<compile_context>
chip_gen: v7x
topology: tpu7x:2x2x1
jax: 0.10.0
libtpu: 0.0.40
codegen_flags: <defaults>
</compile_context>

<pallas_src>
import numpy as np
import jax
import jax.numpy as jnp
from jax import lax
from jax.experimental import pallas as pl
from jax.experimental.pallas import tpu as pltpu


# ----------------------------- GF(2^n) tables --------------------------------
_PRIM_POLY = {4: 0x13, 8: 0x11B}
_GENERATOR = {4: 0x02, 8: 0x03}


def _gf_mul(a, b, poly, n_bits):
    r = 0
    while b:
        if b & 1:
            r ^= a
        b >>= 1
        a <<= 1
        if a & (1 << n_bits):
            a ^= poly
    return r


def get_log_tables(n_bits):
    L = 1 << n_bits
    poly, gen = _PRIM_POLY[n_bits], _GENERATOR[n_bits]
    alog = [0] * L
    log = [0] * L
    x = 1
    for i in range(L - 1):
        alog[i] = x
        log[x] = i
        x = _gf_mul(x, gen, poly, n_bits)
    alog[L - 1] = alog[0]  # wrap-around: g^(L-1) == 1 (dropped via alog[:-1])
    return log, alog


def _popcount(x):
    x = np.asarray(x, dtype=np.int64)
    c = np.zeros_like(x)
    for b in range(16):
        c += (x >> b) & 1
    return c


def build_constants(n_bits):
    """Hadamard matrix + fused DFT/IDFT matrices (log/alog gathers baked in).

    Returns:
      H:     (L, L)  Walsh-Hadamard matrix (entries +-1).
      AF:    (L, 2L) forward transform [A_re | A_im]:
                     x @ AF == [Re | Im] of fft(x[alog[:-1]]) (cols N..L-1 are 0).
      BI_re: (L, L)  inverse transform, real part of z contribution.
      BI_im: (L, L)  inverse transform, imag part of z contribution.
                     z_re @ BI_re + z_im @ BI_im == real(ifft(z))[log[m]] for m>=1
                     (column 0 is 0).
    """
    L = 1 << n_bits
    N = L - 1
    log, alog = get_log_tables(n_bits)
    idx = np.arange(L)
    # Unnormalized Walsh-Hadamard matrix: H[i, j] = (-1)^popcount(i & j)
    H = np.where(_popcount(idx[:, None] & idx[None, :]) % 2 == 0, 1.0, -1.0)

    logv = np.array([log[l] for l in range(1, L)], dtype=np.float64)  # log of 1..L-1
    k = np.arange(N, dtype=np.float64)

    # fft(x[alog[:-1]])[k] = sum_{l>=1} x[l] * exp(-2i*pi*log[l]*k/N)
    A_re = np.zeros((L, L), np.float64)
    A_im = np.zeros((L, L), np.float64)
    ang = -2.0 * np.pi * np.outer(logv, k) / N
    A_re[1:, :N] = np.cos(ang)
    A_im[1:, :N] = np.sin(ang)

    # out[m>=1] = real(ifft(Z))[log[m]] = (1/N) sum_k (Zre*cos - Zim*sin)(2pi*k*log[m]/N)
    B_re = np.zeros((L, L), np.float64)
    B_im = np.zeros((L, L), np.float64)
    angB = 2.0 * np.pi * np.outer(k, logv) / N
    B_re[:N, 1:] = np.cos(angB) / N
    B_im[:N, 1:] = -np.sin(angB) / N

    AF = np.concatenate([A_re, A_im], axis=1)   # (L, 2L)
    return H, AF, B_re, B_im


# ------------------------------- Pallas kernel --------------------------------
def _log_softmax(x):
    m = jnp.max(x, axis=-1, keepdims=True)
    s = x - m
    return s - jnp.log(jnp.sum(jnp.exp(s), axis=-1, keepdims=True))


def _dot(a, b):
    # f32 x f32 MXU matmul with f32 accumulation.  The kernel is HBM-bound, so
    # full-precision matmuls are free (no bf16 rounding of the DFT chain).
    return jnp.dot(a, b, preferred_element_type=jnp.float32)


def _make_kernel(S, L):
    def kernel(masked_ref, alphas_ref, betas_ref,
               h_ref, af_ref, bire_ref, biim_ref, *out_refs):
        ls_masked_ref = out_refs[0]
        ls_alpha_refs = out_refs[1:1 + S]
        ls_beta_refs = out_refs[1 + S:1 + 2 * S]
        target_ref = out_refs[1 + 2 * S]

        Hm = h_ref[...]            # (L, L)   f32
        AF = af_ref[...]           # (L, 2L)  f32
        BIre = bire_ref[...]       # (L, L)   f32
        BIim = biim_ref[...]       # (L, L)   f32

        masked = masked_ref[...]   # (TB, L)  f32
        ls_masked_ref[...] = _log_softmax(masked)

        # --- XOR-group convolution of [masked ; betas] via Walsh-Hadamard ----
        # FFWHT norms fold to c1^(S+1) * c2 = 2^-n_bits = 1/L, applied once.
        # Shares are streamed: each beta tile is loaded once and used for both
        # its log_softmax store and its WHT matmul (low live-data footprint).
        pw = _dot(masked, Hm)
        for s in range(S):
            beta_s = betas_ref[s]                       # (TB, L)
            ls_beta_refs[s][...] = _log_softmax(beta_s)
            pw = pw * _dot(beta_s, Hm)
        betas_conv = _dot(pw, Hm) * np.float32(1.0 / L)  # (TB, L)

        # --- multiplicative-group cross-correlation (torch.fft path) ---------
        # fft over the alog-gathered domain == one matmul with fused [Re | Im].
        bf = _dot(betas_conv, AF)                        # (TB, 2L)
        b_re, b_im = bf[:, :L], bf[:, L:]

        q_re = q_im = aprod = None
        for s in range(S):
            alpha_s = alphas_ref[s]                      # (TB, L)
            ls_alpha_refs[s][...] = _log_softmax(alpha_s)
            a = _dot(alpha_s, AF)                        # un-conjugated alpha fft
            a_re, a_im = a[:, :L], a[:, L:]
            asum_s = jnp.sum(alpha_s, axis=-1, keepdims=True) - alpha_s[:, 0:1]
            if s == 0:
                q_re, q_im, aprod = a_re, a_im, asum_s
            else:
                q_re, q_im = (q_re * a_re - q_im * a_im,
                              q_re * a_im + q_im * a_re)
                aprod = aprod * asum_s                   # (TB, 1)

        # z = conj(prod_s alpha_fft_s) * betas_fft
        z_re = q_re * b_re + q_im * b_im
        z_im = q_re * b_im - q_im * b_re
        # real(ifft(.)) gathered back through the log table; BI split re/im so
        # no (TB, 2L) concatenate copy is materialized.
        tail = _dot(z_re, BIre) + _dot(z_im, BIim)       # (TB, L)

        # element-0 term: betas_conv[:, 0] * prod_s sum_{l>=1} alphas[s, :, l]
        res0 = betas_conv[:, 0:1] * aprod                # (TB, 1)
        lane = lax.broadcasted_iota(jnp.int32, tail.shape, 1)
        res = jnp.where(lane == 0, jnp.broadcast_to(res0, tail.shape), tail)
        target_ref[...] = _log_softmax(res)              # normalize_probs=False path
    return kernel


# ------------------------------- host wrapper ---------------------------------
def _round_up(x, m):
    return ((x + m - 1) // m) * m


def _choose_tile(B, batch_tile):
    b8 = _round_up(max(B, 1), 8)
    TB = min(_round_up(batch_tile, 8), b8)
    if TB >= 256:
        TB = (TB // 256) * 256      # full-length MXU LHS streams (v6e/v7x 256x256)
    TB = max(TB, 8)
    # Prefer >= 2 grid steps for large single-tile batches so the 'parallel'
    # batch axis can shard across both v7x TensorCores.
    if b8 <= TB and b8 >= 64:
        half = _round_up(b8 // 2, 8)
        if half >= 256:
            half = (half // 256) * 256
        TB = max(half, 8)
    return TB


def ascad_recombine_forward(leakages, n_bits=8, batch_tile=512):
    """ASCADRecombine.forward (normalize_probs=False) on TPU via Pallas."""
    L = 1 << n_bits
    alpha_keys = [k for k in leakages if 'alpha' in k]
    beta_keys = [k for k in leakages if 'beta' in k]
    masked_keys = [k for k in leakages if 'masked' in k]
    S = len(alpha_keys)
    assert len(beta_keys) == S and len(masked_keys) == 1
    B = leakages[alpha_keys[0]].shape[0]

    # Share-major stacking [S, B, L]; masked/target stay lane/sublane-dense [B, L].
    p_alpha = jnp.stack([leakages[k] for k in alpha_keys], axis=0).astype(jnp.float32)
    p_beta = jnp.stack([leakages[k] for k in beta_keys], axis=0).astype(jnp.float32)
    masked = leakages[masked_keys[0]].astype(jnp.float32)

    # Batch tile on the sublane axis (multiple of 8; snapped to 256 when large).
    TB = _choose_tile(B, batch_tile)
    Bp = _round_up(B, TB)
    if Bp != B:
        pad = Bp - B
        masked = jnp.pad(masked, ((0, pad), (0, 0)))
        p_alpha = jnp.pad(p_alpha, ((0, 0), (0, pad), (0, 0)))
        p_beta = jnp.pad(p_beta, ((0, 0), (0, pad), (0, 0)))

    H, AF, BIre, BIim = build_constants(n_bits)
    consts = (jnp.asarray(H, jnp.float32),
              jnp.asarray(AF, jnp.float32),
              jnp.asarray(BIre, jnp.float32),
              jnp.asarray(BIim, jnp.float32))

    grid = (Bp // TB,)
    io_spec = pl.BlockSpec((TB, L), lambda b: (b, 0))
    share_spec = pl.BlockSpec((S, TB, L), lambda b: (0, b, 0))
    # Grid-invariant constants: single-buffered (never re-DMA'd between tiles).
    const_spec = lambda shape: pl.BlockSpec(shape, lambda b: (0, 0),
                                            pipeline_mode=pl.Buffered(1))

    grid_spec = pltpu.PrefetchScalarGridSpec(
        num_scalar_prefetch=0,
        grid=grid,
        in_specs=[
            io_spec,                        # masked
            share_spec,                     # alphas (share-major)
            share_spec,                     # betas
            const_spec((L, L)),             # H
            const_spec((L, 2 * L)),         # [A_re | A_im]
            const_spec((L, L)),             # B_re
            const_spec((L, L)),             # B_im
        ],
        # One (Bp, L) output per log-proba so the wrapper never slices shares.
        out_specs=[io_spec] * (2 * S + 2),
    )
    out_shapes = tuple(jax.ShapeDtypeStruct((Bp, L), jnp.float32)
                       for _ in range(2 * S + 2))

    # Explicit VMEM budget: double-buffered IO + single-buffered constants
    # + headroom for live (TB, L)/(TB, 2L) f32 temps.  Capped under the v7x
    # 64 MiB physical budget; well within v5e/v6e 128 MiB.
    vmem_est = (2 * (4 * S + 3) * TB * L * 4      # in/out blocks, double-buffered
                + 5 * L * L * 4                   # constants, single-buffered
                + 24 * TB * L * 4)                # live temporaries
    vmem_limit = int(min(max(vmem_est * 3 // 2, 16 << 20), 56 << 20))

    cost = pl.CostEstimate(
        flops=int(2 * Bp * L * L * (3 * S + 6)),
        transcendentals=int(Bp * L * (2 * S + 3)),
        bytes_accessed=int(4 * Bp * L * (4 * S + 3) + 4 * 5 * L * L),
    )
    outs = pl.pallas_call(
        _make_kernel(S, L),
        out_shape=out_shapes,
        grid_spec=grid_spec,
        compiler_params=pltpu.CompilerParams(
            dimension_semantics=("parallel",),
            vmem_limit_bytes=vmem_limit),
        cost_estimate=cost,
    )(masked, p_alpha, p_beta, *consts)

    ls_masked = outs[0]
    ls_alphas = outs[1:1 + S]
    ls_betas = outs[1 + S:1 + 2 * S]
    target = outs[1 + 2 * S]

    unpad = (lambda x: x) if Bp == B else (lambda x: x[:B])
    log_probas = {}
    for k in leakages:  # preserve input dict order
        if 'alpha' in k:
            log_probas[k] = unpad(ls_alphas[alpha_keys.index(k)])
        elif 'beta' in k:
            log_probas[k] = unpad(ls_betas[beta_keys.index(k)])
        else:
            log_probas[k] = unpad(ls_masked)
    log_probas['target_' + masked_keys[0].split('_')[1]] = unpad(target)
    return log_probas


# ------------------------- numpy (float64) reference ---------------------------
def _log_softmax_np(x):
    m = x.max(axis=-1, keepdims=True)
    s = x - m
    return s - np.log(np.exp(s).sum(axis=-1, keepdims=True))


def reference_forward(leakages, n_bits):
    log, alog = get_log_tables(n_bits)
    H, *_ = build_constants(n_bits)
    lk = {k: np.asarray(v, np.float64) for k, v in leakages.items()}
    out = {k: _log_softmax_np(v) for k, v in lk.items()}
    alphas = np.stack([v for k, v in lk.items() if 'alpha' in k], axis=1)
    betas = np.stack([v for k, v in lk.items() if 'beta' in k], axis=1)
    S = alphas.shape[1]
    for mk, masked in [(k, v) for k, v in lk.items() if 'masked' in k]:
        stacked = np.concatenate([masked[:, None, :], betas], axis=1)      # [B,S+1,L]
        w1 = (stacked @ H) * (2.0 ** (-n_bits / (S + 1) / 2.0))
        pw = np.prod(w1, axis=1, keepdims=True)
        betas_conv = ((pw @ H) * (2.0 ** (-n_bits / 2.0)))[:, 0, :]        # [B,L]
        alog_idx = np.array(alog[:-1])
        betas_fft = np.fft.fft(betas_conv[:, alog_idx], axis=-1)
        alphas_fft = np.conj(np.fft.fft(alphas[:, :, alog_idx], axis=-1))
        aprod = alphas_fft[:, 0, :]
        for s in range(1, S):
            aprod = aprod * alphas_fft[:, s, :]
        prod_alog = np.fft.ifft(aprod * betas_fft, axis=-1).real
        prod = prod_alog[:, np.array(log[1:])]
        res0 = betas_conv[:, :1] * np.prod(
            alphas[:, :, 1:].sum(axis=-1, keepdims=True), axis=1)
        res = np.concatenate([res0, prod], axis=-1)
        out['target_' + mk.split('_')[1]] = _log_softmax_np(res)
    return out


if __name__ == "__main__":
    n_bits = 8
    L = 1 << n_bits
    B = 37  # small, non-multiple of the tile -> exercises the padding path
    names = ['alpha_0', 'alpha_1', 'beta_0', 'beta_1', 'masked_0']
    key = jax.random.PRNGKey(0)
    keys = jax.random.split(key, len(names))
    leakages = {}
    for name, k in zip(names, keys):
        logits = jax.random.normal(k, (B, L), dtype=jnp.float32)
        # probability-like inputs (semantics unchanged; numerically benign)
        leakages[name] = jax.nn.softmax(logits, axis=-1)

    # batch_tile=16 -> TB=16, padded batch 48, grid=(3,): exercises the multi-tile
    # grid and the grid-invariant, single-buffered constants at small demo scale.
    out = ascad_recombine_forward(leakages, n_bits=n_bits, batch_tile=16)
    out = jax.block_until_ready(out)

    ref = reference_forward({k: np.asarray(v) for k, v in leakages.items()}, n_bits)
    for k in ref:
        np.testing.assert_allclose(np.asarray(out[k]), ref[k], rtol=5e-3, atol=5e-3)
    print("KERNEL_OK")
</pallas_src>

<mosaic_0001>
module attributes {stable_mosaic.version = 11 : i64} {
  func.func @kernel(%arg0: i32, %arg1: memref<16x256xf32, #tpu.memory_space<vmem>>, %arg2: memref<2x16x256xf32, #tpu.memory_space<vmem>>, %arg3: memref<2x16x256xf32, #tpu.memory_space<vmem>>, %arg4: memref<256x256xf32, #tpu.memory_space<vmem>>, %arg5: memref<256x512xf32, #tpu.memory_space<vmem>>, %arg6: memref<256x256xf32, #tpu.memory_space<vmem>>, %arg7: memref<256x256xf32, #tpu.memory_space<vmem>>, %arg8: memref<16x256xf32, #tpu.memory_space<vmem>>, %arg9: memref<16x256xf32, #tpu.memory_space<vmem>>, %arg10: memref<16x256xf32, #tpu.memory_space<vmem>>, %arg11: memref<16x256xf32, #tpu.memory_space<vmem>>, %arg12: memref<16x256xf32, #tpu.memory_space<vmem>>, %arg13: memref<16x256xf32, #tpu.memory_space<vmem>>) attributes {dimension_semantics = [#tpu.dimension_semantics<parallel>], iteration_bounds = array<i64: 3>, scalar_prefetch = 0 : i64, scratch_operands = 0 : i64, tpu.core_type = #tpu.core_type<tc>, window_params = [{transform_indices = @transform_0, window_bounds = array<i64: 16, 256>}, {transform_indices = @transform_1, window_bounds = array<i64: 2, 16, 256>}, {transform_indices = @transform_2, window_bounds = array<i64: 2, 16, 256>}, {pipeline_mode = #tpu.pipeline_mode<synchronous>, transform_indices = @transform_3, window_bounds = array<i64: 256, 256>}, {pipeline_mode = #tpu.pipeline_mode<synchronous>, transform_indices = @transform_4, window_bounds = array<i64: 256, 512>}, {pipeline_mode = #tpu.pipeline_mode<synchronous>, transform_indices = @transform_5, window_bounds = array<i64: 256, 256>}, {pipeline_mode = #tpu.pipeline_mode<synchronous>, transform_indices = @transform_6, window_bounds = array<i64: 256, 256>}, {transform_indices = @transform_7, window_bounds = array<i64: 16, 256>}, {transform_indices = @transform_8, window_bounds = array<i64: 16, 256>}, {transform_indices = @transform_9, window_bounds = array<i64: 16, 256>}, {transform_indices = @transform_10, window_bounds = array<i64: 16, 256>}, {transform_indices = @transform_11, window_bounds = array<i64: 16, 256>}, {transform_indices = @transform_12, window_bounds = array<i64: 16, 256>}]} {
    %c0 = arith.constant 0 : index
    %c0_0 = arith.constant 0 : index
    %0 = vector.load %arg4[%c0, %c0_0] : memref<256x256xf32, #tpu.memory_space<vmem>>, vector<256x256xf32>
    %c0_1 = arith.constant 0 : index
    %c0_2 = arith.constant 0 : index
    %1 = vector.load %arg5[%c0_1, %c0_2] : memref<256x512xf32, #tpu.memory_space<vmem>>, vector<256x512xf32>
    %c0_3 = arith.constant 0 : index
    %c0_4 = arith.constant 0 : index
    %2 = vector.load %arg6[%c0_3, %c0_4] : memref<256x256xf32, #tpu.memory_space<vmem>>, vector<256x256xf32>
    %c0_5 = arith.constant 0 : index
    %c0_6 = arith.constant 0 : index
    %3 = vector.load %arg7[%c0_5, %c0_6] : memref<256x256xf32, #tpu.memory_space<vmem>>, vector<256x256xf32>
    %c0_7 = arith.constant 0 : index
    %c0_8 = arith.constant 0 : index
    %4 = vector.load %arg1[%c0_7, %c0_8] : memref<16x256xf32, #tpu.memory_space<vmem>>, vector<16x256xf32>
    %cst = arith.constant dense<0xFF800000> : vector<16xf32>
    %5 = vector.multi_reduction <maximumf>, %4, %cst [1] : vector<16x256xf32> to vector<16xf32>
    %6 = vector.shape_cast %5 : vector<16xf32> to vector<16x1xf32>
    %7 = vector.broadcast %6 : vector<16x1xf32> to vector<16x256xf32>
    %8 = arith.subf %4, %7 : vector<16x256xf32>
    %9 = math.exp %8 : vector<16x256xf32>
    %cst_9 = arith.constant dense<0.000000e+00> : vector<16xf32>
    %10 = vector.multi_reduction <add>, %9, %cst_9 [1] : vector<16x256xf32> to vector<16xf32>
    %11 = vector.shape_cast %10 : vector<16xf32> to vector<16x1xf32>
    %12 = math.log %11 : vector<16x1xf32>
    %13 = vector.broadcast %12 : vector<16x1xf32> to vector<16x256xf32>
    %14 = arith.subf %8, %13 : vector<16x256xf32>
    %c0_10 = arith.constant 0 : index
    %c0_11 = arith.constant 0 : index
    %15 = vector.load %arg8[%c0_10, %c0_11] : memref<16x256xf32, #tpu.memory_space<vmem>>, vector<16x256xf32>
    tpu.vector_store %arg8[%c0_10, %c0_11], %14 {strides = array<i32>} : memref<16x256xf32, #tpu.memory_space<vmem>>, vector<16x256xf32>,
    %cst_12 = arith.constant dense<0.000000e+00> : vector<16x256xf32>
    %16 = tpu.matmul %4, %0, %cst_12 {dimension_numbers = #tpu.dot_dimension_numbers<[1], [0], [0], [1], [0, 0, 1, 1], [], []>} : vector<16x256xf32>, vector<256x256xf32>, vector<16x256xf32> -> vector<16x256xf32>
    %c0_13 = arith.constant 0 : index
    %c0_14 = arith.constant 0 : index
    %c0_15 = arith.constant 0 : index
    %17 = vector.load %arg3[%c0_13, %c0_14, %c0_15] : memref<2x16x256xf32, #tpu.memory_space<vmem>>, vector<1x16x256xf32>
    %18 = vector.shape_cast %17 : vector<1x16x256xf32> to vector<16x256xf32>
    %cst_16 = arith.constant dense<0xFF800000> : vector<16xf32>
    %19 = vector.multi_reduction <maximumf>, %18, %cst_16 [1] : vector<16x256xf32> to vector<16xf32>
    %20 = vector.shape_cast %19 : vector<16xf32> to vector<16x1xf32>
    %21 = vector.broadcast %20 : vector<16x1xf32> to vector<16x256xf32>
    %22 = arith.subf %18, %21 : vector<16x256xf32>
    %23 = math.exp %22 : vector<16x256xf32>
    %cst_17 = arith.constant dense<0.000000e+00> : vector<16xf32>
    %24 = vector.multi_reduction <add>, %23, %cst_17 [1] : vector<16x256xf32> to vector<16xf32>
    %25 = vector.shape_cast %24 : vector<16xf32> to vector<16x1xf32>
    %26 = math.log %25 : vector<16x1xf32>
    %27 = vector.broadcast %26 : vector<16x1xf32> to vector<16x256xf32>
    %28 = arith.subf %22, %27 : vector<16x256xf32>
    %c0_18 = arith.constant 0 : index
    %c0_19 = arith.constant 0 : index
    %29 = vector.load %arg11[%c0_18, %c0_19] : memref<16x256xf32, #tpu.memory_space<vmem>>, vector<16x256xf32>
    tpu.vector_store %arg11[%c0_18, %c0_19], %28 {strides = array<i32>} : memref<16x256xf32, #tpu.memory_space<vmem>>, vector<16x256xf32>,
    %cst_20 = arith.constant dense<0.000000e+00> : vector<16x256xf32>
    %30 = tpu.matmul %18, %0, %cst_20 {dimension_numbers = #tpu.dot_dimension_numbers<[1], [0], [0], [1], [0, 0, 1, 1], [], []>} : vector<16x256xf32>, vector<256x256xf32>, vector<16x256xf32> -> vector<16x256xf32>
    %31 = arith.mulf %16, %30 : vector<16x256xf32>
    %c1 = arith.constant 1 : index
    %c0_21 = arith.constant 0 : index
    %c0_22 = arith.constant 0 : index
    %32 = vector.load %arg3[%c1, %c0_21, %c0_22] : memref<2x16x256xf32, #tpu.memory_space<vmem>>, vector<1x16x256xf32>
    %33 = vector.shape_cast %32 : vector<1x16x256xf32> to vector<16x256xf32>
    %cst_23 = arith.constant dense<0xFF800000> : vector<16xf32>
    %34 = vector.multi_reduction <maximumf>, %33, %cst_23 [1] : vector<16x256xf32> to vector<16xf32>
    %35 = vector.shape_cast %34 : vector<16xf32> to vector<16x1xf32>
    %36 = vector.broadcast %35 : vector<16x1xf32> to vector<16x256xf32>
    %37 = arith.subf %33, %36 : vector<16x256xf32>
    %38 = math.exp %37 : vector<16x256xf32>
    %cst_24 = arith.constant dense<0.000000e+00> : vector<16xf32>
    %39 = vector.multi_reduction <add>, %38, %cst_24 [1] : vector<16x256xf32> to vector<16xf32>
    %40 = vector.shape_cast %39 : vector<16xf32> to vector<16x1xf32>
    %41 = math.log %40 : vector<16x1xf32>
    %42 = vector.broadcast %41 : vector<16x1xf32> to vector<16x256xf32>
    %43 = arith.subf %37, %42 : vector<16x256xf32>
    %c0_25 = arith.constant 0 : index
    %c0_26 = arith.constant 0 : index
    %44 = vector.load %arg12[%c0_25, %c0_26] : memref<16x256xf32, #tpu.memory_space<vmem>>, vector<16x256xf32>
    tpu.vector_store %arg12[%c0_25, %c0_26], %43 {strides = array<i32>} : memref<16x256xf32, #tpu.memory_space<vmem>>, vector<16x256xf32>,
    %cst_27 = arith.constant dense<0.000000e+00> : vector<16x256xf32>
    %45 = tpu.matmul %33, %0, %cst_27 {dimension_numbers = #tpu.dot_dimension_numbers<[1], [0], [0], [1], [0, 0, 1, 1], [], []>} : vector<16x256xf32>, vector<256x256xf32>, vector<16x256xf32> -> vector<16x256xf32>
    %46 = arith.mulf %31, %45 : vector<16x256xf32>
    %cst_28 = arith.constant dense<0.000000e+00> : vector<16x256xf32>
    %47 = tpu.matmul %46, %0, %cst_28 {dimension_numbers = #tpu.dot_dimension_numbers<[1], [0], [0], [1], [0, 0, 1, 1], [], []>} : vector<16x256xf32>, vector<256x256xf32>, vector<16x256xf32> -> vector<16x256xf32>
    %cst_29 = arith.constant 3.906250e-03 : f32
    %48 = vector.broadcast %cst_29 : f32 to vector<16x256xf32>
    %49 = arith.mulf %47, %48 : vector<16x256xf32>
    %cst_30 = arith.constant dense<0.000000e+00> : vector<16x512xf32>
    %50 = tpu.matmul %49, %1, %cst_30 {dimension_numbers = #tpu.dot_dimension_numbers<[1], [0], [0], [1], [0, 0, 1, 1], [], []>} : vector<16x256xf32>, vector<256x512xf32>, vector<16x512xf32> -> vector<16x512xf32>
    %51 = vector.extract_strided_slice %50 {offsets = [0, 0], sizes = [16, 256], strides = [1, 1]} : vector<16x512xf32> to vector<16x256xf32>
    %52 = vector.extract_strided_slice %50 {offsets = [0, 256], sizes = [16, 256], strides = [1, 1]} : vector<16x512xf32> to vector<16x256xf32>
    %c0_31 = arith.constant 0 : index
    %c0_32 = arith.constant 0 : index
    %c0_33 = arith.constant 0 : index
    %53 = vector.load %arg2[%c0_31, %c0_32, %c0_33] : memref<2x16x256xf32, #tpu.memory_space<vmem>>, vector<1x16x256xf32>
    %54 = vector.shape_cast %53 : vector<1x16x256xf32> to vector<16x256xf32>
    %cst_34 = arith.constant dense<0xFF800000> : vector<16xf32>
    %55 = vector.multi_reduction <maximumf>, %54, %cst_34 [1] : vector<16x256xf32> to vector<16xf32>
    %56 = vector.shape_cast %55 : vector<16xf32> to vector<16x1xf32>
    %57 = vector.broadcast %56 : vector<16x1xf32> to vector<16x256xf32>
    %58 = arith.subf %54, %57 : vector<16x256xf32>
    %59 = math.exp %58 : vector<16x256xf32>
    %cst_35 = arith.constant dense<0.000000e+00> : vector<16xf32>
    %60 = vector.multi_reduction <add>, %59, %cst_35 [1] : vector<16x256xf32> to vector<16xf32>
    %61 = vector.shape_cast %60 : vector<16xf32> to vector<16x1xf32>
    %62 = math.log %61 : vector<16x1xf32>
    %63 = vector.broadcast %62 : vector<16x1xf32> to vector<16x256xf32>
    %64 = arith.subf %58, %63 : vector<16x256xf32>
    %c0_36 = arith.constant 0 : index
    %c0_37 = arith.constant 0 : index
    %65 = vector.load %arg9[%c0_36, %c0_37] : memref<16x256xf32, #tpu.memory_space<vmem>>, vector<16x256xf32>
    tpu.vector_store %arg9[%c0_36, %c0_37], %64 {strides = array<i32>} : memref<16x256xf32, #tpu.memory_space<vmem>>, vector<16x256xf32>,
    %cst_38 = arith.constant dense<0.000000e+00> : vector<16x512xf32>
    %66 = tpu.matmul %54, %1, %cst_38 {dimension_numbers = #tpu.dot_dimension_numbers<[1], [0], [0], [1], [0, 0, 1, 1], [], []>} : vector<16x256xf32>, vector<256x512xf32>, vector<16x512xf32> -> vector<16x512xf32>
    %67 = vector.extract_strided_slice %66 {offsets = [0, 0], sizes = [16, 256], strides = [1, 1]} : vector<16x512xf32> to vector<16x256xf32>
    %68 = vector.extract_strided_slice %66 {offsets = [0, 256], sizes = [16, 256], strides = [1, 1]} : vector<16x512xf32> to vector<16x256xf32>
    %cst_39 = arith.constant dense<0.000000e+00> : vector<16xf32>
    %69 = vector.multi_reduction <add>, %54, %cst_39 [1] : vector<16x256xf32> to vector<16xf32>
    %70 = vector.shape_cast %69 : vector<16xf32> to vector<16x1xf32>
    %71 = vector.extract_strided_slice %54 {offsets = [0, 0], sizes = [16, 1], strides = [1, 1]} : vector<16x256xf32> to vector<16x1xf32>
    %72 = arith.subf %70, %71 : vector<16x1xf32>
    %c1_40 = arith.constant 1 : index
    %c0_41 = arith.constant 0 : index
    %c0_42 = arith.constant 0 : index
    %73 = vector.load %arg2[%c1_40, %c0_41, %c0_42] : memref<2x16x256xf32, #tpu.memory_space<vmem>>, vector<1x16x256xf32>
    %74 = vector.shape_cast %73 : vector<1x16x256xf32> to vector<16x256xf32>
    %cst_43 = arith.constant dense<0xFF800000> : vector<16xf32>
    %75 = vector.multi_reduction <maximumf>, %74, %cst_43 [1] : vector<16x256xf32> to vector<16xf32>
    %76 = vector.shape_cast %75 : vector<16xf32> to vector<16x1xf32>
    %77 = vector.broadcast %76 : vector<16x1xf32> to vector<16x256xf32>
    %78 = arith.subf %74, %77 : vector<16x256xf32>
    %79 = math.exp %78 : vector<16x256xf32>
    %cst_44 = arith.constant dense<0.000000e+00> : vector<16xf32>
    %80 = vector.multi_reduction <add>, %79, %cst_44 [1] : vector<16x256xf32> to vector<16xf32>
    %81 = vector.shape_cast %80 : vector<16xf32> to vector<16x1xf32>
    %82 = math.log %81 : vector<16x1xf32>
    %83 = vector.broadcast %82 : vector<16x1xf32> to vector<16x256xf32>
    %84 = arith.subf %78, %83 : vector<16x256xf32>
    %c0_45 = arith.constant 0 : index
    %c0_46 = arith.constant 0 : index
    %85 = vector.load %arg10[%c0_45, %c0_46] : memref<16x256xf32, #tpu.memory_space<vmem>>, vector<16x256xf32>
    tpu.vector_store %arg10[%c0_45, %c0_46], %84 {strides = array<i32>} : memref<16x256xf32, #tpu.memory_space<vmem>>, vector<16x256xf32>,
    %cst_47 = arith.constant dense<0.000000e+00> : vector<16x512xf32>
    %86 = tpu.matmul %74, %1, %cst_47 {dimension_numbers = #tpu.dot_dimension_numbers<[1], [0], [0], [1], [0, 0, 1, 1], [], []>} : vector<16x256xf32>, vector<256x512xf32>, vector<16x512xf32> -> vector<16x512xf32>
    %87 = vector.extract_strided_slice %86 {offsets = [0, 0], sizes = [16, 256], strides = [1, 1]} : vector<16x512xf32> to vector<16x256xf32>
    %88 = vector.extract_strided_slice %86 {offsets = [0, 256], sizes = [16, 256], strides = [1, 1]} : vector<16x512xf32> to vector<16x256xf32>
    %cst_48 = arith.constant dense<0.000000e+00> : vector<16xf32>
    %89 = vector.multi_reduction <add>, %74, %cst_48 [1] : vector<16x256xf32> to vector<16xf32>
    %90 = vector.shape_cast %89 : vector<16xf32> to vector<16x1xf32>
    %91 = vector.extract_strided_slice %74 {offsets = [0, 0], sizes = [16, 1], strides = [1, 1]} : vector<16x256xf32> to vector<16x1xf32>
    %92 = arith.subf %90, %91 : vector<16x1xf32>
    %93 = arith.mulf %67, %87 : vector<16x256xf32>
    %94 = arith.mulf %68, %88 : vector<16x256xf32>
    %95 = arith.subf %93, %94 : vector<16x256xf32>
    %96 = arith.mulf %67, %88 : vector<16x256xf32>
    %97 = arith.mulf %68, %87 : vector<16x256xf32>
    %98 = arith.addf %96, %97 : vector<16x256xf32>
    %99 = arith.mulf %72, %92 : vector<16x1xf32>
    %100 = arith.mulf %95, %51 : vector<16x256xf32>
    %101 = arith.mulf %98, %52 : vector<16x256xf32>
    %102 = arith.addf %100, %101 : vector<16x256xf32>
    %103 = arith.mulf %95, %52 : vector<16x256xf32>
    %104 = arith.mulf %98, %51 : vector<16x256xf32>
    %105 = arith.subf %103, %104 : vector<16x256xf32>
    %cst_49 = arith.constant dense<0.000000e+00> : vector<16x256xf32>
    %106 = tpu.matmul %102, %2, %cst_49 {dimension_numbers = #tpu.dot_dimension_numbers<[1], [0], [0], [1], [0, 0, 1, 1], [], []>} : vector<16x256xf32>, vector<256x256xf32>, vector<16x256xf32> -> vector<16x256xf32>
    %cst_50 = arith.constant dense<0.000000e+00> : vector<16x256xf32>
    %107 = tpu.matmul %105, %3, %cst_50 {dimension_numbers = #tpu.dot_dimension_numbers<[1], [0], [0], [1], [0, 0, 1, 1], [], []>} : vector<16x256xf32>, vector<256x256xf32>, vector<16x256xf32> -> vector<16x256xf32>
    %108 = arith.addf %106, %107 : vector<16x256xf32>
    %109 = vector.extract_strided_slice %49 {offsets = [0, 0], sizes = [16, 1], strides = [1, 1]} : vector<16x256xf32> to vector<16x1xf32>
    %110 = arith.mulf %109, %99 : vector<16x1xf32>
    %111 = tpu.iota {dimensions = array<i32: 1>} : vector<16x256xi32>
    %c0_i32 = arith.constant 0 : i32
    %112 = vector.broadcast %c0_i32 : i32 to vector<16x256xi32>
    %113 = arith.cmpi eq, %111, %112 : vector<16x256xi32>
    %114 = vector.shape_cast %110 : vector<16x1xf32> to vector<16x1xf32>
    %115 = vector.broadcast %114 : vector<16x1xf32> to vector<16x256xf32>
    %116 = arith.select %113, %115, %108 : vector<16x256xi1>, vector<16x256xf32>
    %cst_51 = arith.constant dense<0xFF800000> : vector<16xf32>
    %117 = vector.multi_reduction <maximumf>, %116, %cst_51 [1] : vector<16x256xf32> to vector<16xf32>
    %118 = vector.shape_cast %117 : vector<16xf32> to vector<16x1xf32>
    %119 = vector.broadcast %118 : vector<16x1xf32> to vector<16x256xf32>
    %120 = arith.subf %116, %119 : vector<16x256xf32>
    %121 = math.exp %120 : vector<16x256xf32>
    %cst_52 = arith.constant dense<0.000000e+00> : vector<16xf32>
    %122 = vector.multi_reduction <add>, %121, %cst_52 [1] : vector<16x256xf32> to vector<16xf32>
    %123 = vector.shape_cast %122 : vector<16xf32> to vector<16x1xf32>
    %124 = math.log %123 : vector<16x1xf32>
    %125 = vector.broadcast %124 : vector<16x1xf32> to vector<16x256xf32>
    %126 = arith.subf %120, %125 : vector<16x256xf32>
    %c0_53 = arith.constant 0 : index
    %c0_54 = arith.constant 0 : index
    %127 = vector.load %arg13[%c0_53, %c0_54] : memref<16x256xf32, #tpu.memory_space<vmem>>, vector<16x256xf32>
    tpu.vector_store %arg13[%c0_53, %c0_54], %126 {strides = array<i32>} : memref<16x256xf32, #tpu.memory_space<vmem>>, vector<16x256xf32>,
    return
  }
  func.func @transform_0(%arg0: i32) -> (i32, i32) {
    %c0_i32 = arith.constant 0 : i32
    %c0_i32_0 = arith.constant 0 : i32
    return %arg0, %c0_i32 : i32, i32
  }
  func.func @transform_1(%arg0: i32) -> (i32, i32, i32) {
    %c0_i32 = arith.constant 0 : i32
    %c0_i32_0 = arith.constant 0 : i32
    %c0_i32_1 = arith.constant 0 : i32
    return %c0_i32, %arg0, %c0_i32_0 : i32, i32, i32
  }
  func.func @transform_2(%arg0: i32) -> (i32, i32, i32) {
    %c0_i32 = arith.constant 0 : i32
    %c0_i32_0 = arith.constant 0 : i32
    %c0_i32_1 = arith.constant 0 : i32
    return %c0_i32, %arg0, %c0_i32_0 : i32, i32, i32
  }
  func.func @transform_3(%arg0: i32) -> (i32, i32) {
    %c0_i32 = arith.constant 0 : i32
    %c0_i32_0 = arith.constant 0 : i32
    %c0_i32_1 = arith.constant 0 : i32
    return %c0_i32, %c0_i32_0 : i32, i32
  }
  func.func @transform_4(%arg0: i32) -> (i32, i32) {
    %c0_i32 = arith.constant 0 : i32
    %c0_i32_0 = arith.constant 0 : i32
    %c0_i32_1 = arith.constant 0 : i32
    return %c0_i32, %c0_i32_0 : i32, i32
  }
  func.func @transform_5(%arg0: i32) -> (i32, i32) {
    %c0_i32 = arith.constant 0 : i32
    %c0_i32_0 = arith.constant 0 : i32
    %c0_i32_1 = arith.constant 0 : i32
    return %c0_i32, %c0_i32_0 : i32, i32
  }
  func.func @transform_6(%arg0: i32) -> (i32, i32) {
    %c0_i32 = arith.constant 0 : i32
    %c0_i32_0 = arith.constant 0 : i32
    %c0_i32_1 = arith.constant 0 : i32
    return %c0_i32, %c0_i32_0 : i32, i32
  }
  func.func @transform_7(%arg0: i32) -> (i32, i32) {
    %c0_i32 = arith.constant 0 : i32
    %c0_i32_0 = arith.constant 0 : i32
    return %arg0, %c0_i32 : i32, i32
  }
  func.func @transform_8(%arg0: i32) -> (i32, i32) {
    %c0_i32 = arith.constant 0 : i32
    %c0_i32_0 = arith.constant 0 : i32
    return %arg0, %c0_i32 : i32, i32
  }
  func.func @transform_9(%arg0: i32) -> (i32, i32) {
    %c0_i32 = arith.constant 0 : i32
    %c0_i32_0 = arith.constant 0 : i32
    return %arg0, %c0_i32 : i32, i32
  }
  func.func @transform_10(%arg0: i32) -> (i32, i32) {
    %c0_i32 = arith.constant 0 : i32
    %c0_i32_0 = arith.constant 0 : i32
    return %arg0, %c0_i32 : i32, i32
  }
  func.func @transform_11(%arg0: i32) -> (i32, i32) {
    %c0_i32 = arith.constant 0 : i32
    %c0_i32_0 = arith.constant 0 : i32
    return %arg0, %c0_i32 : i32, i32
  }
  func.func @transform_12(%arg0: i32) -> (i32, i32) {
    %c0_i32 = arith.constant 0 : i32
    %c0_i32_0 = arith.constant 0 : i32
    return %arg0, %c0_i32 : i32, i32
  }
}

</mosaic_0001>

<bundles_post_ra>
// kernel: tpu_custom_call.1
= control target key start
LH: loop header
LB: loop body
LE: loop exit
PB: predicated region body
PF: predicated region fallthrough
CT: control target
= control target key end

     0   :  { %s5651_s0 = inlined_call_operand.hbm [shape: f32[48,256], index: 0, kind: input, shape index: {}]   ;;  %s5652_s1 = inlined_call_operand.hbm [shape: f32[2,48,256], index: 1, kind: input, shape index: {}]   ;;  %s5653_s2 = inlined_call_operand.hbm [shape: f32[2,48,256], index: 2, kind: input, shape index: {}]   ;;  %s5654_s3 = inlined_call_operand.hbm [shape: f32[256,256], index: 3, kind: input, shape index: {}]   ;;  %s5655_s4 = inlined_call_operand.hbm [shape: f32[256,512], index: 4, kind: input, shape index: {}]   ;;  %s5656_s5 = inlined_call_operand.hbm [shape: f32[256,256], index: 5, kind: input, shape index: {}]   ;;  %s5657_s6 = inlined_call_operand.hbm [shape: f32[256,256], index: 6, kind: input, shape index: {}]   ;;  %s5658_s7 = inlined_call_operand.hbm [shape: f32[48,256], index: 7, kind: output, shape index: {0}]   ;;  %s5659_s8 = inlined_call_operand.hbm [shape: f32[48,256], index: 8, kind: output, shape index: {1}]   ;;  %s5660_s9 = inlined_call_operand.hbm [shape: f32[48,256], index: 9, kind: output, shape index: {2}]   ;;  %s5661_s10 = inlined_call_operand.hbm [shape: f32[48,256], index: 10, kind: output, shape index: {3}]   ;;  %s5662_s11 = inlined_call_operand.hbm [shape: f32[48,256], index: 11, kind: output, shape index: {4}]   ;;  %s5663_s12 = inlined_call_operand.hbm [shape: f32[48,256], index: 12, kind: output, shape index: {5}]  }
   0x1   :  { %5734 = sst [smem:[#allocation68_spill]] %s5651_s0 }
   0x2   :  { %5735 = sst [smem:[#allocation69_spill]] %s5652_s1 }
   0x3   :  { %5736 = sst [smem:[#allocation70_spill]] %s5653_s2 }
   0x4   :  { %5737 = sst [smem:[#allocation71_spill]] %s5654_s3 }
   0x5   :  { %5738 = sst [smem:[#allocation72_spill]] %s5655_s4 }
   0x6   :  { %5739 = sst [smem:[#allocation73_spill]] %s5656_s5 }
   0x7   :  { %5740 = sst [smem:[#allocation74_spill]] %s5658_s7 }
   0x8   :  { %5741 = sst [smem:[#allocation75_spill]] %s5660_s9 }
   0x9   :  { %5742 = sst [smem:[#allocation76_spill]] %s5661_s10 }
   0xa   :  { %5743 = sst [smem:[#allocation77_spill]] %s5662_s11 }
   0xb   :  { %5744 = sst [smem:[#allocation78_spill]] %s5663_s12 }
   0xc   :  { %18 = vsyncpa [#allocation3], 0 }
   0xd   :  { %20 = vsyncpa [#allocation3 + $0x1], 0 }
   0xe   :  { %21 = vsyncpa [#allocation6], 0 }
   0xf   :  { %23 = vsyncpa [#allocation6 + $0x1], 0 }
  0x10   :  { %24 = vsyncpa [#allocation9], 0 }
  0x11   :  { %25 = vsyncpa [#allocation12], 0 }
  0x12   :  { %26 = vsyncpa [#allocation4], 0 }
  0x13   :  { %28 = vsyncpa [#allocation4 + $0x1], 0 }
  0x14   :  { %29 = vsyncpa [#allocation16], 0 }
  0x15   :  { %31 = vsyncpa [#allocation16 + $0x1], 0 }
  0x16   :  { %32 = vsyncpa [#allocation19], 0 }
  0x17   :  { %34 = vsyncpa [#allocation19 + $0x1], 0 }
  0x18   :  { %35 = vsyncpa [#allocation22], 0 }
  0x19   :  { %37 = vsyncpa [#allocation22 + $0x1], 0  ;;  %s4258_s21 = smov 0   ;;  %s4260_s22 = smov 0  }
  0x1a   :  { %s4262_s23 = smov 0   ;;  %s4264_s24 = smov 0  }
  0x1b LB: > { %5745 = sst [smem:[#allocation37_spill]] %s4147_s21  ;;  %s4279_s25 = sadd.s32 4294967295, %s4159_s24   ;;  %s4159_s24 = sphi %s4264_s24, %s5839_s24   ;;  %s4155_s23 = sphi %s4262_s23, %s5843_s23   ;;  %s4151_s22 = sphi %s4260_s22, %s5842_s22   ;;  %s4147_s21 = sphi %s4258_s21, %s5841_s21  }
  0x1c   : > { %s5664_s26 = sadd.s32 4294967294, %s4159_s24   ;;  %s4283_s27 = sadd.s32 1, %s4159_s24  }
  0x1d   : > { %5746 = sst [smem:[#allocation38_spill]] %s4283_s27  ;;  %s50_s28 = sadd.s32 1, %s4155_s23 }
  0x1e   : > { %s47_s29 = ssub.s32 %s4159_s24, %s4283_s27  ;;  %p57_p0 = scmp.ne.s32.totalorder %s4155_s23, %s4151_s22 }
  0x1f   : > { %p48_p1 = scmp.eq.s32.totalorder %s47_s29, 0  ;;  %p58_p2 = scmp.eq.s32.totalorder %s4159_s24, 0 }
  0x20   : > { %p63_p3 = scmp.ne.s32.totalorder %s4151_s22, %s4147_s21  ;;  %p5670_p4 = scmp.eq.s32.totalorder %s4279_s25, 0 }
  0x21   : > { %s4295_s30 = scalar_select %p48_p1, %s4155_s23, %s50_s28  }
  0x22   : > { %p4297_p5 = por %p58_p2, %p57_p0  ;;  %p4303_p6 = por %p5670_p4, %p63_p3 }
  0x23   : > { %5747 = sst [smem:[#allocation39_spill]] %s4295_s30  ;;  %p223_p7 = scmp.eq.s32.totalorder %s4279_s25, 2 }
  0x24   : > { %s5748_s13 = scalar_select %p4297_p5, 1, 0 }
  0x25   : > { %s5749_s14 = scalar_select %p4303_p6, 1, 0 }
  0x26   : > { %p229_p8 = scmp.eq.s32.totalorder %s5664_s26, 2  ;;  %p2689_p9 = scmp.ge.s32.totalorder %s4159_s24, 1 }
  0x27   : > { %p366_p10 = scmp.lt.s32.totalorder %s4159_s24, 4  ;;  %p4312_p11 = por %p223_p7, %p57_p0 }
  0x28   : > { %p4316_p12 = por %p229_p8, %p63_p3  ;;  %s4161_s18 = smov [#allocation8]  }
  0x29   : > { %s5750_s15 = scalar_select %p4312_p11, 1, 0 }
  0x2a   : > { %s5751_s16 = scalar_select %p4316_p12, 1, 0 }
  0x2b   : > { %p4320_p13 = pnand %p2689_p9, %p366_p10  ;;  %s378_s19 = sshll.u32 %s4161_s18, 4  ;;  %s379_s19 = int_to_ptr.vmem [resolvable:$true] %s378_s19 }
  0x2c   : > { %5752 = sst [smem:[#allocation40_spill]] %s5751_s16  ;;  %s4162_s28 = smov [#allocation11]  }
  0x2d   : > { %s5753_s17 = scalar_select %p4320_p13, 1, 0 }
  0x2e   : > { %p3597_p1 = pneg %p4320_p13  ;;  %s404_s29 = sshll.u32 %s4162_s28, 4  ;;  %s4332_s29 = int_to_ptr.vmem [resolvable:$true] %s404_s29 }
  0x2f   : > { %s5755_s3 = sld [smem:[#allocation71_spill]] }
  0x30   : > { %p4328_p2 = pnand %p3597_p1, %p5670_p4 }
  0x32   : > { %p4342_p3 = pneg %p4328_p2 }
  0x35   : > { %s3789_s27 = scalar_lea.hbm %s5755_s3, 8192 }
  0x36   : > { %p3790_p0 = scmp.ne.s32.totalorder %s5755_s3, %s3789_s27  ;;  %p3796_p9 = scmp.lt.u32.totalorder %s3789_s27, %s5755_s3 }
  0x38   : > { %p3792_p7 = pnand %p4342_p3, %p3790_p0 }
  0x3a   : > { %p3793_p8 = pneg %p3792_p7 }
  0x3c   : > { %p3798_p10 = pnand %p3796_p9, %p3793_p8 }
  0x3e   : > { %3801 = shalt.err (!%p3798_p10)
}
  0x3f   : > { %s3802_s26 = scalar_lea.vmem %s379_s19, 8192  ;;  %p3810_p11 = scmp.lt.s32.totalorder %s379_s19, %s379_s19 }
  0x40   : > { %p3803_p1 = scmp.ne.s32.totalorder %s379_s19, %s3802_s26  ;;  %p3811_p6 = scmp.lt.s32.totalorder %s3802_s26, %s3802_s26 }
  0x42   : > { %p3805_p4 = pnand %p3803_p1, %p4342_p3  ;;  %p3812_p13 = por %p3811_p6, %p3810_p11 }
  0x44   : > { %p3806_p12 = pneg %p3805_p4 }
  0x46   : > { %p3813_p5 = pnand %p3812_p13, %p3806_p12 }
  0x48   : > { %3816 = shalt.err (!%p3813_p5)
}
  0x49   : > { %s5679_s21 = smov 256   ;;  %s5680_s30 = smov 16  }
  0x4a   : > { %3600 = dma.hbm_to_vmem [thread:$0]  (!%p4328_p2), %s5755_s3, 8192, %s379_s19, [#allocation9], %s5679_s21, %s5679_s21, %s5680_s30  }
  0x4b   : > { %s5757_s5 = sld [smem:[#allocation73_spill]] }
  0x51   : > { %s3817_s11 = scalar_lea.hbm %s5757_s5, 8192 }
  0x52   : > { %p3818_p4 = scmp.ne.s32.totalorder %s5757_s5, %s3817_s11  ;;  %p3824_p11 = scmp.lt.u32.totalorder %s3817_s11, %s5757_s5 }
  0x54   : > { %p3820_p5 = pnand %p3818_p4, %p4342_p3 }
  0x56   : > { %p3821_p6 = pneg %p3820_p5 }
  0x58   : > { %p3826_p12 = pnand %p3824_p11, %p3821_p6 }
  0x5a   : > { %3829 = shalt.err (!%p3826_p12)
}
  0x5b   : > { %s3830_s19 = scalar_lea.vmem %s4332_s29, 8192  ;;  %p3838_p8 = scmp.lt.s32.totalorder %s4332_s29, %s4332_s29 }
  0x5c   : > { %p3831_p13 = scmp.ne.s32.totalorder %s4332_s29, %s3830_s19  ;;  %p3839_p9 = scmp.lt.s32.totalorder %s3830_s19, %s3830_s19 }
  0x5e   : > { %p3833_p0 = pnand %p3831_p13, %p4342_p3  ;;  %p3840_p10 = por %p3839_p9, %p3838_p8 }
  0x60   : > { %p3834_p7 = pneg %p3833_p0 }
  0x62   : > { %p3841_p1 = pnand %p3840_p10, %p3834_p7 }
  0x64   : > { %3844 = shalt.err (!%p3841_p1)
}
  0x65   : > { %3606 = dma.hbm_to_vmem [thread:$0]  (!%p4328_p2), %s5757_s5, 8192, %s4332_s29, [#allocation12], %s5679_s21, %s5679_s21, %s5680_s30  }
  0x66   : > { %s4165_s10 = smov [#allocation10]   ;;  %s5758_s4 = sld [smem:[#allocation72_spill]] }
  0x67   : > { %s391_s11 = sshll.u32 %s4165_s10, 4  ;;  %s392_s11 = int_to_ptr.vmem [resolvable:$true] %s391_s11 }
  0x6c   : > { %s3845_s16 = scalar_lea.hbm %s5758_s4, 16384 }
  0x6d   : > { %p3846_p4 = scmp.ne.s32.totalorder %s5758_s4, %s3845_s16  ;;  %p3852_p11 = scmp.lt.u32.totalorder %s3845_s16, %s5758_s4 }
  0x6f   : > { %p3848_p5 = pnand %p3846_p4, %p4342_p3 }
  0x71   : > { %p3849_p6 = pneg %p3848_p5 }
  0x73   : > { %p3854_p12 = pnand %p3852_p11, %p3849_p6 }
  0x75   : > { %3857 = shalt.err (!%p3854_p12)
}
  0x76   : > { %s3858_s29 = scalar_lea.vmem %s392_s11, 16384  ;;  %p3866_p8 = scmp.lt.s32.totalorder %s392_s11, %s392_s11 }
  0x77   : > { %p3859_p13 = scmp.ne.s32.totalorder %s392_s11, %s3858_s29  ;;  %p3867_p9 = scmp.lt.s32.totalorder %s3858_s29, %s3858_s29 }
  0x79   : > { %p3861_p0 = pnand %p3859_p13, %p4342_p3  ;;  %p3868_p10 = por %p3867_p9, %p3866_p8 }
  0x7b   : > { %p3862_p7 = pneg %p3861_p0 }
  0x7d   : > { %p3869_p1 = pnand %p3868_p10, %p3862_p7 }
  0x7f   : > { %3872 = shalt.err (!%p3869_p1)
}
  0x80   : > { %s4166_s7 = smov 512   ;;  %s4167_s9 = smov 32  }
  0x81   : > { %3603 = dma.hbm_to_vmem [thread:$0]  (!%p4328_p2), %s5758_s4, 16384, %s392_s11, [#allocation9], %s4166_s7, %s4166_s7, %s4167_s9  }
  0x82   : > { %s4168_s12 = smov [#allocation13]   ;;  %s3873_s26 = scalar_lea.hbm %s5657_s6, 8192 }
  0x83   : > { %s417_s27 = sshll.u32 %s4168_s12, 4  ;;  %p3874_p4 = scmp.ne.s32.totalorder %s5657_s6, %s3873_s26  ;;  %s418_s27 = int_to_ptr.vmem [resolvable:$true] %s417_s27 }
  0x84   : > { %p3880_p11 = scmp.lt.u32.totalorder %s3873_s26, %s5657_s6 }
  0x85   : > { %p3876_p5 = pnand %p3874_p4, %p4342_p3 }
  0x87   : > { %p3877_p6 = pneg %p3876_p5 }
  0x89   : > { %p3882_p12 = pnand %p3880_p11, %p3877_p6 }
  0x8b   : > { %3885 = shalt.err (!%p3882_p12)
}
  0x8c   : > { %s3886_s11 = scalar_lea.vmem %s418_s27, 8192  ;;  %p3894_p8 = scmp.lt.s32.totalorder %s418_s27, %s418_s27 }
  0x8d   : > { %p3887_p13 = scmp.ne.s32.totalorder %s418_s27, %s3886_s11  ;;  %p3895_p9 = scmp.lt.s32.totalorder %s3886_s11, %s3886_s11 }
  0x8f   : > { %p3889_p0 = pnand %p3887_p13, %p4342_p3  ;;  %p3896_p10 = por %p3895_p9, %p3894_p8 }
  0x91   : > { %p3890_p7 = pneg %p3889_p0 }
  0x93   : > { %p3897_p1 = pnand %p3896_p10, %p3890_p7 }
  0x95   : > { %3900 = shalt.err (!%p3897_p1)
}
  0x96   : > { %s5759_s7 = smov 16   ;;  %s5760_s9 = smov 256  }
  0x97   : > { %3609 = dma.hbm_to_vmem [thread:$0]  (!%p4328_p2), %s5657_s6, 8192, %s418_s27, [#allocation12], %s5760_s9, %s5760_s9, %s5759_s7  }
  0x98   : > { %p2694_p4 = scmp.ge.s32.totalorder %s4159_s24, 3 }
  0x99   : > { %s4428_s18 = sand.u32 (!%p2694_p4), 1, %s4155_s23   ;;  %s4431_s3 = sshll.u32 (!%p2694_p4), %s4159_s24, 9 }
  0x9a   : > { %427 = sbr.rel (%p2694_p4) target bundleno = 209 (0xd1), region = 32  ;;  %s2695_s20 = sshll.u32 (!%p2694_p4), %s4428_s18, 5 }
  0x9b   : > { %s5761_s0 = sld [smem:[#allocation68_spill]] (!%p2694_p4)  ;;  %s435_s27 = scalar_lea.vmem (!%p2694_p4), [#allocation2], %s2695_s20 }
  0x9c   : > { %s443_s28 = sshll.u32 (!%p2694_p4), %s435_s27, 4  ;;  %s432_s26 = scalar_lea.sflag (!%p2694_p4), [#allocation3], %s4428_s18  ;;  %s4440_s28 = int_to_ptr.vmem [resolvable:$true] %s443_s28 }
  0x9d   : > { %p5762_p3 = scmp.ne.s32.totalorder (!%p2694_p4), %s5748_s13, 0 }
  0xa1   : > { %s4438_s16 = scalar_lea.hbm %s5761_s0, %s4431_s3  ;;  %s3905_s7 = scalar_lea.hbm %s5761_s0, 1536 }
  0xa2   : > { %s3901_s19 = scalar_lea.hbm %s4438_s16, 512  ;;  %p3906_p11 = scmp.lt.u32.totalorder %s4438_s16, %s5761_s0 }
  0xa3   : > { %p3902_p2 = scmp.ne.s32.totalorder %s4438_s16, %s3901_s19  ;;  %p3907_p12 = scmp.lt.u32.totalorder %s3905_s7, %s3901_s19 }
  0xa4   : > { %p3909_p0 = scmp.lt.u32.totalorder %s3901_s19, %s4438_s16 }
  0xa5   : > { %p3903_p5 = pnand %p3902_p2, %p5762_p3  ;;  %p3908_p13 = por %p3907_p12, %p3906_p11 }
  0xa7   : > { %p3904_p6 = pneg %p3903_p5  ;;  %p3910_p7 = por %p3909_p0, %p3908_p13 }
  0xa9   : > { %p3911_p8 = pnand %p3910_p7, %p3904_p6 }
  0xab   : > { %3914 = shalt.err (!%p3911_p8)
}
  0xac   : > { %s3915_s30 = scalar_lea.vmem %s4440_s28, 512  ;;  %s4169_s20 = smov [#allocation2]  }
  0xad   : > { %p3916_p9 = scmp.ne.s32.totalorder %s4440_s28, %s3915_s30  ;;  %s3919_s10 = sshll.u32 %s4169_s20, 4  ;;  %s3920_s10 = int_to_ptr.vmem [resolvable:$false] %s3919_s10 }
  0xae   : > { %s3921_s12 = scalar_lea.vmem %s3920_s10, 1024  ;;  %p3922_p4 = scmp.lt.s32.totalorder %s4440_s28, %s3920_s10 }
  0xaf   : > { %p3917_p10 = pnand %p3916_p9, %p5762_p3  ;;  %p3923_p2 = scmp.lt.s32.totalorder %s3921_s12, %s3915_s30 }
  0xb1   : > { %p3918_p1 = pneg %p3917_p10  ;;  %p3924_p5 = por %p3923_p2, %p3922_p4 }
  0xb3   : > { %p3925_p11 = pnand %p3924_p5, %p3918_p1 }
  0xb5   : > { %3928 = shalt.err (!%p3925_p11)
}
  0xb6   : > { %s4170_s27 = smov 256   ;;  %s4171_s19 = smov 16  }
  0xb7   : > { %3557 = dma.hbm_to_vmem [thread:$0]  (%p5762_p3), %s4438_s16, 512, %s4440_s28, %s432_s26, %s4170_s27, %s4170_s27, %s4171_s19  }
  0xb8   : > { %s453_s29 = sand.u32 1, %s4159_s24   ;;  %s2699_s11 = sshll.u32 %s4428_s18, 6 }
  0xb9   : > { %s5763_s1 = sld [smem:[#allocation69_spill]]  ;;  %s457_s20 = scalar_lea.vmem [#allocation5], %s2699_s11 }
  0xba   : > { %s3558_s30 = scalar_select %p5762_p3, [#allocation0], [#allocation27] }
  0xbb   : > { %s477_s16 = sshll.u32 %s457_s20, 4  ;;  %s4172_s26 = smov 1536   ;;  %s478_s16 = int_to_ptr.vmem [resolvable:$true] %s477_s16 }
  0xbc   : > { %s469_s28 = sld [smem:[%s3558_s30]]   ;;  %s4173_s10 = smov 512  }
  0xbd   : > { %3559 = sst [smem:[#allocation24]] (%p5762_p3), %s4172_s26  ;;  %s4174_s12 = smov 2  }
  0xbe   : > { %3560 = sst [smem:[#allocation24 + $0x1]] (%p5762_p3), %s4173_s10  ;;  %s4175_s18 = smov 256  }
  0xbf   : > { %s464_s21 = scalar_lea.hbm %s5763_s1, %s4431_s3  ;;  %3561 = sst [smem:[#allocation24 + $0x2]] (%p5762_p3), %s4174_s12 }
  0xc0   : > { %3562 = sst [smem:[#allocation24 + $0x3]] (%p5762_p3), %s4175_s18  ;;  %s4176_s19 = smov 16  }
  0xc1   : > { %3563 = sst [smem:[#allocation24 + $0x4]] (%p5762_p3), %s4175_s18  ;;  %s454_s9 = scalar_lea.sflag [#allocation6], %s453_s29 }
  0xc2   : > { %s2703_s27 = sshll.u32 %s469_s28, 26  ;;  %3564 = sst [smem:[#allocation24 + $0x5]] (%p5762_p3), %s4176_s19 }
  0xc3   : > { %s2704_s7 = sadd.s32 134217728, %s2703_s27  ;;  %s4177_s30 = smov [#allocation23]  }
  0xc4   : > { %3565 = dma.general (%p5762_p3), %s464_s21, 1024, %s478_s16, %s454_s9, %s4177_s30, [#allocation24], %s2704_s7, 0  }
  0xc5   : > { %s5764_s2 = sld [smem:[#allocation70_spill]]  ;;  %s504_s12 = scalar_lea.vmem [#allocation7], %s2699_s11 }
  0xc6   : > { %s3566_s28 = scalar_select %p5762_p3, [#allocation0], [#allocation28] }
  0xc7   : > { %s524_s18 = sshll.u32 %s504_s12, 4  ;;  %s4178_s21 = smov 1536   ;;  %s525_s18 = int_to_ptr.vmem [resolvable:$true] %s524_s18 }
  0xc8   : > { %s516_s29 = sld [smem:[%s3566_s28]]   ;;  %s4179_s16 = smov 512  }
  0xc9   : > { %3567 = sst [smem:[#allocation26]] (%p5762_p3), %s4178_s21  ;;  %s4180_s27 = smov 2  }
  0xca   : > { %3568 = sst [smem:[#allocation26 + $0x1]] (%p5762_p3), %s4179_s16  ;;  %s4181_s19 = smov 256  }
  0xcb   : > { %s511_s10 = scalar_lea.hbm %s5764_s2, %s4431_s3  ;;  %3569 = sst [smem:[#allocation26 + $0x2]] (%p5762_p3), %s4180_s27 }
  0xcc   : > { %3570 = sst [smem:[#allocation26 + $0x3]] (%p5762_p3), %s4181_s19  ;;  %s4182_s11 = smov 16  }
  0xcd   : > { %3571 = sst [smem:[#allocation26 + $0x4]] (%p5762_p3), %s4181_s19  ;;  %s4183_s30 = smov [#allocation25]  }
  0xce   : > { %s2709_s3 = sshll.u32 %s516_s29, 26  ;;  %3572 = sst [smem:[#allocation26 + $0x5]] (%p5762_p3), %s4182_s11 }
  0xcf   : > { %s2710_s7 = sadd.s32 134217728, %s2709_s3 }
  0xd0   : > { %3573 = dma.general (%p5762_p3), %s511_s10, 1024, %s525_s18, %s454_s9, %s4183_s30, [#allocation26], %s2710_s7, 0  }
  0xd1 PF: > { %p5765_p6 = scmp.ne.s32.totalorder %s5753_s17, 0 }
  0xd3   : > { %549 = sbr.rel (%p5765_p6) target bundleno = 1763 (0x6e3), region = 48 }
  0xda   : > { %s4511_s20 = sand.u32 1, %s4151_s22   ;;  %p5766_p12 = scmp.ne.s32.totalorder %s5749_s14, 0 }
  0xdb   : > { %s4514_s26 = sshll.u32 %s4511_s20, 5  ;;  %s552_s28 = scalar_lea.sflag [#allocation3], %s4511_s20 }
  0xdc   : > { %s4518_s12 = scalar_lea.vmem [#allocation2], %s4514_s26 }
  0xdd   : > { %4114 = dma.done.wait (%p5766_p12), %s552_s28, 512  }
  0xde   : > { %4116 = vsyncadd (%p5766_p12), %s552_s28, 4294966784  ;;  %s4525_s13 = sand.u32 1, %s4279_s25   ;;  %s2713_s17 = sshll.u32 %s4511_s20, 6 }
  0xdf   : > { %s561_s9 = scalar_lea.sflag [#allocation6], %s4525_s13  ;;  %s4529_s10 = scalar_lea.vmem [#allocation5], %s2713_s17 }
  0xe0   : > { %4118 = dma.done.wait (%p5766_p12), %s561_s9, 2048  }
  0xe1   : > { %4120 = vsyncadd (%p5766_p12), %s561_s9, 4294965248  ;;  %s4535_s18 = scalar_lea.vmem [#allocation7], %s2713_s17  ;;  %p5767_p3 = scmp.eq.s32.totalorder %s4279_s25, 0 }
  0xe3   : > { %4122 = dma.done.wait (%p5767_p3), [#allocation9], 24576   ;;  %p5768_p13 = pmov %p5767_p3 }
  0xe4   : > { %p5769_p0 = pmov %p5767_p3 }
  0xe5   : > { %4124 = vsyncadd (%p5768_p13), [#allocation9], 4294942720 }
  0xe6   : > { %4126 = dma.done.wait (%p5769_p0), [#allocation12], 16384   ;;  %p5770_p7 = pmov %p5769_p0 }
  0xe7   : > { %v675_v0 = vld [vmem:[#allocation8 + $0x8] sm:$0xff]  ;;  %v677_v1 = vld [vmem:[#allocation8 + $0x18] sm:$0xff]  ;;  %v674_v2 = vld [vmem:[#allocation8] sm:$0xff]  ;;  %s5366_s14 = scalar_lea.vmem [#allocation18], %s4514_s26  ;;  %s5375_s29 = scalar_lea.vmem [#allocation15], %s4514_s26 }
  0xe8   : > { %4128 = vsyncadd (%p5770_p7), [#allocation12], 4294950912  ;;  %v4545_v3 = vpack.c.bf16 %v677_v1, %v675_v0  ;;  %v676_v4 = vld [vmem:[#allocation8 + $0x10] sm:$0xff]  ;;  %v679_v5 = vld [vmem:[#allocation8 + $0x28] sm:$0xff]  ;;  %s5386_s21 = scalar_lea.vmem [#allocation14], %s4514_s26  ;;  %s5397_s16 = scalar_lea.vmem [#allocation20], %s4514_s26 }
  0xe9   : > { %v681_v6 = vld [vmem:[#allocation8 + $0x38] sm:$0xff]  ;;  %v4547_v7 = vpack.c.bf16 %v676_v4, %v674_v2  ;;  %v678_v9 = vld [vmem:[#allocation8 + $0x20] sm:$0xff]  ;;  %v680_v10 = vld [vmem:[#allocation8 + $0x30] sm:$0xff]  ;;  %s643_s27 = scalar_lea.vmem [#allocation17], %s4514_s26  ;;  %s2346_s19 = sshll.u32 %s5366_s14, 4  ;;  %s5416_s19 = int_to_ptr.vmem [resolvable:$true] %s2346_s19 }
  0xea   : > { %v4549_v8 = vpack.c.bf16 %v681_v6, %v679_v5  ;;  %v683_v11 = vld [vmem:[#allocation8 + $0x48] sm:$0xff]  ;;  %2778 = vmatprep.subr.bf16.mxu1 %v4545_v3  ;;  %v685_v12 = vld [vmem:[#allocation8 + $0x58] sm:$0xff]  ;;  %2906 = vmatprep.subr.bf16.mxu0 %v4545_v3  ;;  %v4554_v13 = vpack.c.bf16 %v680_v10, %v678_v9  ;;  %v682_v15 = vld [vmem:[#allocation8 + $0x40] sm:$0xff]  ;;  %s2312_s3 = sshll.u32 %s5375_s29, 4  ;;  %s2295_s11 = sshll.u32 %s5386_s21, 4  ;;  %s5418_s3 = int_to_ptr.vmem [resolvable:$true] %s2312_s3  ;;  %s5420_s11 = int_to_ptr.vmem [resolvable:$true] %s2295_s11 }
  0xeb   : > { %2780 = vmatpush1.bf16.msra.mxu1 %v4547_v7  ;;  %2908 = vmatpush1.bf16.msra.mxu0 %v4547_v7  ;;  %v4558_v14 = vpack.c.bf16 %v685_v12, %v683_v11  ;;  %v684_v16 = vld [vmem:[#allocation8 + $0x50] sm:$0xff]  ;;  %v687_v17 = vld [vmem:[#allocation8 + $0x68] sm:$0xff]  ;;  %v689_v18 = vld [vmem:[#allocation8 + $0x78] sm:$0xff]  ;;  %s2363_s7 = sshll.u32 %s5397_s16, 4  ;;  %s2329_s30 = sshll.u32 %s643_s27, 4  ;;  %s5422_s7 = int_to_ptr.vmem [resolvable:$true] %s2363_s7  ;;  %s5424_s30 = int_to_ptr.vmem [resolvable:$true] %s2329_s30 }
  0xec   : > { %2782 = vmatprep.subr.bf16.mxu1 %v4549_v8  ;;  %2910 = vmatprep.subr.bf16.mxu0 %v4549_v8  ;;  %v4562_v19 = vpack.c.bf16 %v684_v16, %v682_v15  ;;  %v4566_v20 = vpack.c.bf16 %v689_v18, %v687_v17  ;;  %v686_v21 = vld [vmem:[#allocation8 + $0x60] sm:$0xff]  ;;  %v688_v22 = vld [vmem:[#allocation8 + $0x70] sm:$0xff]  ;;  %v691_v23 = vld [vmem:[#allocation8 + $0x88] sm:$0xff]  ;;  %s5427_s28 = sshll.u32 %s4279_s25, 9  ;;  %p5828_p9 = scmp.ne.s32.totalorder %s5750_s15, 0 }
  0xed   : > { %v693_v24 = vld [vmem:[#allocation8 + $0x98] sm:$0xff]  ;;  %v4570_v25 = vpack.c.bf16 %v688_v22, %v686_v21  ;;  %v690_v27 = vld [vmem:[#allocation8 + $0x80] sm:$0xff]  ;;  %v692_v28 = vld [vmem:[#allocation8 + $0x90] sm:$0xff]  ;;  %s5433_s9 = scalar_lea.hbm %s5659_s8, %s5427_s28 }
  0xee   : > { %v4574_v26 = vpack.c.bf16 %v693_v24, %v691_v23  ;;  %v695_v29 = vld [vmem:[#allocation8 + $0xa8] sm:$0xff]  ;;  %v697_v30 = vld [vmem:[#allocation8 + $0xb8] sm:$0xff]  ;;  %v4578_v31 = vpack.c.bf16 %v692_v28, %v690_v27  ;;  %v694_v33 = vld [vmem:[#allocation8 + $0xa0] sm:$0xff] }
  0xef   : > { %2784 = vmatpush1.bf16.msra.mxu1 %v4554_v13  ;;  %2912 = vmatpush1.bf16.msra.mxu0 %v4554_v13  ;;  %v4582_v32 = vpack.c.bf16 %v697_v30, %v695_v29  ;;  %v696_v34 = vld [vmem:[#allocation8 + $0xb0] sm:$0xff]  ;;  %v699_v35 = vld [vmem:[#allocation8 + $0xc8] sm:$0xff]  ;;  %v701_v36 = vld [vmem:[#allocation8 + $0xd8] sm:$0xff] }
  0xf0   : > { %2786 = vmatprep.subr.bf16.mxu1 %v4558_v14  ;;  %2914 = vmatprep.subr.bf16.mxu0 %v4558_v14  ;;  %v4586_v37 = vpack.c.bf16 %v696_v34, %v694_v33  ;;  %v4590_v38 = vpack.c.bf16 %v701_v36, %v699_v35  ;;  %v698_v39 = vld [vmem:[#allocation8 + $0xc0] sm:$0xff]  ;;  %v700_v40 = vld [vmem:[#allocation8 + $0xd0] sm:$0xff]  ;;  %v995_v41 = vld [vmem:[%s4518_s12 + $0x8] sm:$0xff] }
  0xf1   : > { %v703_v42 = vld [vmem:[#allocation8 + $0xe8] sm:$0xff]  ;;  %v705_v43 = vld [vmem:[#allocation8 + $0xf8] sm:$0xff]  ;;  %1098 = vmatprep.mubr.f32.mxu1 %v995_v41  ;;  %v4596_v45 = vpack.c.bf16 %v700_v40, %v698_v39  ;;  %v702_v47 = vld [vmem:[#allocation8 + $0xe0] sm:$0xff] }
  0xf2   : > { %v2726_v44 = vld [vmem:[%s4535_s18 + $0x28] sm:$0xff]  ;;  %v4600_v46 = vpack.c.bf16 %v705_v43, %v703_v42  ;;  %v704_v48 = vld [vmem:[#allocation8 + $0xf0] sm:$0xff]  ;;  %v709_v50 = vld [vmem:[#allocation8 + $0x118] sm:$0xff] }
  0xf3   : > { %2788 = vmatpush1.bf16.msra.mxu1 %v4562_v19  ;;  %2916 = vmatpush1.bf16.msra.mxu0 %v4562_v19  ;;  %v707_v49 = vld [vmem:[#allocation8 + $0x108] sm:$0xff]  ;;  %v4604_v51 = vpack.c.bf16 %v704_v48, %v702_v47  ;;  %v706_v53 = vld [vmem:[#allocation8 + $0x100] sm:$0xff]  ;;  %v708_v54 = vld [vmem:[#allocation8 + $0x110] sm:$0xff] }
  0xf4   : > { %2790 = vmatprep.subr.bf16.mxu1 %v4566_v20  ;;  %2918 = vmatprep.subr.bf16.mxu0 %v4566_v20  ;;  %v4608_v52 = vpack.c.bf16 %v709_v50, %v707_v49  ;;  %v711_v55 = vld [vmem:[#allocation8 + $0x128] sm:$0xff]  ;;  %v713_v56 = vld [vmem:[#allocation8 + $0x138] sm:$0xff]  ;;  %v4612_v57 = vpack.c.bf16 %v708_v54, %v706_v53  ;;  %v710_v59 = vld [vmem:[#allocation8 + $0x120] sm:$0xff] }
  0xf5   : > { %1337 = vmatprep.mubr.f32.mxu0 %v2726_v44  ;;  %v4616_v58 = vpack.c.bf16 %v713_v56, %v711_v55  ;;  %v712_v60 = vld [vmem:[#allocation8 + $0x130] sm:$0xff]  ;;  %v715_v61 = vld [vmem:[#allocation8 + $0x148] sm:$0xff]  ;;  %v717_v62 = vld [vmem:[#allocation8 + $0x158] sm:$0xff] }
  0xf6   : > { %v4620_v63 = vpack.c.bf16 %v712_v60, %v710_v59  ;;  %v4624_v0 = vpack.c.bf16 %v717_v62, %v715_v61  ;;  %v714_v1 = vld [vmem:[#allocation8 + $0x140] sm:$0xff]  ;;  %v716_v2 = vld [vmem:[#allocation8 + $0x150] sm:$0xff]  ;;  %v719_v4 = vld [vmem:[#allocation8 + $0x168] sm:$0xff] }
  0xf7   : > { %2792 = vmatpush1.bf16.msra.mxu1 %v4570_v25  ;;  %2920 = vmatpush1.bf16.msra.mxu0 %v4570_v25  ;;  %v721_v5 = vld [vmem:[#allocation8 + $0x178] sm:$0xff]  ;;  %v4628_v6 = vpack.c.bf16 %v716_v2, %v714_v1  ;;  %v718_v10 = vld [vmem:[#allocation8 + $0x160] sm:$0xff]  ;;  %v720_v11 = vld [vmem:[#allocation8 + $0x170] sm:$0xff] }
  0xf8   : > { %2794 = vmatprep.subr.bf16.mxu1 %v4574_v26  ;;  %2922 = vmatprep.subr.bf16.mxu0 %v4574_v26  ;;  %v4632_v9 = vpack.c.bf16 %v721_v5, %v719_v4  ;;  %v723_v12 = vld [vmem:[#allocation8 + $0x188] sm:$0xff]  ;;  %v725_v15 = vld [vmem:[#allocation8 + $0x198] sm:$0xff]  ;;  %v4636_v16 = vpack.c.bf16 %v720_v11, %v718_v10  ;;  %v722_v18 = vld [vmem:[#allocation8 + $0x180] sm:$0xff] }
  0xf9   : > { %v4640_v17 = vpack.c.bf16 %v725_v15, %v723_v12  ;;  %v724_v21 = vld [vmem:[#allocation8 + $0x190] sm:$0xff]  ;;  %v727_v22 = vld [vmem:[#allocation8 + $0x1a8] sm:$0xff]  ;;  %v729_v23 = vld [vmem:[#allocation8 + $0x1b8] sm:$0xff] }
  0xfa   : > { %v4644_v24 = vpack.c.bf16 %v724_v21, %v722_v18  ;;  %v4648_v27 = vpack.c.bf16 %v729_v23, %v727_v22  ;;  %v726_v28 = vld [vmem:[#allocation8 + $0x1a0] sm:$0xff]  ;;  %v728_v29 = vld [vmem:[#allocation8 + $0x1b0] sm:$0xff]  ;;  %v731_v30 = vld [vmem:[#allocation8 + $0x1c8] sm:$0xff] }
  0xfb   : > { %2796 = vmatpush1.bf16.msra.mxu1 %v4578_v31  ;;  %2924 = vmatpush1.bf16.msra.mxu0 %v4578_v31  ;;  %v733_v33 = vld [vmem:[#allocation8 + $0x1d8] sm:$0xff]  ;;  %v4652_v34 = vpack.c.bf16 %v728_v29, %v726_v28  ;;  %v730_v36 = vld [vmem:[#allocation8 + $0x1c0] sm:$0xff]  ;;  %v732_v39 = vld [vmem:[#allocation8 + $0x1d0] sm:$0xff] }
  0xfc   : > { %2798 = vmatprep.subr.bf16.mxu1 %v4582_v32  ;;  %2926 = vmatprep.subr.bf16.mxu0 %v4582_v32  ;;  %v4656_v35 = vpack.c.bf16 %v733_v33, %v731_v30  ;;  %v735_v40 = vld [vmem:[#allocation8 + $0x1e8] sm:$0xff]  ;;  %v737_v41 = vld [vmem:[#allocation8 + $0x1f8] sm:$0xff]  ;;  %v4660_v42 = vpack.c.bf16 %v732_v39, %v730_v36  ;;  %v734_v44 = vld [vmem:[#allocation8 + $0x1e0] sm:$0xff] }
  0xfd   : > { %v4664_v43 = vpack.c.bf16 %v737_v41, %v735_v40  ;;  %v736_v47 = vld [vmem:[#allocation8 + $0x1f0] sm:$0xff]  ;;  %v994_v49 = vld [vmem:[%s4518_s12] sm:$0xff]  ;;  %v997_v53 = vld [vmem:[%s4518_s12 + $0x18] sm:$0xff] }
  0xfe   : > { %v4668_v48 = vpack.c.bf16 %v736_v47, %v734_v44  ;;  %v2725_v50 = vld [vmem:[%s4535_s18 + $0x20] sm:$0xff]  ;;  %v2728_v54 = vld [vmem:[%s4535_s18 + $0x38] sm:$0xff]  ;;  %v996_v55 = vld [vmem:[%s4518_s12 + $0x10] sm:$0xff] }
  0xff   : > { %2800 = vmatpush1.bf16.msra.mxu1 %v4586_v37  ;;  %2928 = vmatpush1.bf16.msra.mxu0 %v4586_v37  ;;  %v2727_v56 = vld [vmem:[%s4535_s18 + $0x30] sm:$0xff]  ;;  %v1112_v59 = vld [vmem:[%s4535_s18 + $0x8] sm:$0xff]  ;;  %v1111_v60 = vld [vmem:[%s4535_s18] sm:$0xff] }
 0x100   : > { %2802 = vmatprep.subr.bf16.mxu1 %v4590_v38  ;;  %2930 = vmatprep.subr.bf16.mxu0 %v4590_v38  ;;  %v1114_v61 = vld [vmem:[%s4535_s18 + $0x18] sm:$0xff]  ;;  %v1113_v62 = vld [vmem:[%s4535_s18 + $0x10] sm:$0xff]  ;;  %v747_v1 = vld [vmem:[#allocation10 + $0x48] sm:$0xff] }
 0x101   : > { %v751_v2 = vld [vmem:[#allocation10 + $0x68] sm:$0xff]  ;;  %v746_v5 = vld [vmem:[#allocation10 + $0x40] sm:$0xff] }
 0x102   : > { %v4789_v4 = vpack.c.bf16 %v751_v2, %v747_v1  ;;  %v755_v10 = vld [vmem:[#allocation10 + $0x88] sm:$0xff]  ;;  %v754_v15 = vld [vmem:[#allocation10 + $0x80] sm:$0xff] }
 0x103   : > { %2804 = vmatpush1.bf16.msra.mxu1 %v4596_v45  ;;  %2932 = vmatpush1.bf16.msra.mxu0 %v4596_v45  ;;  %v759_v11 = vld [vmem:[#allocation10 + $0xa8] sm:$0xff]  ;;  %v762_v23 = vld [vmem:[#allocation10 + $0xc0] sm:$0xff] }
 0x104   : > { %2806 = vmatprep.subr.bf16.mxu1 %v4600_v46  ;;  %2934 = vmatprep.subr.bf16.mxu0 %v4600_v46  ;;  %v4795_v12 = vpack.c.bf16 %v759_v11, %v755_v10  ;;  %v767_v21 = vld [vmem:[#allocation10 + $0xe8] sm:$0xff]  ;;  %v770_v33 = vld [vmem:[#allocation10 + $0x100] sm:$0xff] }
 0x105   : > { %v775_v28 = vld [vmem:[#allocation10 + $0x128] sm:$0xff]  ;;  %v778_v41 = vld [vmem:[#allocation10 + $0x140] sm:$0xff] }
 0x106   : > { %v783_v36 = vld [vmem:[#allocation10 + $0x168] sm:$0xff]  ;;  %v818_v10 = vld [vmem:[#allocation10 + $0x280] sm:$0xff] }
 0x107   : > { %2808 = vmatpush1.bf16.msra.mxu1 %v4604_v51  ;;  %2936 = vmatpush1.bf16.msra.mxu0 %v4604_v51  ;;  %v791_v44 = vld [vmem:[#allocation10 + $0x1a8] sm:$0xff]  ;;  %v822_v11 = vld [vmem:[#allocation10 + $0x2a0] sm:$0xff] }
 0x108   : > { %2810 = vmatprep.subr.bf16.mxu1 %v4608_v52  ;;  %2938 = vmatprep.subr.bf16.mxu0 %v4608_v52  ;;  %v819_v1 = vld [vmem:[#allocation10 + $0x288] sm:$0xff] }
 0x109   : > { %v823_v2 = vld [vmem:[#allocation10 + $0x2a8] sm:$0xff] }
 0x10b   : > { %2812 = vmatpush1.bf16.msra.mxu1 %v4612_v57  ;;  %2940 = vmatpush1.bf16.msra.mxu0 %v4612_v57 }
 0x10c   : > { %2814 = vmatprep.subr.bf16.mxu1 %v4616_v58  ;;  %2942 = vmatprep.subr.bf16.mxu0 %v4616_v58 }
 0x10f   : > { %2816 = vmatpush1.bf16.msra.mxu1 %v4620_v63  ;;  %2944 = vmatpush1.bf16.msra.mxu0 %v4620_v63 }
 0x110   : > { %2818 = vmatprep.subr.bf16.mxu1 %v4624_v0  ;;  %2946 = vmatprep.subr.bf16.mxu0 %v4624_v0 }
 0x113   : > { %2820 = vmatpush1.bf16.msra.mxu1 %v4628_v6  ;;  %2948 = vmatpush1.bf16.msra.mxu0 %v4628_v6 }
 0x114   : > { %2822 = vmatprep.subr.bf16.mxu1 %v4632_v9  ;;  %2950 = vmatprep.subr.bf16.mxu0 %v4632_v9 }
 0x117   : > { %2824 = vmatpush1.bf16.msra.mxu1 %v4636_v16  ;;  %2952 = vmatpush1.bf16.msra.mxu0 %v4636_v16 }
 0x118   : > { %2826 = vmatprep.subr.bf16.mxu1 %v4640_v17  ;;  %2954 = vmatprep.subr.bf16.mxu0 %v4640_v17 }
 0x11b   : > { %2828 = vmatpush1.bf16.msra.mxu1 %v4644_v24  ;;  %2956 = vmatpush1.bf16.msra.mxu0 %v4644_v24 }
 0x11c   : > { %2830 = vmatprep.subr.bf16.mxu1 %v4648_v27  ;;  %2958 = vmatprep.subr.bf16.mxu0 %v4648_v27 }
 0x11f   : > { %2832 = vmatpush1.bf16.msra.mxu1 %v4652_v34  ;;  %2960 = vmatpush1.bf16.msra.mxu0 %v4652_v34 }
 0x120   : > { %2834 = vmatprep.subr.bf16.mxu1 %v4656_v35  ;;  %2962 = vmatprep.subr.bf16.mxu0 %v4656_v35 }
 0x123   : > { %2836 = vmatpush1.bf16.msra.mxu1 %v4660_v42  ;;  %2964 = vmatpush1.bf16.msra.mxu0 %v4660_v42 }
 0x124   : > { %2838 = vmatprep.subr.bf16.mxu1 %v4664_v43  ;;  %2966 = vmatprep.subr.bf16.mxu0 %v4664_v43 }
 0x127   : > { %2840 = vmatpush1.bf16.msra.mxu1 %v4668_v48  ;;  %2968 = vmatpush1.bf16.msra.mxu0 %v4668_v48 }
 0x128   : > { %2842 = vmatprep.subr.bf16.mxu1 %v4545_v3 }
 0x12a   : > { %1099 = vmatmul.mubr.f32.vlgmr.msra.gmra.mrb[0].mxu1 %v994_v49  ;;  %1338 = vmatmul.mubr.f32.vlgmr.msra.gmra.mrb[0].mxu0 %v2725_v50  ;;  %v786_v49 = vld [vmem:[#allocation10 + $0x180] sm:$0xff] }
 0x12b   : > { %2844 = vmatpush1.bf16.msra.mxu1 %v4547_v7  ;;  %1104 = vmatprep.mubr.f32.mxu1 %v997_v53  ;;  %v790_v50 = vld [vmem:[#allocation10 + $0x1a0] sm:$0xff]  ;;  %v795_v53 = vld [vmem:[#allocation10 + $0x1c8] sm:$0xff] }
 0x12c   : > { %2846 = vmatprep.subr.bf16.mxu1 %v4549_v8  ;;  %1343 = vmatprep.mubr.f32.mxu0 %v2728_v54  ;;  %v799_v54 = vld [vmem:[#allocation10 + $0x1e8] sm:$0xff] }
 0x12e   : > { %1105 = vmatmul.mubr.f32.gmra.mrb[2].mxu1 %v996_v55  ;;  %1344 = vmatmul.mubr.f32.gmra.mrb[2].mxu0 %v2727_v56  ;;  %v4822_v55 = vpack.c.bf16 %v790_v50, %v786_v49  ;;  %v4825_v56 = vpack.c.bf16 %v799_v54, %v795_v53  ;;  %v842_v49 = vld [vmem:[#allocation10 + $0x340] sm:$0xff] }
 0x12f   : > { %2848 = vmatpush1.bf16.msra.mxu1 %v4554_v13  ;;  %1215 = vmatprep.mubr.f32.mxu1 %v1112_v59  ;;  %v794_v59 = vld [vmem:[#allocation10 + $0x1c0] sm:$0xff] }
 0x130   : > { %2850 = vmatprep.subr.bf16.mxu1 %v4558_v14  ;;  %v846_v50 = vld [vmem:[#allocation10 + $0x360] sm:$0xff] }
 0x133   : > { %2852 = vmatpush1.bf16.msra.mxu1 %v4562_v19 }
 0x134   : > { %2854 = vmatprep.subr.bf16.mxu1 %v4566_v20 }
 0x137   : > { %2856 = vmatpush1.bf16.msra.mxu1 %v4570_v25 }
 0x138   : > { %2858 = vmatprep.subr.bf16.mxu1 %v4574_v26 }
 0x13b   : > { %2860 = vmatpush1.bf16.msra.mxu1 %v4578_v31 }
 0x13c   : > { %2862 = vmatprep.subr.bf16.mxu1 %v4582_v32 }
 0x13f   : > { %2864 = vmatpush1.bf16.msra.mxu1 %v4586_v37 }
 0x140   : > { %2866 = vmatprep.subr.bf16.mxu1 %v4590_v38 }
 0x143   : > { %2868 = vmatpush1.bf16.msra.mxu1 %v4596_v45 }
 0x144   : > { %2870 = vmatprep.subr.bf16.mxu1 %v4600_v46 }
 0x147   : > { %2872 = vmatpush1.bf16.msra.mxu1 %v4604_v51 }
 0x148   : > { %2874 = vmatprep.subr.bf16.mxu1 %v4608_v52 }
 0x14b   : > { %2876 = vmatpush1.bf16.msra.mxu1 %v4612_v57 }
 0x14c   : > { %2878 = vmatprep.subr.bf16.mxu1 %v4616_v58 }
 0x14f   : > { %2880 = vmatpush1.bf16.msra.mxu1 %v4620_v63 }
 0x150   : > { %2882 = vmatprep.subr.bf16.mxu1 %v4624_v0 }
 0x153   : > { %2884 = vmatpush1.bf16.msra.mxu1 %v4628_v6 }
 0x154   : > { %2886 = vmatprep.subr.bf16.mxu1 %v4632_v9 }
 0x157   : > { %2888 = vmatpush1.bf16.msra.mxu1 %v4636_v16 }
 0x158   : > { %2890 = vmatprep.subr.bf16.mxu1 %v4640_v17 }
 0x15b   : > { %2892 = vmatpush1.bf16.msra.mxu1 %v4644_v24 }
 0x15c   : > { %2894 = vmatprep.subr.bf16.mxu1 %v4648_v27 }
 0x15f   : > { %2896 = vmatpush1.bf16.msra.mxu1 %v4652_v34 }
 0x160   : > { %2898 = vmatprep.subr.bf16.mxu1 %v4656_v35 }
 0x163   : > { %2900 = vmatpush1.bf16.msra.mxu1 %v4660_v42 }
 0x164   : > { %2902 = vmatprep.subr.bf16.mxu1 %v4664_v43 }
 0x167   : > { %2904 = vmatpush1.bf16.msra.mxu1 %v4668_v48 }
 0x168   : > { %2970 = vmatprep.subr.bf16.mxu1 %v4545_v3  ;;  %v4750_v3 = vld [vmem:[%s4529_s10 + $0x20] sm:$0xff] }
 0x169   : > { %5771 = vst [vmem:[#allocation41_spill] sm:$0xff] %v4750_v3 }
 0x16a   : > { %1216 = vmatmul.mubr.f32.vlgmr.msra.gmra.mrb[4].mxu1 %v1111_v60  ;;  %v798_v60 = vld [vmem:[#allocation10 + $0x1e0] sm:$0xff] }
 0x16b   : > { %1221 = vmatprep.mubr.f32.mxu1 %v1114_v61  ;;  %2972 = vmatpush1.bf16.msra.mxu1 %v4547_v7  ;;  %v4753_v7 = vld [vmem:[%s4529_s10 + $0x28] sm:$0xff] }
 0x16c   : > { %2974 = vmatprep.subr.bf16.mxu1 %v4549_v8  ;;  %5772 = vst [vmem:[#allocation42_spill] sm:$0xff] %v4753_v7  ;;  %v4756_v8 = vld [vmem:[%s4529_s10] sm:$0xff]  ;;  %v803_v61 = vld [vmem:[#allocation10 + $0x208] sm:$0xff] }
 0x16e   : > { %1222 = vmatmul.mubr.f32.gmra.mrb[6].mxu1 %v1113_v62  ;;  %v807_v62 = vld [vmem:[#allocation10 + $0x228] sm:$0xff] }
 0x16f   : > { %2976 = vmatpush1.bf16.msra.mxu1 %v4554_v13  ;;  %v1986_v13 = vadd.f32 %v4753_v7, %v4750_v3 }
 0x170   : > { %2978 = vmatprep.subr.bf16.mxu1 %v4558_v14  ;;  %v4761_v14 = vld [vmem:[%s4529_s10 + $0x8] sm:$0xff] }
 0x171   : > { %1987 = vadd.xlane.f32.xlu1 %v1986_v13  ;;  %v4828_v13 = vpack.c.bf16 %v798_v60, %v794_v59  ;;  %v851_v59 = vld [vmem:[#allocation10 + $0x388] sm:$0xff] }
 0x172   : > { %v855_v60 = vld [vmem:[#allocation10 + $0x3a8] sm:$0xff] }
 0x173   : > { %2980 = vmatpush1.bf16.msra.mxu1 %v4562_v19  ;;  %v4764_v19 = vld [vmem:[%s4529_s10 + $0x30] sm:$0xff] }
 0x174   : > { %2982 = vmatprep.subr.bf16.mxu1 %v4566_v20  ;;  %5773 = vst [vmem:[#allocation43_spill] sm:$0xff] %v4764_v19  ;;  %v4767_v20 = vld [vmem:[%s4529_s10 + $0x38] sm:$0xff] }
 0x175   : > { %5774 = vst [vmem:[#allocation44_spill] sm:$0xff] %v4767_v20 }
 0x177   : > { %2984 = vmatpush1.bf16.msra.mxu1 %v4570_v25  ;;  %v1783_v25 = vadd.f32 %v4761_v14, %v4756_v8 }
 0x178   : > { %2986 = vmatprep.subr.bf16.mxu1 %v4574_v26  ;;  %v4772_v26 = vld [vmem:[%s4529_s10 + $0x10] sm:$0xff] }
 0x179   : > { %1784 = vadd.xlane.f32.xlu0 %v1783_v25  ;;  %v4831_v25 = vpack.c.bf16 %v807_v62, %v803_v61 }
 0x17b   : > { %2988 = vmatpush1.bf16.msra.mxu1 %v4578_v31  ;;  %v4775_v31 = vld [vmem:[%s4529_s10 + $0x18] sm:$0xff] }
 0x17c   : > { %2990 = vmatprep.subr.bf16.mxu1 %v4582_v32  ;;  %5775 = vst [vmem:[#allocation45_spill] sm:$0xff] %v4775_v31  ;;  %v739_v32 = vld [vmem:[#allocation10 + $0x8] sm:$0xff] }
 0x17f   : > { %2992 = vmatpush1.bf16.msra.mxu1 %v4586_v37  ;;  %v1989_v37 = vadd.f32 %v4767_v20, %v4764_v19 }
 0x180   : > { %2994 = vmatprep.subr.bf16.mxu1 %v4590_v38  ;;  %v743_v38 = vld [vmem:[#allocation10 + $0x28] sm:$0xff] }
 0x181   : > { %1990 = vadd.xlane.f32.xlu1 %v1989_v37  ;;  %v806_v37 = vld [vmem:[#allocation10 + $0x220] sm:$0xff] }
 0x183   : > { %2996 = vmatpush1.bf16.msra.mxu1 %v4596_v45  ;;  %v741_v45 = vld [vmem:[#allocation10 + $0x18] sm:$0xff] }
 0x184   : > { %2998 = vmatprep.subr.bf16.mxu1 %v4600_v46  ;;  %v745_v46 = vld [vmem:[#allocation10 + $0x38] sm:$0xff] }
 0x187   : > { %3000 = vmatpush1.bf16.msra.mxu1 %v4604_v51  ;;  %v1786_v51 = vadd.f32 %v4775_v31, %v4772_v26  ;;  %v816_v31 = vld [vmem:[#allocation10 + $0x270] sm:$0xff] }
 0x188   : > { %3002 = vmatprep.subr.bf16.mxu1 %v4608_v52  ;;  %v4781_v52 = vpack.c.bf16 %v743_v38, %v739_v32  ;;  %v802_v32 = vld [vmem:[#allocation10 + $0x200] sm:$0xff]  ;;  %v811_v38 = vld [vmem:[#allocation10 + $0x248] sm:$0xff] }
 0x189   : > { %1787 = vadd.xlane.f32.xlu0 %v1786_v51 }
 0x18a   : > { %5776 = vst [vmem:[#allocation46_spill] sm:$0xff] %v4781_v52  ;;  %3034 = vmatprep.subr.bf16.mxu0 %v4781_v52 }
 0x18b   : > { %3004 = vmatpush1.bf16.msra.mxu1 %v4612_v57  ;;  %v4783_v57 = vpack.c.bf16 %v745_v46, %v741_v45  ;;  %v815_v45 = vld [vmem:[#allocation10 + $0x268] sm:$0xff]  ;;  %v4834_v46 = vpack.c.bf16 %v806_v37, %v802_v32  ;;  %v4864_v32 = vpack.c.bf16 %v846_v50, %v842_v49  ;;  %v4867_v37 = vpack.c.bf16 %v855_v60, %v851_v59 }
 0x18c   : > { %3006 = vmatprep.subr.bf16.mxu1 %v4616_v58  ;;  %v738_v58 = vld [vmem:[#allocation10] sm:$0xff]  ;;  %v4837_v51 = vpack.c.bf16 %v815_v45, %v811_v38 }
 0x18d   : > { %5777 = vst [vmem:[#allocation47_spill] sm:$0xff] %v4783_v57  ;;  %5783 = vst [vmem:[#allocation53_spill] sm:$0xff] %v4864_v32  ;;  %v850_v38 = vld [vmem:[#allocation10 + $0x380] sm:$0xff] }
 0x18e   : > { %5784 = vst [vmem:[#allocation54_spill] sm:$0xff] %v4867_v37  ;;  %v854_v45 = vld [vmem:[#allocation10 + $0x3a0] sm:$0xff] }
 0x18f   : > { %3008 = vmatpush1.bf16.msra.mxu1 %v4620_v63  ;;  %v742_v63 = vld [vmem:[#allocation10 + $0x20] sm:$0xff] }
 0x190   : > { %3010 = vmatprep.subr.bf16.mxu1 %v4624_v0  ;;  %v4785_v0 = vpack.c.bf16 %v742_v63, %v738_v58  ;;  %v810_v58 = vld [vmem:[#allocation10 + $0x240] sm:$0xff] }
 0x191   : > { %v814_v63 = vld [vmem:[#allocation10 + $0x260] sm:$0xff] }
 0x192   : > { %3036 = vmatpush1.bf16.msra.mxu0 %v4785_v0 }
 0x193   : > { %3012 = vmatpush1.bf16.msra.mxu1 %v4628_v6  ;;  %v750_v6 = vld [vmem:[#allocation10 + $0x60] sm:$0xff]  ;;  %3038 = vmatprep.subr.bf16.mxu0 %v4789_v4 }
 0x194   : > { %3014 = vmatprep.subr.bf16.mxu1 %v4632_v9  ;;  %v4793_v9 = vpack.c.bf16 %v750_v6, %v746_v5  ;;  %v4840_v5 = vpack.c.bf16 %v814_v63, %v810_v58  ;;  %v4843_v6 = vpack.c.bf16 %v823_v2, %v819_v1 }
 0x196   : > { %3040 = vmatpush1.bf16.msra.mxu0 %v4793_v9 }
 0x197   : > { %3016 = vmatpush1.bf16.msra.mxu1 %v4636_v16  ;;  %v758_v16 = vld [vmem:[#allocation10 + $0xa0] sm:$0xff]  ;;  %3042 = vmatprep.subr.bf16.mxu0 %v4795_v12 }
 0x198   : > { %3018 = vmatprep.subr.bf16.mxu1 %v4640_v17  ;;  %v763_v17 = vld [vmem:[#allocation10 + $0xc8] sm:$0xff]  ;;  %v4798_v18 = vpack.c.bf16 %v758_v16, %v754_v15 }
 0x199   : > { %v4801_v22 = vpack.c.bf16 %v767_v21, %v763_v17  ;;  %v827_v15 = vld [vmem:[#allocation10 + $0x2c8] sm:$0xff]  ;;  %v4846_v17 = vpack.c.bf16 %v822_v11, %v818_v10  ;;  %v4870_v10 = vpack.c.bf16 %v854_v45, %v850_v38  ;;  %v748_v38 = vld [vmem:[#allocation10 + $0x50] sm:$0xff] }
 0x19a   : > { %3044 = vmatpush1.bf16.msra.mxu0 %v4798_v18  ;;  %v831_v16 = vld [vmem:[#allocation10 + $0x2e8] sm:$0xff]  ;;  %v752_v45 = vld [vmem:[#allocation10 + $0x70] sm:$0xff] }
 0x19b   : > { %3020 = vmatpush1.bf16.msra.mxu1 %v4644_v24  ;;  %v766_v24 = vld [vmem:[#allocation10 + $0xe0] sm:$0xff]  ;;  %3046 = vmatprep.subr.bf16.mxu0 %v4801_v22  ;;  %v4849_v21 = vpack.c.bf16 %v831_v16, %v827_v15  ;;  %5785 = vst [vmem:[#allocation55_spill] sm:$0xff] %v4870_v10 }
 0x19c   : > { %3022 = vmatprep.subr.bf16.mxu1 %v4648_v27  ;;  %v771_v27 = vld [vmem:[#allocation10 + $0x108] sm:$0xff]  ;;  %v4804_v29 = vpack.c.bf16 %v766_v24, %v762_v23  ;;  %v826_v23 = vld [vmem:[#allocation10 + $0x2c0] sm:$0xff] }
 0x19d   : > { %v4807_v30 = vpack.c.bf16 %v775_v28, %v771_v27  ;;  %5778 = vst [vmem:[#allocation48_spill] sm:$0xff] %v4849_v21  ;;  %v830_v24 = vld [vmem:[#allocation10 + $0x2e0] sm:$0xff]  ;;  %v835_v27 = vld [vmem:[#allocation10 + $0x308] sm:$0xff] }
 0x19e   : > { %3048 = vmatpush1.bf16.msra.mxu0 %v4804_v29  ;;  %v839_v28 = vld [vmem:[#allocation10 + $0x328] sm:$0xff] }
 0x19f   : > { %3024 = vmatpush1.bf16.msra.mxu1 %v4652_v34  ;;  %v774_v34 = vld [vmem:[#allocation10 + $0x120] sm:$0xff]  ;;  %3050 = vmatprep.subr.bf16.mxu0 %v4807_v30 }
 0x1a0   : > { %3026 = vmatprep.subr.bf16.mxu1 %v4656_v35  ;;  %v779_v35 = vld [vmem:[#allocation10 + $0x148] sm:$0xff]  ;;  %v4810_v39 = vpack.c.bf16 %v774_v34, %v770_v33  ;;  %v4852_v33 = vpack.c.bf16 %v830_v24, %v826_v23  ;;  %v4855_v34 = vpack.c.bf16 %v839_v28, %v835_v27  ;;  %v740_v23 = vld [vmem:[#allocation10 + $0x10] sm:$0xff]  ;;  %v749_v28 = vld [vmem:[#allocation10 + $0x58] sm:$0xff] }
 0x1a1   : > { %v4813_v40 = vpack.c.bf16 %v783_v36, %v779_v35  ;;  %v834_v35 = vld [vmem:[#allocation10 + $0x300] sm:$0xff]  ;;  %v744_v24 = vld [vmem:[#allocation10 + $0x30] sm:$0xff] }
 0x1a2   : > { %3052 = vmatpush1.bf16.msra.mxu0 %v4810_v39  ;;  %5779 = vst [vmem:[#allocation49_spill] sm:$0xff] %v4852_v33  ;;  %5780 = vst [vmem:[#allocation50_spill] sm:$0xff] %v4855_v34  ;;  %v838_v36 = vld [vmem:[#allocation10 + $0x320] sm:$0xff]  ;;  %v4874_v49 = vpack.c.bf16 %v744_v24, %v740_v23  ;;  %v769_v23 = vld [vmem:[#allocation10 + $0xf8] sm:$0xff] }
 0x1a3   : > { %3028 = vmatpush1.bf16.msra.mxu1 %v4660_v42  ;;  %v782_v42 = vld [vmem:[#allocation10 + $0x160] sm:$0xff]  ;;  %3054 = vmatprep.subr.bf16.mxu0 %v4813_v40  ;;  %v773_v24 = vld [vmem:[#allocation10 + $0x118] sm:$0xff] }
 0x1a4   : > { %3030 = vmatprep.subr.bf16.mxu1 %v4664_v43  ;;  %v787_v43 = vld [vmem:[#allocation10 + $0x188] sm:$0xff]  ;;  %v4816_v47 = vpack.c.bf16 %v782_v42, %v778_v41 }
 0x1a5   : > { %v843_v41 = vld [vmem:[#allocation10 + $0x348] sm:$0xff] }
 0x1a6   : > { %3056 = vmatpush1.bf16.msra.mxu0 %v4816_v47  ;;  %v847_v42 = vld [vmem:[#allocation10 + $0x368] sm:$0xff] }
 0x1a7   : > { %3032 = vmatpush1.bf16.msra.mxu1 %v4668_v48  ;;  %v4819_v48 = vpack.c.bf16 %v791_v44, %v787_v43  ;;  %v4858_v43 = vpack.c.bf16 %v838_v36, %v834_v35  ;;  %v4861_v44 = vpack.c.bf16 %v847_v42, %v843_v41  ;;  %v753_v35 = vld [vmem:[#allocation10 + $0x78] sm:$0xff] }
 0x1a8   : > { %3098 = vmatprep.subr.bf16.mxu1 %v4783_v57  ;;  %v4876_v60 = vpack.c.bf16 %v753_v35, %v749_v28 }
 0x1a9   : > { %3058 = vmatprep.subr.bf16.mxu0 %v4819_v48  ;;  %5781 = vst [vmem:[#allocation51_spill] sm:$0xff] %v4858_v43  ;;  %5782 = vst [vmem:[#allocation52_spill] sm:$0xff] %v4861_v44 }
 0x1aa   : > { %3060 = vmatpush1.bf16.msra.mxu0 %v4822_v55 }
 0x1ab   : > { %3062 = vmatprep.subr.bf16.mxu0 %v4825_v56 }
 0x1ae   : > { %3064 = vmatpush1.bf16.msra.mxu0 %v4828_v13 }
 0x1af   : > { %3066 = vmatprep.subr.bf16.mxu0 %v4831_v25 }
 0x1b2   : > { %3068 = vmatpush1.bf16.msra.mxu0 %v4834_v46 }
 0x1b3   : > { %3070 = vmatprep.subr.bf16.mxu0 %v4837_v51 }
 0x1b6   : > { %3072 = vmatpush1.bf16.msra.mxu0 %v4840_v5 }
 0x1b7   : > { %3074 = vmatprep.subr.bf16.mxu0 %v4843_v6 }
 0x1ba   : > { %3076 = vmatpush1.bf16.msra.mxu0 %v4846_v17 }
 0x1bb   : > { %3078 = vmatprep.subr.bf16.mxu0 %v4849_v21  ;;  %v848_v21 = vld [vmem:[#allocation10 + $0x370] sm:$0xff] }
 0x1be   : > { %3080 = vmatpush1.bf16.msra.mxu0 %v4852_v33  ;;  %v844_v33 = vld [vmem:[#allocation10 + $0x350] sm:$0xff] }
 0x1bf   : > { %3082 = vmatprep.subr.bf16.mxu0 %v4855_v34  ;;  %v840_v34 = vld [vmem:[#allocation10 + $0x330] sm:$0xff] }
 0x1c2   : > { %3084 = vmatpush1.bf16.msra.mxu0 %v4858_v43  ;;  %v836_v43 = vld [vmem:[#allocation10 + $0x310] sm:$0xff] }
 0x1c3   : > { %3086 = vmatprep.subr.bf16.mxu0 %v4861_v44  ;;  %v832_v44 = vld [vmem:[#allocation10 + $0x2f0] sm:$0xff] }
 0x1c6   : > { %3088 = vmatpush1.bf16.msra.mxu0 %v4864_v32  ;;  %v828_v32 = vld [vmem:[#allocation10 + $0x2d0] sm:$0xff] }
 0x1c7   : > { %3090 = vmatprep.subr.bf16.mxu0 %v4867_v37  ;;  %v824_v37 = vld [vmem:[#allocation10 + $0x2b0] sm:$0xff] }
 0x1ca   : > { %3092 = vmatpush1.bf16.msra.mxu0 %v4870_v10  ;;  %v820_v10 = vld [vmem:[#allocation10 + $0x290] sm:$0xff] }
 0x1fd   : > { %v1100_v53 = vpop.f32.mrb[0].mxu1  ;;  %v1339_v54 = vpop.f32.mrb[0].mxu0 }
 0x1fe   : > { %v1102_v61 = vpop.f32.mrb[1].mxu1  ;;  %v1341_v62 = vpop.f32.mrb[1].mxu0 }
 0x201   : > { %v1106_v58 = vpop.f32.mrb[2].mxu1  ;;  %v1345_v63 = vpop.f32.mrb[2].mxu0 }
 0x202   : > { %v1108_v1 = vpop.f32.mrb[3].mxu1  ;;  %v1347_v2 = vpop.f32.mrb[3].mxu0 }
 0x23d   : > { %v1217_v11 = vpop.f32.mrb[4].mxu1 }
 0x23e   : > { %v1228_v15 = vmul.f32 %v1217_v11, %v1100_v53  ;;  %v1219_v16 = vpop.f32.mrb[5].mxu1  ;;  %v757_v53 = vld [vmem:[#allocation10 + $0x98] sm:$0xff] }
 0x23f   : > { %v1229_v27 = vmul.f32 %v1219_v16, %v1102_v61  ;;  %v761_v11 = vld [vmem:[#allocation10 + $0xb8] sm:$0xff] }
 0x240   : > { %v1350_v36 = vmul.f32 %v1339_v54, %v1228_v15  ;;  %v4879_v54 = vpack.c.bf16 %v752_v45, %v748_v38  ;;  %v760_v15 = vld [vmem:[#allocation10 + $0xb0] sm:$0xff]  ;;  %v765_v16 = vld [vmem:[#allocation10 + $0xd8] sm:$0xff] }
 0x241   : > { %v1351_v41 = vmul.f32 %v1341_v62, %v1229_v27  ;;  %v1223_v42 = vpop.f32.mrb[6].mxu1  ;;  %v4882_v62 = vpack.c.bf16 %v761_v11, %v757_v53  ;;  %v777_v27 = vld [vmem:[#allocation10 + $0x138] sm:$0xff]  ;;  %v780_v38 = vld [vmem:[#allocation10 + $0x150] sm:$0xff] }
 0x242   : > { %v1230_v50 = vmul.f32 %v1223_v42, %v1106_v58  ;;  %v1225_v59 = vpop.f32.mrb[7].mxu1  ;;  %v756_v58 = vld [vmem:[#allocation10 + $0x90] sm:$0xff]  ;;  %v4894_v35 = vpack.c.bf16 %v777_v27, %v773_v24  ;;  %v785_v42 = vld [vmem:[#allocation10 + $0x178] sm:$0xff] }
 0x243   : > { %v1231_v20 = vmul.f32 %v1225_v59, %v1108_v1  ;;  %1418 = vmatprep.mubr.f32.mxu1 %v1351_v41  ;;  %v4885_v1 = vpack.c.bf16 %v760_v15, %v756_v58  ;;  %v781_v41 = vld [vmem:[#allocation10 + $0x158] sm:$0xff]  ;;  %v784_v45 = vld [vmem:[#allocation10 + $0x170] sm:$0xff] }
 0x244   : > { %v1352_v7 = vmul.f32 %v1345_v63, %v1230_v50  ;;  %1419 = vmatmul.mubr.f32.vlgmr.msra.gmra.mrb[8].mxu1 %v1350_v36  ;;  %v764_v63 = vld [vmem:[#allocation10 + $0xd0] sm:$0xff]  ;;  %v4900_v59 = vpack.c.bf16 %v785_v42, %v781_v41  ;;  %v789_v53 = vld [vmem:[#allocation10 + $0x198] sm:$0xff] }
 0x245   : > { %v1353_v61 = vmul.f32 %v1347_v2, %v1231_v20  ;;  %3100 = vmatpush1.bf16.msra.mxu1 %v4874_v49  ;;  %v4888_v20 = vpack.c.bf16 %v769_v23, %v765_v16  ;;  %v768_v2 = vld [vmem:[#allocation10 + $0xf0] sm:$0xff]  ;;  %v793_v11 = vld [vmem:[#allocation10 + $0x1b8] sm:$0xff] }
 0x246   : > { %3102 = vmatprep.subr.bf16.mxu1 %v4876_v60  ;;  %v4891_v28 = vpack.c.bf16 %v768_v2, %v764_v63  ;;  %v776_v36 = vld [vmem:[#allocation10 + $0x130] sm:$0xff]  ;;  %v4906_v58 = vpack.c.bf16 %v793_v11, %v789_v53  ;;  %v797_v23 = vld [vmem:[#allocation10 + $0x1d8] sm:$0xff] }
 0x247   : > { %1424 = vmatprep.mubr.f32.mxu1 %v1353_v61  ;;  %v4903_v61 = vpack.c.bf16 %v784_v45, %v780_v38  ;;  %v788_v15 = vld [vmem:[#allocation10 + $0x190] sm:$0xff]  ;;  %v801_v63 = vld [vmem:[#allocation10 + $0x1f8] sm:$0xff] }
 0x248   : > { %1425 = vmatmul.mubr.f32.gmra.mrb[10].mxu1 %v1352_v7  ;;  %v772_v7 = vld [vmem:[#allocation10 + $0x110] sm:$0xff]  ;;  %v4912_v24 = vpack.c.bf16 %v801_v63, %v797_v23  ;;  %v809_v41 = vld [vmem:[#allocation10 + $0x238] sm:$0xff] }
 0x249   : > { %3104 = vmatpush1.bf16.msra.mxu1 %v4879_v54  ;;  %v4897_v50 = vpack.c.bf16 %v776_v36, %v772_v7  ;;  %v792_v16 = vld [vmem:[#allocation10 + $0x1b0] sm:$0xff]  ;;  %v805_v36 = vld [vmem:[#allocation10 + $0x218] sm:$0xff] }
 0x24a   : > { %3106 = vmatprep.subr.bf16.mxu1 %v4882_v62  ;;  %v4909_v2 = vpack.c.bf16 %v792_v16, %v788_v15  ;;  %v796_v27 = vld [vmem:[#allocation10 + $0x1d0] sm:$0xff]  ;;  %v4918_v38 = vpack.c.bf16 %v809_v41, %v805_v36  ;;  %v813_v11 = vld [vmem:[#allocation10 + $0x258] sm:$0xff] }
 0x24b   : > { %v800_v7 = vld [vmem:[#allocation10 + $0x1f0] sm:$0xff]  ;;  %v817_v15 = vld [vmem:[#allocation10 + $0x278] sm:$0xff] }
 0x24c   : > { %v4915_v42 = vpack.c.bf16 %v800_v7, %v796_v27  ;;  %v804_v45 = vld [vmem:[#allocation10 + $0x210] sm:$0xff]  ;;  %v4924_v23 = vpack.c.bf16 %v817_v15, %v813_v11  ;;  %v821_v27 = vld [vmem:[#allocation10 + $0x298] sm:$0xff]  ;;  %v4933_v11 = vpack.c.bf16 %v824_v37, %v820_v10 }
 0x24d   : > { %3108 = vmatpush1.bf16.msra.mxu1 %v4885_v1  ;;  %v808_v53 = vld [vmem:[#allocation10 + $0x230] sm:$0xff]  ;;  %v825_v7 = vld [vmem:[#allocation10 + $0x2b8] sm:$0xff] }
 0x24e   : > { %3110 = vmatprep.subr.bf16.mxu1 %v4888_v20  ;;  %v4921_v16 = vpack.c.bf16 %v808_v53, %v804_v45  ;;  %v812_v63 = vld [vmem:[#allocation10 + $0x250] sm:$0xff]  ;;  %v4930_v41 = vpack.c.bf16 %v825_v7, %v821_v27  ;;  %v829_v45 = vld [vmem:[#allocation10 + $0x2d8] sm:$0xff]  ;;  %v4939_v27 = vpack.c.bf16 %v832_v44, %v828_v32 }
 0x24f   : > { %v4927_v36 = vpack.c.bf16 %v816_v31, %v812_v63  ;;  %v833_v53 = vld [vmem:[#allocation10 + $0x2f8] sm:$0xff] }
 0x250   : > { %v4936_v15 = vpack.c.bf16 %v833_v53, %v829_v45  ;;  %v837_v31 = vld [vmem:[#allocation10 + $0x318] sm:$0xff]  ;;  %5787 = vst [vmem:[#allocation57_spill] sm:$0xff] %v4939_v27  ;;  %v4945_v45 = vpack.c.bf16 %v840_v34, %v836_v43  ;;  %v859_v43 = vld [vmem:[#allocation10 + $0x3c8] sm:$0xff] }
 0x251   : > { %3112 = vmatpush1.bf16.msra.mxu1 %v4891_v28  ;;  %v841_v63 = vld [vmem:[#allocation10 + $0x338] sm:$0xff] }
 0x252   : > { %3114 = vmatprep.subr.bf16.mxu1 %v4894_v35  ;;  %5786 = vst [vmem:[#allocation56_spill] sm:$0xff] %v4936_v15  ;;  %v4942_v7 = vpack.c.bf16 %v841_v63, %v837_v31  ;;  %v845_v37 = vld [vmem:[#allocation10 + $0x358] sm:$0xff]  ;;  %5789 = vst [vmem:[#allocation59_spill] sm:$0xff] %v4945_v45  ;;  %v4951_v31 = vpack.c.bf16 %v848_v21, %v844_v33  ;;  %v858_v33 = vld [vmem:[#allocation10 + $0x3c0] sm:$0xff] }
 0x253   : > { %v849_v10 = vld [vmem:[#allocation10 + $0x378] sm:$0xff] }
 0x254   : > { %5788 = vst [vmem:[#allocation58_spill] sm:$0xff] %v4942_v7  ;;  %v4948_v53 = vpack.c.bf16 %v849_v10, %v845_v37  ;;  %v853_v44 = vld [vmem:[#allocation10 + $0x398] sm:$0xff]  ;;  %5791 = vst [vmem:[#allocation61_spill] sm:$0xff] %v4951_v31  ;;  %v863_v37 = vld [vmem:[#allocation10 + $0x3e8] sm:$0xff] }
 0x255   : > { %3116 = vmatpush1.bf16.msra.mxu1 %v4897_v50  ;;  %v857_v32 = vld [vmem:[#allocation10 + $0x3b8] sm:$0xff] }
 0x256   : > { %3118 = vmatprep.subr.bf16.mxu1 %v4900_v59  ;;  %5790 = vst [vmem:[#allocation60_spill] sm:$0xff] %v4948_v53  ;;  %v4954_v63 = vpack.c.bf16 %v857_v32, %v853_v44  ;;  %v861_v10 = vld [vmem:[#allocation10 + $0x3d8] sm:$0xff] }
 0x257   : > { %v865_v21 = vld [vmem:[#allocation10 + $0x3f8] sm:$0xff] }
 0x258   : > { %5792 = vst [vmem:[#allocation62_spill] sm:$0xff] %v4954_v63  ;;  %v4963_v44 = vpack.c.bf16 %v865_v21, %v861_v10 }
 0x259   : > { %3120 = vmatpush1.bf16.msra.mxu1 %v4903_v61 }
 0x25a   : > { %3122 = vmatprep.subr.bf16.mxu1 %v4906_v58  ;;  %5795 = vst [vmem:[#allocation65_spill] sm:$0xff] %v4963_v44 }
 0x25d   : > { %3124 = vmatpush1.bf16.msra.mxu1 %v4909_v2 }
 0x25e   : > { %3126 = vmatprep.subr.bf16.mxu1 %v4912_v24 }
 0x261   : > { %3128 = vmatpush1.bf16.msra.mxu1 %v4915_v42 }
 0x262   : > { %3130 = vmatprep.subr.bf16.mxu1 %v4918_v38 }
 0x265   : > { %3132 = vmatpush1.bf16.msra.mxu1 %v4921_v16 }
 0x266   : > { %3134 = vmatprep.subr.bf16.mxu1 %v4924_v23 }
 0x269   : > { %3136 = vmatpush1.bf16.msra.mxu1 %v4927_v36 }
 0x26a   : > { %3138 = vmatprep.subr.bf16.mxu1 %v4930_v41 }
 0x26d   : > { %3140 = vmatpush1.bf16.msra.mxu1 %v4933_v11 }
 0x26e   : > { %3142 = vmatprep.subr.bf16.mxu1 %v4936_v15  ;;  %v852_v15 = vld [vmem:[#allocation10 + $0x390] sm:$0xff] }
 0x271   : > { %3144 = vmatpush1.bf16.msra.mxu1 %v4939_v27  ;;  %v856_v27 = vld [vmem:[#allocation10 + $0x3b0] sm:$0xff] }
 0x272   : > { %3146 = vmatprep.subr.bf16.mxu1 %v4942_v7  ;;  %v4957_v34 = vpack.c.bf16 %v856_v27, %v852_v15  ;;  %v860_v7 = vld [vmem:[#allocation10 + $0x3d0] sm:$0xff]  ;;  %v4184_v27 = vmov 0  }
 0x273   : > { %3695 = vset.pattern.permute.xlu0 %v4184_v27  ;;  %3696 = vset.pattern.permute.xlu1 %v4184_v27 }
 0x274   : > { %5793 = vst [vmem:[#allocation63_spill] sm:$0xff] %v4957_v34 }
 0x275   : > { %3148 = vmatpush1.bf16.msra.mxu1 %v4945_v45  ;;  %v4961_v45 = vpack.c.bf16 %v863_v37, %v859_v43  ;;  %v1785_v43 = vpop.xlane.xlu0 %1784 }
 0x276   : > { %3150 = vmatprep.subr.bf16.mxu1 %v4948_v53  ;;  %v862_v53 = vld [vmem:[#allocation10 + $0x3e0] sm:$0xff] }
 0x277   : > { %5794 = vst [vmem:[#allocation64_spill] sm:$0xff] %v4961_v45  ;;  %v4965_v32 = vpack.c.bf16 %v862_v53, %v858_v33  ;;  %3094 = vmatprep.subr.bf16.mxu0 %v4961_v45  ;;  %v1988_v53 = vpop.xlane.xlu1 %1987 }
 0x278   : > { %v1992_v37 = vsub.f32 %v1988_v53, %v4750_v3 }
 0x279   : > { %3152 = vmatpush1.bf16.msra.mxu1 %v4951_v31  ;;  %5796 = vst [vmem:[#allocation66_spill] sm:$0xff] %v4965_v32  ;;  %v864_v31 = vld [vmem:[#allocation10 + $0x3f0] sm:$0xff]  ;;  %3096 = vmatpush1.bf16.msra.mxu0 %v4965_v32  ;;  %v1788_v10 = vpop.xlane.xlu0 %1787 }
 0x27a   : > { %3154 = vmatprep.subr.bf16.mxu1 %v4954_v63  ;;  %v4968_v15 = vpack.c.bf16 %v864_v31, %v860_v7  ;;  %3162 = vmatprep.subr.bf16.mxu0 %v4781_v52  ;;  %v1789_v7 = vsub.f32 %v1785_v43, %v4756_v8 }
 0x27b   : > { %v1991_v31 = vpop.xlane.xlu1 %1990 }
 0x27c   : > { %5797 = vst [vmem:[#allocation67_spill] sm:$0xff] %v4968_v15  ;;  %v2018_v21 = vmul.f32 %v1992_v37, %v1789_v7  ;;  %v1993_v33 = vsub.f32 %v1991_v31, %v4764_v19  ;;  %v5806_v37 = vld [vmem:[#allocation52_spill] sm:$0xff]  ;;  %v5808_v31 = vld [vmem:[#allocation53_spill] sm:$0xff] }
 0x27d   : > { %3156 = vmatpush1.bf16.msra.mxu1 %v4957_v34  ;;  %v5807_v7 = vld [vmem:[#allocation60_spill] sm:$0xff] }
 0x27e   : > { %3158 = vmatprep.subr.bf16.mxu1 %v4963_v44 }
 0x280   : > { %v5816_v19 = vld [vmem:[#allocation66_spill] sm:$0xff] }
 0x281   : > { %3160 = vmatpush1.bf16.msra.mxu1 %v4968_v15  ;;  %v1790_v15 = vsub.f32 %v1788_v10, %v4772_v26  ;;  %v5809_v10 = vld [vmem:[#allocation61_spill] sm:$0xff] }
 0x282   : > { %3226 = vmatprep.subr.bf16.mxu1 %v4783_v57 }
 0x283   : > { %v2019_v34 = vmul.f32 %v1993_v33, %v1790_v15  ;;  %v5805_v15 = vld [vmem:[#allocation59_spill] sm:$0xff]  ;;  %v5811_v33 = vld [vmem:[#allocation62_spill] sm:$0xff] }
 0x284   : > { %v5817_v3 = vld [vmem:[#allocation67_spill] sm:$0xff] }
 0x317   : > { %v1420_v32 = vpop.f32.mrb[8].mxu1 }
 0x318   : > { %v1431_v52 = vmul.f32 0.00390625, %v1420_v32  ;;  %v1422_v44 = vpop.f32.mrb[9].mxu1 }
 0x319   : > { %v1432_v45 = vmul.f32 0.00390625, %v1422_v44  ;;  %v5804_v44 = vld [vmem:[#allocation51_spill] sm:$0xff] }
 0x31a   : > { %v2198_v57 = vmul.f32 %v2018_v21, %v1431_v52  ;;  %v5810_v21 = vld [vmem:[#allocation54_spill] sm:$0xff] }
 0x31b   : > { %v1426_v27 = vpop.f32.mrb[10].mxu1  ;;  %1499 = vmatprep.mubr.f32.mxu0 %v1432_v45  ;;  %1576 = vmatprep.mubr.f32.mxu1 %v1432_v45  ;;  %v5801_v45 = vld [vmem:[#allocation57_spill] sm:$0xff] }
 0x31c   : > { %v1433_v63 = vmul.f32 0.00390625, %v1426_v27  ;;  %2207 = vperm.xlu0 %3695, %v2198_v57   ;;  %v1428_v53 = vpop.f32.mrb[11].mxu1  ;;  %1500 = vmatmul.mubr.f32.vlgmr.msra.gmra.mrb[4].mxu0 %v1431_v52  ;;  %v5800_v57 = vld [vmem:[#allocation49_spill] sm:$0xff]  ;;  %v5812_v27 = vld [vmem:[#allocation55_spill] sm:$0xff] }
 0x31d   : > { %v1434_v43 = vmul.f32 0.00390625, %v1428_v53  ;;  %1577 = vmatmul.mubr.f32.vlgmr.msra.gmra.mrb[12].mxu1 %v1431_v52  ;;  %3164 = vmatpush1.bf16.msra.mxu0 %v4785_v0  ;;  %v5799_v52 = vld [vmem:[#allocation56_spill] sm:$0xff]  ;;  %v5813_v53 = vld [vmem:[#allocation63_spill] sm:$0xff] }
 0x31e   : > { %3228 = vmatpush1.bf16.msra.mxu1 %v4874_v49  ;;  %3166 = vmatprep.subr.bf16.mxu0 %v4789_v4  ;;  %v2199_v32 = vmul.f32 %v2019_v34, %v1433_v63  ;;  %v5803_v34 = vld [vmem:[#allocation58_spill] sm:$0xff] }
 0x31f   : > { %1505 = vmatprep.mubr.f32.mxu0 %v1434_v43  ;;  %1582 = vmatprep.mubr.f32.mxu1 %v1434_v43  ;;  %v5814_v43 = vld [vmem:[#allocation64_spill] sm:$0xff] }
 0x320   : > { %3230 = vmatprep.subr.bf16.mxu1 %v4876_v60  ;;  %2212 = vperm.xlu1 %3696, %v2199_v32   ;;  %v5815_v32 = vld [vmem:[#allocation65_spill] sm:$0xff] }
 0x321   : > { %3168 = vmatpush1.bf16.msra.mxu0 %v4793_v9  ;;  %1583 = vmatmul.mubr.f32.gmra.mrb[14].mxu1 %v1433_v63 }
 0x322   : > { %3232 = vmatpush1.bf16.msra.mxu1 %v4879_v54  ;;  %1506 = vmatmul.mubr.f32.gmra.mrb[6].mxu0 %v1433_v63  ;;  %v5802_v63 = vld [vmem:[#allocation50_spill] sm:$0xff] }
 0x323   : > { %3170 = vmatprep.subr.bf16.mxu0 %v4795_v12  ;;  %3234 = vmatprep.subr.bf16.mxu1 %v4882_v62 }
 0x324   : > { %1693 = vmatprep.mubr.f32.mxu0 %v4761_v14  ;;  %1770 = vmatprep.mubr.f32.mxu1 %v4761_v14  ;;  %v5798_v14 = vld [vmem:[#allocation48_spill] sm:$0xff] }
 0x325   : > { %3172 = vmatpush1.bf16.msra.mxu0 %v4798_v18 }
 0x326   : > { %3236 = vmatpush1.bf16.msra.mxu1 %v4885_v1  ;;  %3174 = vmatprep.subr.bf16.mxu0 %v4801_v22 }
 0x327   : > { %3238 = vmatprep.subr.bf16.mxu1 %v4888_v20 }
 0x329   : > { %3176 = vmatpush1.bf16.msra.mxu0 %v4804_v29 }
 0x32a   : > { %3240 = vmatpush1.bf16.msra.mxu1 %v4891_v28  ;;  %3178 = vmatprep.subr.bf16.mxu0 %v4807_v30 }
 0x32b   : > { %3242 = vmatprep.subr.bf16.mxu1 %v4894_v35 }
 0x32d   : > { %3180 = vmatpush1.bf16.msra.mxu0 %v4810_v39 }
 0x32e   : > { %3244 = vmatpush1.bf16.msra.mxu1 %v4897_v50  ;;  %3182 = vmatprep.subr.bf16.mxu0 %v4813_v40 }
 0x32f   : > { %3246 = vmatprep.subr.bf16.mxu1 %v4900_v59 }
 0x331   : > { %3184 = vmatpush1.bf16.msra.mxu0 %v4816_v47 }
 0x332   : > { %3248 = vmatpush1.bf16.msra.mxu1 %v4903_v61  ;;  %3186 = vmatprep.subr.bf16.mxu0 %v4819_v48 }
 0x333   : > { %3250 = vmatprep.subr.bf16.mxu1 %v4906_v58 }
 0x335   : > { %3188 = vmatpush1.bf16.msra.mxu0 %v4822_v55 }
 0x336   : > { %3252 = vmatpush1.bf16.msra.mxu1 %v4909_v2  ;;  %3190 = vmatprep.subr.bf16.mxu0 %v4825_v56 }
 0x337   : > { %3254 = vmatprep.subr.bf16.mxu1 %v4912_v24 }
 0x339   : > { %3192 = vmatpush1.bf16.msra.mxu0 %v4828_v13 }
 0x33a   : > { %3256 = vmatpush1.bf16.msra.mxu1 %v4915_v42  ;;  %3194 = vmatprep.subr.bf16.mxu0 %v4831_v25 }
 0x33b   : > { %3258 = vmatprep.subr.bf16.mxu1 %v4918_v38 }
 0x33d   : > { %3196 = vmatpush1.bf16.msra.mxu0 %v4834_v46 }
 0x33e   : > { %3260 = vmatpush1.bf16.msra.mxu1 %v4921_v16  ;;  %3198 = vmatprep.subr.bf16.mxu0 %v4837_v51 }
 0x33f   : > { %3262 = vmatprep.subr.bf16.mxu1 %v4924_v23 }
 0x341   : > { %3200 = vmatpush1.bf16.msra.mxu0 %v4840_v5 }
 0x342   : > { %3264 = vmatpush1.bf16.msra.mxu1 %v4927_v36  ;;  %3202 = vmatprep.subr.bf16.mxu0 %v4843_v6 }
 0x343   : > { %3266 = vmatprep.subr.bf16.mxu1 %v4930_v41 }
 0x345   : > { %3204 = vmatpush1.bf16.msra.mxu0 %v4846_v17 }
 0x346   : > { %3268 = vmatpush1.bf16.msra.mxu1 %v4933_v11  ;;  %3206 = vmatprep.subr.bf16.mxu0 %v5798_v14 }
 0x347   : > { %3270 = vmatprep.subr.bf16.mxu1 %v5799_v52 }
 0x349   : > { %3208 = vmatpush1.bf16.msra.mxu0 %v5800_v57 }
 0x34a   : > { %3272 = vmatpush1.bf16.msra.mxu1 %v5801_v45  ;;  %3210 = vmatprep.subr.bf16.mxu0 %v5802_v63 }
 0x34b   : > { %3274 = vmatprep.subr.bf16.mxu1 %v5803_v34 }
 0x34d   : > { %3212 = vmatpush1.bf16.msra.mxu0 %v5804_v44 }
 0x34e   : > { %3276 = vmatpush1.bf16.msra.mxu1 %v5805_v15  ;;  %3214 = vmatprep.subr.bf16.mxu0 %v5806_v37 }
 0x34f   : > { %3278 = vmatprep.subr.bf16.mxu1 %v5807_v7  ;;  %v5818_v7 = vld [vmem:[#allocation46_spill] sm:$0xff] }
 0x351   : > { %3216 = vmatpush1.bf16.msra.mxu0 %v5808_v31  ;;  %v5819_v31 = vld [vmem:[#allocation47_spill] sm:$0xff] }
 0x352   : > { %3280 = vmatpush1.bf16.msra.mxu1 %v5809_v10  ;;  %3218 = vmatprep.subr.bf16.mxu0 %v5810_v21 }
 0x353   : > { %3282 = vmatprep.subr.bf16.mxu1 %v5811_v33 }
 0x355   : > { %3220 = vmatpush1.bf16.msra.mxu0 %v5812_v27 }
 0x356   : > { %3284 = vmatpush1.bf16.msra.mxu1 %v5813_v53  ;;  %3222 = vmatprep.subr.bf16.mxu0 %v5814_v43 }
 0x357   : > { %3286 = vmatprep.subr.bf16.mxu1 %v5815_v32  ;;  %v5820_v32 = vld [vmem:[#allocation45_spill] sm:$0xff] }
 0x359   : > { %3224 = vmatpush1.bf16.msra.mxu0 %v5816_v19 }
 0x35a   : > { %3288 = vmatpush1.bf16.msra.mxu1 %v5817_v3  ;;  %3290 = vmatprep.subr.bf16.mxu0 %v5818_v7  ;;  %v965_v7 = vld [vmem:[#allocation13 + $0x118] sm:$0xff] }
 0x35b   : > { %3354 = vmatprep.subr.bf16.mxu1 %v5819_v31 }
 0x35c   : > { %1694 = vmatmul.mubr.f32.vlgmr.msra.gmra.mrb[8].mxu0 %v4756_v8 }
 0x35d   : > { %1771 = vmatmul.mubr.f32.vlgmr.msra.gmra.mrb[16].mxu1 %v4756_v8  ;;  %3292 = vmatpush1.bf16.msra.mxu0 %v4785_v0  ;;  %v5821_v8 = vld [vmem:[#allocation42_spill] sm:$0xff]  ;;  %v5823_v0 = vld [vmem:[#allocation53_spill] sm:$0xff] }
 0x35e   : > { %3356 = vmatpush1.bf16.msra.mxu1 %v4874_v49  ;;  %3294 = vmatprep.subr.bf16.mxu0 %v4789_v4  ;;  %v5824_v4 = vld [vmem:[#allocation65_spill] sm:$0xff]  ;;  %v945_v49 = vld [vmem:[#allocation13 + $0x78] sm:$0xff] }
 0x35f   : > { %3358 = vmatprep.subr.bf16.mxu1 %v4876_v60  ;;  %1699 = vmatprep.mubr.f32.mxu0 %v5820_v32 }
 0x360   : > { %1776 = vmatprep.mubr.f32.mxu1 %v5820_v32  ;;  %1700 = vmatmul.mubr.f32.gmra.mrb[10].mxu0 %v4772_v26 }
 0x361   : > { %3296 = vmatpush1.bf16.msra.mxu0 %v4793_v9  ;;  %1777 = vmatmul.mubr.f32.gmra.mrb[18].mxu1 %v4772_v26  ;;  %v5822_v26 = vld [vmem:[#allocation60_spill] sm:$0xff]  ;;  %v5825_v9 = vld [vmem:[#allocation41_spill] sm:$0xff] }
 0x362   : > { %3360 = vmatpush1.bf16.msra.mxu1 %v4879_v54  ;;  %3298 = vmatprep.subr.bf16.mxu0 %v4795_v12  ;;  %v5826_v12 = vld [vmem:[#allocation44_spill] sm:$0xff] }
 0x363   : > { %3362 = vmatprep.subr.bf16.mxu1 %v4882_v62  ;;  %1896 = vmatprep.mubr.f32.mxu0 %v5821_v8  ;;  %v942_v62 = vld [vmem:[#allocation13 + $0x60] sm:$0xff] }
 0x364   : > { %1973 = vmatprep.mubr.f32.mxu1 %v5821_v8  ;;  %v966_v8 = vld [vmem:[#allocation13 + $0x120] sm:$0xff] }
 0x365   : > { %3300 = vmatpush1.bf16.msra.mxu0 %v4798_v18  ;;  %v5827_v18 = vld [vmem:[#allocation43_spill] sm:$0xff] }
 0x366   : > { %3364 = vmatpush1.bf16.msra.mxu1 %v4885_v1  ;;  %3302 = vmatprep.subr.bf16.mxu0 %v4801_v22  ;;  %v931_v22 = vld [vmem:[#allocation13 + $0x8] sm:$0xff]  ;;  %v944_v1 = vld [vmem:[#allocation13 + $0x70] sm:$0xff] }
 0x367   : > { %3366 = vmatprep.subr.bf16.mxu1 %v4888_v20  ;;  %v947_v20 = vld [vmem:[#allocation13 + $0x88] sm:$0xff] }
 0x369   : > { %3304 = vmatpush1.bf16.msra.mxu0 %v4804_v29  ;;  %v933_v29 = vld [vmem:[#allocation13 + $0x18] sm:$0xff] }
 0x36a   : > { %3368 = vmatpush1.bf16.msra.mxu1 %v4891_v28  ;;  %3306 = vmatprep.subr.bf16.mxu0 %v4807_v30  ;;  %v930_v30 = vld [vmem:[#allocation13] sm:$0xff]  ;;  %v949_v28 = vld [vmem:[#allocation13 + $0x98] sm:$0xff] }
 0x36b   : > { %3370 = vmatprep.subr.bf16.mxu1 %v4894_v35  ;;  %v3431_v35 = vpack.c.bf16 %v944_v1, %v942_v62  ;;  %v987_v62 = vld [vmem:[#allocation13 + $0x1c8] sm:$0xff]  ;;  %v989_v1 = vld [vmem:[#allocation13 + $0x1d8] sm:$0xff] }
 0x36d   : > { %3308 = vmatpush1.bf16.msra.mxu0 %v4810_v39  ;;  %v3417_v39 = vpack.c.bf16 %v933_v29, %v931_v22  ;;  %v972_v22 = vld [vmem:[#allocation13 + $0x150] sm:$0xff]  ;;  %v975_v29 = vld [vmem:[#allocation13 + $0x168] sm:$0xff] }
 0x36e   : > { %3372 = vmatpush1.bf16.msra.mxu1 %v4897_v50  ;;  %3310 = vmatprep.subr.bf16.mxu0 %v4813_v40  ;;  %v932_v40 = vld [vmem:[#allocation13 + $0x10] sm:$0xff]  ;;  %v3433_v50 = vpack.c.bf16 %v949_v28, %v947_v20 }
 0x36f   : > { %3374 = vmatprep.subr.bf16.mxu1 %v4900_v59  ;;  %v946_v59 = vld [vmem:[#allocation13 + $0x80] sm:$0xff] }
 0x371   : > { %3312 = vmatpush1.bf16.msra.mxu0 %v4816_v47  ;;  %v937_v47 = vld [vmem:[#allocation13 + $0x38] sm:$0xff] }
 0x372   : > { %3376 = vmatpush1.bf16.msra.mxu1 %v4903_v61  ;;  %3314 = vmatprep.subr.bf16.mxu0 %v4819_v48  ;;  %v948_v61 = vld [vmem:[#allocation13 + $0x90] sm:$0xff] }
 0x373   : > { %3378 = vmatprep.subr.bf16.mxu1 %v4906_v58  ;;  %v951_v58 = vld [vmem:[#allocation13 + $0xa8] sm:$0xff] }
 0x375   : > { %3316 = vmatpush1.bf16.msra.mxu0 %v4822_v55  ;;  %v934_v55 = vld [vmem:[#allocation13 + $0x20] sm:$0xff] }
 0x376   : > { %3380 = vmatpush1.bf16.msra.mxu1 %v4909_v2  ;;  %3318 = vmatprep.subr.bf16.mxu0 %v4825_v56  ;;  %v936_v56 = vld [vmem:[#allocation13 + $0x30] sm:$0xff]  ;;  %v953_v2 = vld [vmem:[#allocation13 + $0xb8] sm:$0xff] }
 0x377   : > { %3382 = vmatprep.subr.bf16.mxu1 %v4912_v24  ;;  %v3435_v24 = vpack.c.bf16 %v948_v61, %v946_v59  ;;  %v988_v59 = vld [vmem:[#allocation13 + $0x1d0] sm:$0xff] }
 0x379   : > { %3320 = vmatpush1.bf16.msra.mxu0 %v4828_v13  ;;  %v939_v13 = vld [vmem:[#allocation13 + $0x48] sm:$0xff] }
 0x37a   : > { %3384 = vmatpush1.bf16.msra.mxu1 %v4915_v42  ;;  %3322 = vmatprep.subr.bf16.mxu0 %v4831_v25  ;;  %v941_v25 = vld [vmem:[#allocation13 + $0x58] sm:$0xff]  ;;  %v3437_v42 = vpack.c.bf16 %v953_v2, %v951_v58 }
 0x37b   : > { %3386 = vmatprep.subr.bf16.mxu1 %v4918_v38  ;;  %v950_v38 = vld [vmem:[#allocation13 + $0xa0] sm:$0xff] }
 0x37d   : > { %3324 = vmatpush1.bf16.msra.mxu0 %v4834_v46  ;;  %v3423_v46 = vpack.c.bf16 %v936_v56, %v934_v55 }
 0x37e   : > { %3388 = vmatpush1.bf16.msra.mxu1 %v4921_v16  ;;  %3326 = vmatprep.subr.bf16.mxu0 %v4837_v51  ;;  %v3425_v51 = vpack.c.bf16 %v941_v25, %v939_v13  ;;  %v952_v16 = vld [vmem:[#allocation13 + $0xb0] sm:$0xff]  ;;  %v978_v13 = vld [vmem:[#allocation13 + $0x180] sm:$0xff] }
 0x37f   : > { %3390 = vmatprep.subr.bf16.mxu1 %v4924_v23  ;;  %v955_v23 = vld [vmem:[#allocation13 + $0xc8] sm:$0xff]  ;;  %v980_v25 = vld [vmem:[#allocation13 + $0x190] sm:$0xff] }
 0x381   : > { %3328 = vmatpush1.bf16.msra.mxu0 %v4840_v5  ;;  %v938_v5 = vld [vmem:[#allocation13 + $0x40] sm:$0xff] }
 0x382   : > { %3392 = vmatpush1.bf16.msra.mxu1 %v4927_v36  ;;  %3330 = vmatprep.subr.bf16.mxu0 %v4843_v6  ;;  %v940_v6 = vld [vmem:[#allocation13 + $0x50] sm:$0xff]  ;;  %v957_v36 = vld [vmem:[#allocation13 + $0xd8] sm:$0xff] }
 0x383   : > { %3394 = vmatprep.subr.bf16.mxu1 %v4930_v41  ;;  %v3427_v60 = vpack.c.bf16 %v940_v6, %v938_v5  ;;  %v3439_v41 = vpack.c.bf16 %v952_v16, %v950_v38  ;;  %v3467_v5 = vpack.c.bf16 %v980_v25, %v978_v13  ;;  %v991_v38 = vld [vmem:[#allocation13 + $0x1e8] sm:$0xff]  ;;  %v993_v16 = vld [vmem:[#allocation13 + $0x1f8] sm:$0xff]  ;;  %v5213_v25 = vld [vmem:[%s4535_s18 + $0x30] sm:$0xff] }
 0x384   : > { %v5210_v13 = vld [vmem:[%s4535_s18 + $0x38] sm:$0xff] }
 0x385   : > { %3332 = vmatpush1.bf16.msra.mxu0 %v4846_v17  ;;  %v943_v17 = vld [vmem:[#allocation13 + $0x68] sm:$0xff] }
 0x386   : > { %3396 = vmatpush1.bf16.msra.mxu1 %v4933_v11  ;;  %3334 = vmatprep.subr.bf16.mxu0 %v5798_v14  ;;  %v3429_v54 = vpack.c.bf16 %v945_v49, %v943_v17  ;;  %v3441_v11 = vpack.c.bf16 %v957_v36, %v955_v23  ;;  %v954_v14 = vld [vmem:[#allocation13 + $0xc0] sm:$0xff]  ;;  %v984_v49 = vld [vmem:[#allocation13 + $0x1b0] sm:$0xff]  ;;  %v3477_v36 = vpack.c.bf16 %v993_v16, %v991_v38 }
 0x387   : > { %3398 = vmatprep.subr.bf16.mxu1 %v5799_v52  ;;  %v956_v52 = vld [vmem:[#allocation13 + $0xd0] sm:$0xff]  ;;  %v982_v17 = vld [vmem:[#allocation13 + $0x1a0] sm:$0xff] }
 0x389   : > { %3336 = vmatpush1.bf16.msra.mxu0 %v5800_v57  ;;  %v959_v57 = vld [vmem:[#allocation13 + $0xe8] sm:$0xff] }
 0x38a   : > { %3400 = vmatpush1.bf16.msra.mxu1 %v5801_v45  ;;  %3338 = vmatprep.subr.bf16.mxu0 %v5802_v63  ;;  %v961_v45 = vld [vmem:[#allocation13 + $0xf8] sm:$0xff]  ;;  %v3443_v63 = vpack.c.bf16 %v956_v52, %v954_v14  ;;  %v867_v52 = vld [vmem:[#allocation11 + $0x8] sm:$0xff] }
 0x38b   : > { %3402 = vmatprep.subr.bf16.mxu1 %v5803_v34  ;;  %v3445_v34 = vpack.c.bf16 %v961_v45, %v959_v57  ;;  %v869_v57 = vld [vmem:[#allocation11 + $0x18] sm:$0xff] }
 0x38c   : > { %v3481_v45 = vpack.c.bf16 %v869_v57, %v867_v52 }
 0x38d   : > { %3340 = vmatpush1.bf16.msra.mxu0 %v5804_v44  ;;  %v958_v44 = vld [vmem:[#allocation13 + $0xe0] sm:$0xff] }
 0x38e   : > { %3404 = vmatpush1.bf16.msra.mxu1 %v5805_v15  ;;  %3342 = vmatprep.subr.bf16.mxu0 %v5806_v37  ;;  %v960_v15 = vld [vmem:[#allocation13 + $0xf0] sm:$0xff]  ;;  %v963_v37 = vld [vmem:[#allocation13 + $0x108] sm:$0xff] }
 0x38f   : > { %3406 = vmatprep.subr.bf16.mxu1 %v5822_v26  ;;  %v3447_v31 = vpack.c.bf16 %v960_v15, %v958_v44  ;;  %v968_v26 = vld [vmem:[#allocation13 + $0x130] sm:$0xff] }
 0x391   : > { %3344 = vmatpush1.bf16.msra.mxu0 %v5823_v0  ;;  %v971_v0 = vld [vmem:[#allocation13 + $0x148] sm:$0xff] }
 0x392   : > { %3408 = vmatpush1.bf16.msra.mxu1 %v5809_v10  ;;  %3346 = vmatprep.subr.bf16.mxu0 %v5810_v21  ;;  %v3449_v10 = vpack.c.bf16 %v965_v7, %v963_v37  ;;  %v962_v21 = vld [vmem:[#allocation13 + $0x100] sm:$0xff] }
 0x393   : > { %3410 = vmatprep.subr.bf16.mxu1 %v5811_v33  ;;  %v964_v33 = vld [vmem:[#allocation13 + $0x110] sm:$0xff] }
 0x395   : > { %3348 = vmatpush1.bf16.msra.mxu0 %v5812_v27  ;;  %v967_v27 = vld [vmem:[#allocation13 + $0x128] sm:$0xff] }
 0x396   : > { %3412 = vmatpush1.bf16.msra.mxu1 %v5813_v53  ;;  %3350 = vmatprep.subr.bf16.mxu0 %v5814_v43  ;;  %v969_v53 = vld [vmem:[#allocation13 + $0x138] sm:$0xff]  ;;  %v3451_v43 = vpack.c.bf16 %v964_v33, %v962_v21  ;;  %v5146_v21 = vld [vmem:[%s4535_s18 + $0x8] sm:$0xff]  ;;  %v5149_v33 = vld [vmem:[%s4535_s18] sm:$0xff] }
 0x397   : > { %3414 = vmatprep.subr.bf16.mxu1 %v5824_v4  ;;  %v3453_v32 = vpack.c.bf16 %v969_v53, %v967_v27  ;;  %v973_v4 = vld [vmem:[#allocation13 + $0x158] sm:$0xff]  ;;  %v1115_v27 = vmax.f32 %v5149_v33, %v5146_v21 }
 0x398   : > { %v5154_v53 = vld [vmem:[%s4535_s18 + $0x18] sm:$0xff] }
 0x399   : > { %3352 = vmatpush1.bf16.msra.mxu0 %v5816_v19  ;;  %v935_v19 = vld [vmem:[#allocation13 + $0x28] sm:$0xff]  ;;  %1116 = vmax.xlane.f32.xlu1 %v1115_v27 }
 0x39a   : > { %3416 = vmatpush1.bf16.msra.mxu1 %v5817_v3  ;;  %v3419_v3 = vpack.c.bf16 %v932_v40, %v930_v30  ;;  %v3421_v48 = vpack.c.bf16 %v937_v47, %v935_v19  ;;  %3418 = vmatprep.subr.bf16.mxu0 %v3417_v39  ;;  %v977_v30 = vld [vmem:[#allocation13 + $0x178] sm:$0xff]  ;;  %v974_v19 = vld [vmem:[#allocation13 + $0x160] sm:$0xff]  ;;  %v976_v47 = vld [vmem:[#allocation13 + $0x170] sm:$0xff] }
 0x39b   : > { %v3461_v40 = vpack.c.bf16 %v977_v30, %v975_v29  ;;  %v3463_v55 = vpack.c.bf16 %v976_v47, %v974_v19  ;;  %v5186_v30 = vld [vmem:[%s4518_s12 + $0x8] sm:$0xff]  ;;  %v5194_v19 = vld [vmem:[%s4518_s12 + $0x18] sm:$0xff]  ;;  %v5197_v47 = vld [vmem:[%s4518_s12 + $0x10] sm:$0xff] }
 0x39c   : > { %1897 = vmatmul.mubr.f32.vlgmr.msra.gmra.mrb[12].mxu0 %v5825_v9 }
 0x39d   : > { %1974 = vmatmul.mubr.f32.vlgmr.msra.gmra.mrb[20].mxu1 %v5825_v9  ;;  %1902 = vmatprep.mubr.f32.mxu0 %v5826_v12  ;;  %v3455_v9 = vpack.c.bf16 %v968_v26, %v966_v8  ;;  %v5162_v8 = vld [vmem:[%s4529_s10] sm:$0xff]  ;;  %v5165_v26 = vld [vmem:[%s4529_s10 + $0x8] sm:$0xff] }
 0x39e   : > { %1979 = vmatprep.mubr.f32.mxu1 %v5826_v12  ;;  %3420 = vmatpush1.bf16.msra.mxu0 %v3419_v3  ;;  %v3457_v12 = vpack.c.bf16 %v973_v4, %v971_v0  ;;  %v979_v3 = vld [vmem:[#allocation13 + $0x188] sm:$0xff]  ;;  %v1593_v0 = vmax.f32 %v5162_v8, %v5165_v26  ;;  %v5170_v4 = vld [vmem:[%s4529_s10 + $0x20] sm:$0xff] }
 0x39f   : > { %3422 = vmatprep.subr.bf16.mxu0 %v3421_v48  ;;  %v981_v48 = vld [vmem:[#allocation13 + $0x198] sm:$0xff] }
 0x3a0   : > { %1903 = vmatmul.mubr.f32.gmra.mrb[14].mxu0 %v5827_v18  ;;  %v3465_v56 = vpack.c.bf16 %v981_v48, %v979_v3  ;;  %1594 = vmax.xlane.f32.xlu1 %v1593_v0  ;;  %v1001_v3 = vmax.f32 %v5197_v47, %v5194_v19  ;;  %v5202_v48 = vld [vmem:[%s4535_s18 + $0x28] sm:$0xff] }
 0x3a1   : > { %1980 = vmatmul.mubr.f32.gmra.mrb[22].mxu1 %v5827_v18  ;;  %v970_v18 = vld [vmem:[#allocation13 + $0x140] sm:$0xff] }
 0x3a2   : > { %3424 = vmatpush1.bf16.msra.mxu0 %v3423_v46  ;;  %v3459_v39 = vpack.c.bf16 %v972_v22, %v970_v18  ;;  %v983_v46 = vld [vmem:[#allocation13 + $0x1a8] sm:$0xff]  ;;  %v5178_v18 = vld [vmem:[%s4529_s10 + $0x10] sm:$0xff]  ;;  %v5181_v22 = vld [vmem:[%s4529_s10 + $0x18] sm:$0xff] }
 0x3a3   : > { %3426 = vmatprep.subr.bf16.mxu0 %v3425_v51  ;;  %v985_v51 = vld [vmem:[#allocation13 + $0x1b8] sm:$0xff]  ;;  %v1596_v29 = vmax.f32 %v5178_v18, %v5181_v22 }
 0x3a4   : > { %v3469_v6 = vpack.c.bf16 %v985_v51, %v983_v46  ;;  %v1240_v46 = vmax.f32 %v5213_v25, %v5210_v13  ;;  %v5218_v51 = vld [vmem:[%s4529_s10 + $0x30] sm:$0xff] }
 0x3a5   : > { %1597 = vmax.xlane.f32.xlu1 %v1596_v29 }
 0x3a6   : > { %3428 = vmatpush1.bf16.msra.mxu0 %v3427_v60  ;;  %v3471_v60 = vpack.c.bf16 %v984_v49, %v982_v17 }
 0x3a7   : > { %3430 = vmatprep.subr.bf16.mxu0 %v3429_v54 }
 0x3aa   : > { %3432 = vmatpush1.bf16.msra.mxu0 %v3431_v35  ;;  %v3473_v35 = vpack.c.bf16 %v989_v1, %v987_v62 }
 0x3ab   : > { %3434 = vmatprep.subr.bf16.mxu0 %v3433_v50  ;;  %v986_v50 = vld [vmem:[#allocation13 + $0x1c0] sm:$0xff] }
 0x3ac   : > { %v3475_v58 = vpack.c.bf16 %v988_v59, %v986_v50  ;;  %v868_v50 = vld [vmem:[#allocation11 + $0x10] sm:$0xff] }
 0x3ae   : > { %3436 = vmatpush1.bf16.msra.mxu0 %v3435_v24 }
 0x3af   : > { %3438 = vmatprep.subr.bf16.mxu0 %v3437_v42 }
 0x3b2   : > { %3440 = vmatpush1.bf16.msra.mxu0 %v3439_v41  ;;  %v990_v41 = vld [vmem:[#allocation13 + $0x1e0] sm:$0xff] }
 0x3b3   : > { %3442 = vmatprep.subr.bf16.mxu0 %v3441_v11  ;;  %v992_v11 = vld [vmem:[#allocation13 + $0x1f0] sm:$0xff] }
 0x3b4   : > { %v3479_v14 = vpack.c.bf16 %v992_v11, %v990_v41 }
 0x3b6   : > { %3444 = vmatpush1.bf16.msra.mxu0 %v3443_v63 }
 0x3b7   : > { %3446 = vmatprep.subr.bf16.mxu0 %v3445_v34 }
 0x3ba   : > { %3448 = vmatpush1.bf16.msra.mxu0 %v3447_v31 }
 0x3bb   : > { %3450 = vmatprep.subr.bf16.mxu0 %v3449_v10 }
 0x3be   : > { %3452 = vmatpush1.bf16.msra.mxu0 %v3451_v43  ;;  %v5157_v43 = vld [vmem:[%s4535_s18 + $0x10] sm:$0xff] }
 0x3bf   : > { %3454 = vmatprep.subr.bf16.mxu0 %v3453_v32  ;;  %v1118_v32 = vmax.f32 %v5157_v43, %v5154_v53 }
 0x3c1   : > { %1119 = vmax.xlane.f32.xlu0 %v1118_v32 }
 0x3c2   : > { %3456 = vmatpush1.bf16.msra.mxu0 %v3455_v9  ;;  %v5173_v9 = vld [vmem:[%s4529_s10 + $0x28] sm:$0xff] }
 0x3c3   : > { %3458 = vmatprep.subr.bf16.mxu0 %v3457_v12  ;;  %v1796_v12 = vmax.f32 %v5170_v4, %v5173_v9 }
 0x3c5   : > { %1797 = vmax.xlane.f32.xlu0 %v1796_v12 }
 0x3c6   : > { %3460 = vmatpush1.bf16.msra.mxu0 %v3459_v39  ;;  %v5189_v39 = vld [vmem:[%s4518_s12] sm:$0xff] }
 0x3c7   : > { %3462 = vmatprep.subr.bf16.mxu0 %v3461_v40  ;;  %v998_v40 = vmax.f32 %v5189_v39, %v5186_v30 }
 0x3c9   : > { %999 = vmax.xlane.f32.xlu1 %v998_v40 }
 0x3ca   : > { %3464 = vmatpush1.bf16.msra.mxu0 %v3463_v55  ;;  %v5205_v55 = vld [vmem:[%s4535_s18 + $0x20] sm:$0xff]  ;;  %s3929_s18 = scalar_lea.vmem %s5418_s3, 512 }
 0x3cb   : > { %3466 = vmatprep.subr.bf16.mxu0 %v3465_v56  ;;  %v1237_v56 = vmax.f32 %v5205_v55, %v5202_v48  ;;  %p3930_p8 = scmp.ne.s32.totalorder %s5418_s3, %s3929_s18 }
 0x3cd   : > { %1002 = vmax.xlane.f32.xlu1 %v1001_v3  ;;  %p3931_p10 = pnand %p3930_p8, %p5828_p9 }
 0x3ce   : > { %3468 = vmatpush1.bf16.msra.mxu0 %v3467_v5  ;;  %v5221_v5 = vld [vmem:[%s4529_s10 + $0x38] sm:$0xff]  ;;  %s5733_s10 = scalar_lea.sflag [#allocation16], %s4525_s13 }
 0x3cf   : > { %3470 = vmatprep.subr.bf16.mxu0 %v3469_v6  ;;  %v1799_v6 = vmax.f32 %v5218_v51, %v5221_v5  ;;  %p3932_p1 = pneg %p3931_p10 }
 0x3d1   : > { %1238 = vmax.xlane.f32.xlu1 %v1237_v56 }
 0x3d2   : > { %3472 = vmatpush1.bf16.msra.mxu0 %v3471_v60 }
 0x3d3   : > { %3474 = vmatprep.subr.bf16.mxu0 %v3473_v35  ;;  %v866_v35 = vld [vmem:[#allocation11] sm:$0xff] }
 0x3d5   : > { %1241 = vmax.xlane.f32.xlu1 %v1240_v46 }
 0x3d6   : > { %3476 = vmatpush1.bf16.msra.mxu0 %v3475_v58 }
 0x3d7   : > { %3478 = vmatprep.subr.bf16.mxu0 %v3477_v36 }
 0x3d9   : > { %1800 = vmax.xlane.f32.xlu1 %v1799_v6 }
 0x3da   : > { %3480 = vmatpush1.bf16.msra.mxu0 %v3479_v14 }
 0x3db   : > { %3482 = vmatprep.subr.bf16.mxu0 %v3481_v45  ;;  %v3483_v45 = vpack.c.bf16 %v868_v50, %v866_v35  ;;  %v871_v35 = vld [vmem:[#allocation11 + $0x28] sm:$0xff] }
 0x3ef   : > { %v5121_v54 = vpop.f32.mrb[4].mxu0 }
 0x3f0   : > { %v5123_v20 = vpop.f32.mrb[12].mxu1  ;;  %v5125_v28 = vpop.f32.mrb[5].mxu0 }
 0x3f1   : > { %v5127_v61 = vpop.f32.mrb[13].mxu1 }
 0x3f4   : > { %v5129_v2 = vpop.f32.mrb[14].mxu1 }
 0x3f5   : > { %v5131_v24 = vpop.f32.mrb[6].mxu0  ;;  %v5133_v42 = vpop.f32.mrb[15].mxu1 }
 0x3f6   : > { %v5135_v23 = vpop.f32.mrb[7].mxu0 }
 0x42f   : > { %v1695_v63 = vpop.f32.mrb[8].mxu0 }
 0x430   : > { %v1772_v34 = vpop.f32.mrb[16].mxu1  ;;  %v1697_v44 = vpop.f32.mrb[9].mxu0 }
 0x431   : > { %v1774_v15 = vpop.f32.mrb[17].mxu1 }
 0x433   : > { %v5137_v37 = vpop.f32.mrb[10].mxu0 }
 0x434   : > { %v5139_v7 = vpop.f32.mrb[18].mxu1  ;;  %v5141_v31 = vpop.f32.mrb[11].mxu0 }
 0x435   : > { %v5143_v10 = vpop.f32.mrb[19].mxu1 }
 0x46f   : > { %v1898_v17 = vpop.f32.mrb[12].mxu0 }
 0x470   : > { %v1994_v49 = vmul.f32 %v1898_v17, %v1695_v63  ;;  %v2010_v60 = vmul.f32 %v1898_v17, %v1772_v34  ;;  %v1975_v62 = vpop.f32.mrb[20].mxu1  ;;  %v1900_v1 = vpop.f32.mrb[13].mxu0 }
 0x471   : > { %v1998_v59 = vmul.f32 %v1975_v62, %v1772_v34  ;;  %v2006_v58 = vmul.f32 %v1975_v62, %v1695_v63  ;;  %v1995_v38 = vmul.f32 %v1900_v1, %v1697_v44  ;;  %v2011_v16 = vmul.f32 %v1900_v1, %v1774_v15  ;;  %v1977_v36 = vpop.f32.mrb[21].mxu1 }
 0x472   : > { %v1999_v41 = vmul.f32 %v1977_v36, %v1774_v15  ;;  %v2007_v11 = vmul.f32 %v1977_v36, %v1697_v44 }
 0x473   : > { %v2002_v14 = vsub.f32 %v1994_v49, %v1998_v59  ;;  %v2014_v52 = vadd.f32 %v2010_v60, %v2006_v58  ;;  %v1904_v57 = vpop.f32.mrb[14].mxu0 }
 0x474   : > { %v2003_v27 = vsub.f32 %v1995_v38, %v1999_v41  ;;  %v2015_v32 = vadd.f32 %v2011_v16, %v2007_v11  ;;  %v1996_v0 = vmul.f32 %v1904_v57, %v5137_v37  ;;  %v2012_v12 = vmul.f32 %v1904_v57, %v5139_v7  ;;  %v1981_v29 = vpop.f32.mrb[22].mxu1  ;;  %v1906_v40 = vpop.f32.mrb[15].mxu0  ;;  %v870_v57 = vld [vmem:[#allocation11 + $0x20] sm:$0xff] }
 0x475   : > { %v2020_v34 = vmul.f32 %v2002_v14, %v5121_v54  ;;  %v2024_v63 = vmul.f32 %v2014_v52, %v5123_v20  ;;  %v2032_v3 = vmul.f32 %v2002_v14, %v5123_v20  ;;  %v2036_v44 = vmul.f32 %v2014_v52, %v5121_v54  ;;  %v1983_v15 = vpop.f32.mrb[23].mxu1  ;;  %v873_v20 = vld [vmem:[#allocation11 + $0x38] sm:$0xff] }
 0x476   : > { %v2021_v56 = vmul.f32 %v2003_v27, %v5125_v28  ;;  %v2025_v46 = vmul.f32 %v2015_v32, %v5127_v61  ;;  %v2033_v6 = vmul.f32 %v2003_v27, %v5127_v61  ;;  %v2037_v17 = vmul.f32 %v2015_v32, %v5125_v28 }
 0x477   : > { %v5235_v49 = vadd.f32 %v2024_v63, %v2020_v34  ;;  %v2040_v60 = vsub.f32 %v2032_v3, %v2036_v44  ;;  %v2000_v62 = vmul.f32 %v1981_v29, %v5139_v7  ;;  %v2008_v1 = vmul.f32 %v1981_v29, %v5137_v37  ;;  %v877_v29 = vld [vmem:[#allocation11 + $0x58] sm:$0xff]  ;;  %v874_v44 = vld [vmem:[#allocation11 + $0x40] sm:$0xff] }
 0x478   : > { %v1997_v54 = vmul.f32 %v1906_v40, %v5141_v31  ;;  %v2013_v50 = vmul.f32 %v1906_v40, %v5143_v10  ;;  %v2001_v59 = vmul.f32 %v1983_v15, %v5143_v10  ;;  %v2009_v58 = vmul.f32 %v1983_v15, %v5141_v31  ;;  %v872_v10 = vld [vmem:[#allocation11 + $0x30] sm:$0xff] }
 0x479   : > { %v2004_v61 = vsub.f32 %v1996_v0, %v2000_v62  ;;  %v2016_v38 = vadd.f32 %v2012_v12, %v2008_v1  ;;  %v2041_v28 = vsub.f32 %v2033_v6, %v2037_v17  ;;  %v2029_v16 = vadd.f32 %v2025_v46, %v2021_v56  ;;  %v875_v12 = vld [vmem:[#allocation11 + $0x48] sm:$0xff]  ;;  %v876_v15 = vld [vmem:[#allocation11 + $0x50] sm:$0xff]  ;;  %v878_v46 = vld [vmem:[#allocation11 + $0x60] sm:$0xff] }
 0x47a   : > { %v2005_v36 = vsub.f32 %v1997_v54, %v2001_v59  ;;  %v2017_v41 = vadd.f32 %v2013_v50, %v2009_v58  ;;  %v3485_v11 = vpack.c.bf16 %v873_v20, %v871_v35  ;;  %v3489_v3 = vpack.c.bf16 %v877_v29, %v875_v12  ;;  %v879_v56 = vld [vmem:[#allocation11 + $0x68] sm:$0xff]  ;;  %v880_v6 = vld [vmem:[#allocation11 + $0x70] sm:$0xff]  ;;  %v882_v35 = vld [vmem:[#allocation11 + $0x80] sm:$0xff] }
 0x47b   : > { %v2022_v7 = vmul.f32 %v2004_v61, %v5131_v24  ;;  %v2026_v37 = vmul.f32 %v2016_v38, %v5129_v2  ;;  %v2034_v14 = vmul.f32 %v2004_v61, %v5129_v2  ;;  %v2038_v52 = vmul.f32 %v2016_v38, %v5131_v24  ;;  %2108 = vmatprep.mubr.f32.mxu0 %v2041_v28  ;;  %v883_v17 = vld [vmem:[#allocation11 + $0x88] sm:$0xff]  ;;  %v884_v20 = vld [vmem:[#allocation11 + $0x90] sm:$0xff]  ;;  %v889_v50 = vld [vmem:[#allocation11 + $0xb8] sm:$0xff] }
 0x47c   : > { %v2023_v31 = vmul.f32 %v2005_v36, %v5135_v23  ;;  %v2027_v27 = vmul.f32 %v2017_v41, %v5133_v42  ;;  %v2035_v32 = vmul.f32 %v2005_v36, %v5133_v42  ;;  %v2039_v0 = vmul.f32 %v2017_v41, %v5135_v23  ;;  %2109 = vmatmul.mubr.f32.vlgmr.msra.gmra.mrb[16].mxu0 %v2040_v60  ;;  %v881_v42 = vld [vmem:[#allocation11 + $0x78] sm:$0xff]  ;;  %v887_v54 = vld [vmem:[#allocation11 + $0xa8] sm:$0xff]  ;;  %v886_v61 = vld [vmem:[#allocation11 + $0xa0] sm:$0xff] }
 0x47d   : > { %3484 = vmatpush1.bf16.msra.mxu0 %v3483_v45  ;;  %v2042_v40 = vsub.f32 %v2034_v14, %v2038_v52  ;;  %v5251_v34 = vadd.f32 %v2026_v37, %v2022_v7  ;;  %v3487_v24 = vpack.c.bf16 %v872_v10, %v870_v57  ;;  %v3491_v23 = vpack.c.bf16 %v876_v15, %v874_v44  ;;  %v885_v60 = vld [vmem:[#allocation11 + $0x98] sm:$0xff]  ;;  %v888_v38 = vld [vmem:[#allocation11 + $0xb0] sm:$0xff]  ;;  %v891_v28 = vld [vmem:[#allocation11 + $0xc8] sm:$0xff] }
 0x47e   : > { %v2043_v2 = vsub.f32 %v2035_v32, %v2039_v0  ;;  %3486 = vmatprep.subr.bf16.mxu0 %v3485_v11  ;;  %v5253_v63 = vadd.f32 %v2027_v27, %v2023_v31  ;;  %v3493_v45 = vpack.c.bf16 %v881_v42, %v879_v56  ;;  %v3495_v62 = vpack.c.bf16 %v880_v6, %v878_v46  ;;  %v890_v11 = vld [vmem:[#allocation11 + $0xc0] sm:$0xff]  ;;  %v892_v7 = vld [vmem:[#allocation11 + $0xd0] sm:$0xff]  ;;  %v895_v37 = vld [vmem:[#allocation11 + $0xe8] sm:$0xff] }
 0x47f   : > { %v3497_v1 = vpack.c.bf16 %v885_v60, %v883_v17  ;;  %v3499_v59 = vpack.c.bf16 %v884_v20, %v882_v35  ;;  %v3501_v58 = vpack.c.bf16 %v889_v50, %v887_v54  ;;  %v3503_v36 = vpack.c.bf16 %v888_v38, %v886_v61  ;;  %v897_v14 = vld [vmem:[#allocation11 + $0xf8] sm:$0xff]  ;;  %v894_v10 = vld [vmem:[#allocation11 + $0xe0] sm:$0xff]  ;;  %v896_v31 = vld [vmem:[#allocation11 + $0xf0] sm:$0xff] }
 0x480   : > { %2114 = vmatprep.mubr.f32.mxu0 %v2043_v2  ;;  %v3507_v52 = vpack.c.bf16 %v892_v7, %v890_v11  ;;  %v3509_v57 = vpack.c.bf16 %v897_v14, %v895_v37  ;;  %v899_v27 = vld [vmem:[#allocation11 + $0x108] sm:$0xff]  ;;  %v901_v32 = vld [vmem:[#allocation11 + $0x118] sm:$0xff]  ;;  %v3511_v0 = vpack.c.bf16 %v896_v31, %v894_v10  ;;  %v898_v29 = vld [vmem:[#allocation11 + $0x100] sm:$0xff] }
 0x481   : > { %2115 = vmatmul.mubr.f32.gmra.mrb[18].mxu0 %v2042_v40  ;;  %v3513_v12 = vpack.c.bf16 %v901_v32, %v899_v27  ;;  %v900_v40 = vld [vmem:[#allocation11 + $0x110] sm:$0xff]  ;;  %v903_v2 = vld [vmem:[#allocation11 + $0x128] sm:$0xff]  ;;  %v902_v15 = vld [vmem:[#allocation11 + $0x120] sm:$0xff] }
 0x482   : > { %3488 = vmatpush1.bf16.msra.mxu0 %v3487_v24  ;;  %2185 = vmatprep.mubr.f32.mxu0 %v2029_v16  ;;  %v893_v16 = vld [vmem:[#allocation11 + $0xd8] sm:$0xff]  ;;  %v904_v56 = vld [vmem:[#allocation11 + $0x130] sm:$0xff]  ;;  %v907_v42 = vld [vmem:[#allocation11 + $0x148] sm:$0xff] }
 0x483   : > { %3490 = vmatprep.subr.bf16.mxu0 %v3489_v3  ;;  %v3505_v41 = vpack.c.bf16 %v893_v16, %v891_v28  ;;  %v905_v24 = vld [vmem:[#allocation11 + $0x138] sm:$0xff]  ;;  %v3515_v3 = vpack.c.bf16 %v900_v40, %v898_v29  ;;  %v906_v6 = vld [vmem:[#allocation11 + $0x140] sm:$0xff]  ;;  %v908_v17 = vld [vmem:[#allocation11 + $0x150] sm:$0xff] }
 0x484   : > { %v3517_v44 = vpack.c.bf16 %v905_v24, %v903_v2  ;;  %v911_v60 = vld [vmem:[#allocation11 + $0x168] sm:$0xff]  ;;  %v910_v20 = vld [vmem:[#allocation11 + $0x160] sm:$0xff]  ;;  %v912_v54 = vld [vmem:[#allocation11 + $0x170] sm:$0xff] }
 0x485   : > { %v915_v50 = vld [vmem:[#allocation11 + $0x188] sm:$0xff]  ;;  %v914_v38 = vld [vmem:[#allocation11 + $0x180] sm:$0xff]  ;;  %v916_v28 = vld [vmem:[#allocation11 + $0x190] sm:$0xff] }
 0x486   : > { %3492 = vmatpush1.bf16.msra.mxu0 %v3491_v23  ;;  %v909_v23 = vld [vmem:[#allocation11 + $0x158] sm:$0xff]  ;;  %v919_v16 = vld [vmem:[#allocation11 + $0x1a8] sm:$0xff]  ;;  %v918_v7 = vld [vmem:[#allocation11 + $0x1a0] sm:$0xff] }
 0x487   : > { %3494 = vmatprep.subr.bf16.mxu0 %v3493_v45  ;;  %v3519_v45 = vpack.c.bf16 %v904_v56, %v902_v15  ;;  %v3521_v46 = vpack.c.bf16 %v909_v23, %v907_v42  ;;  %v920_v37 = vld [vmem:[#allocation11 + $0x1b0] sm:$0xff]  ;;  %v923_v14 = vld [vmem:[#allocation11 + $0x1c8] sm:$0xff]  ;;  %v922_v31 = vld [vmem:[#allocation11 + $0x1c0] sm:$0xff]  ;;  %v2208_v23 = vpop.permute.xlu0 %2207 }
 0x488   : > { %v924_v27 = vld [vmem:[#allocation11 + $0x1d0] sm:$0xff]  ;;  %v927_v32 = vld [vmem:[#allocation11 + $0x1e8] sm:$0xff]  ;;  %v926_v40 = vld [vmem:[#allocation11 + $0x1e0] sm:$0xff] }
 0x489   : > { %v928_v2 = vld [vmem:[#allocation11 + $0x1f0] sm:$0xff] }
 0x48a   : > { %3496 = vmatpush1.bf16.msra.mxu0 %v3495_v62  ;;  %v913_v62 = vld [vmem:[#allocation11 + $0x178] sm:$0xff]  ;;  %v3543_v24 = vpack.c.bf16 %v928_v2, %v926_v40 }
 0x48b   : > { %3498 = vmatprep.subr.bf16.mxu0 %v3497_v1  ;;  %v3523_v1 = vpack.c.bf16 %v908_v17, %v906_v6  ;;  %v3525_v35 = vpack.c.bf16 %v913_v62, %v911_v60 }
 0x48e   : > { %3500 = vmatpush1.bf16.msra.mxu0 %v3499_v59  ;;  %v917_v59 = vld [vmem:[#allocation11 + $0x198] sm:$0xff] }
 0x48f   : > { %3502 = vmatprep.subr.bf16.mxu0 %v3501_v58  ;;  %v3527_v58 = vpack.c.bf16 %v912_v54, %v910_v20  ;;  %v3529_v61 = vpack.c.bf16 %v917_v59, %v915_v50  ;;  %v2200_v54 = vlaneseq }
 0x492   : > { %3504 = vmatpush1.bf16.msra.mxu0 %v3503_v36  ;;  %v921_v36 = vld [vmem:[#allocation11 + $0x1b8] sm:$0xff] }
 0x493   : > { %3506 = vmatprep.subr.bf16.mxu0 %v3505_v41  ;;  %v3531_v41 = vpack.c.bf16 %v916_v28, %v914_v38  ;;  %v3533_v11 = vpack.c.bf16 %v921_v36, %v919_v16  ;;  %v2201_v28 = vand.u32 127, %v2200_v54 }
 0x495   : > { %vm2203_vm0 = vcmp.eq.s32.totalorder %v2201_v28, 0 }
 0x496   : > { %3508 = vmatpush1.bf16.msra.mxu0 %v3507_v52  ;;  %v925_v52 = vld [vmem:[#allocation11 + $0x1d8] sm:$0xff] }
 0x497   : > { %3510 = vmatprep.subr.bf16.mxu0 %v3509_v57  ;;  %v3535_v57 = vpack.c.bf16 %v920_v37, %v918_v7  ;;  %v3537_v10 = vpack.c.bf16 %v925_v52, %v923_v14 }
 0x49a   : > { %3512 = vmatpush1.bf16.msra.mxu0 %v3511_v0  ;;  %v929_v0 = vld [vmem:[#allocation11 + $0x1f8] sm:$0xff] }
 0x49b   : > { %3514 = vmatprep.subr.bf16.mxu0 %v3513_v12  ;;  %v3539_v12 = vpack.c.bf16 %v924_v27, %v922_v31  ;;  %v3541_v29 = vpack.c.bf16 %v929_v0, %v927_v32 }
 0x49e   : > { %3516 = vmatpush1.bf16.msra.mxu0 %v3515_v3  ;;  %v5258_v3 = vpop.permute.xlu1 %2212 }
 0x49f   : > { %3518 = vmatprep.subr.bf16.mxu0 %v3517_v44 }
 0x4a2   : > { %3520 = vmatpush1.bf16.msra.mxu0 %v3519_v45  ;;  %v1117_v44 = vpop.xlane.xlu1 %1116  ;;  %v1120_v45 = vpop.xlane.xlu0 %1119 }
 0x4a3   : > { %3522 = vmatprep.subr.bf16.mxu0 %v3521_v46  ;;  %v5261_v6 = vsub.f32 %v5149_v33, %v1117_v44  ;;  %v5264_v17 = vsub.f32 %v5146_v21, %v1117_v44 }
 0x4a5   : > { %v1127_v62 = vmul.f32 1.442695, %v5264_v17 }
 0x4a6   : > { %3524 = vmatpush1.bf16.msra.mxu0 %v3523_v1  ;;  %v1595_v15 = vpop.xlane.xlu1 %1594 }
 0x4a7   : > { %3526 = vmatprep.subr.bf16.mxu0 %v3525_v35  ;;  %v5274_v60 = vsub.f32 %v5162_v8, %v1595_v15  ;;  %v5278_v1 = vsub.f32 %v5165_v26, %v1595_v15 }
 0x4a9   : > { %v1603_v8 = vmul.f32 1.442695, %v5274_v60  ;;  %v1605_v26 = vmul.f32 1.442695, %v5278_v1 }
 0x4aa   : > { %3528 = vmatpush1.bf16.msra.mxu0 %v3527_v58  ;;  %v1598_v56 = vpop.xlane.xlu1 %1597 }
 0x4ab   : > { %3530 = vmatprep.subr.bf16.mxu0 %v3529_v61  ;;  %v5281_v21 = vsub.f32 %v5178_v18, %v1598_v56  ;;  %v5285_v35 = vsub.f32 %v5181_v22, %v1598_v56 }
 0x4ad   : > { %v1607_v50 = vmul.f32 1.442695, %v5281_v21  ;;  %v1609_v59 = vmul.f32 1.442695, %v5285_v35 }
 0x4ae   : > { %3532 = vmatpush1.bf16.msra.mxu0 %v3531_v41  ;;  %v1000_v42 = vpop.xlane.xlu1 %999 }
 0x4af   : > { %3534 = vmatprep.subr.bf16.mxu0 %v3533_v11  ;;  %v5290_v20 = vsub.f32 %v5189_v39, %v1000_v42  ;;  %v5294_v18 = vsub.f32 %v5186_v30, %v1000_v42  ;;  %v1798_v39 = vpop.xlane.xlu0 %1797 }
 0x4b0   : > { %v5318_v11 = vsub.f32 %v5173_v9, %v1798_v39 }
 0x4b1   : > { %v1008_v38 = vmul.f32 1.442695, %v5290_v20  ;;  %v1010_v16 = vmul.f32 1.442695, %v5294_v18 }
 0x4b2   : > { %3536 = vmatpush1.bf16.msra.mxu0 %v3535_v57  ;;  %v1003_v46 = vpop.xlane.xlu1 %1002 }
 0x4b3   : > { %3538 = vmatprep.subr.bf16.mxu0 %v3537_v10  ;;  %v5298_v22 = vsub.f32 %v5197_v47, %v1003_v46  ;;  %v5302_v58 = vsub.f32 %v5194_v19, %v1003_v46  ;;  %v5314_v19 = vsub.f32 %v5170_v4, %v1798_v39 }
 0x4b5   : > { %v1012_v36 = vmul.f32 1.442695, %v5298_v22  ;;  %v1014_v41 = vmul.f32 1.442695, %v5302_v58  ;;  %v1806_v9 = vmul.f32 1.442695, %v5314_v19 }
 0x4b6   : > { %3540 = vmatpush1.bf16.msra.mxu0 %v3539_v12  ;;  %v1239_v33 = vpop.xlane.xlu1 %1238 }
 0x4b7   : > { %3542 = vmatprep.subr.bf16.mxu0 %v3541_v29  ;;  %v5306_v30 = vsub.f32 %v5205_v55, %v1239_v33  ;;  %v5310_v47 = vsub.f32 %v5202_v48, %v1239_v33 }
 0x4b9   : > { %v1247_v55 = vmul.f32 1.442695, %v5306_v30  ;;  %v1249_v48 = vmul.f32 1.442695, %v5310_v47 }
 0x4ba   : > { %3544 = vmatpush1.bf16.msra.mxu0 %v3543_v24  ;;  %v1242_v61 = vpop.xlane.xlu1 %1241 }
 0x4bb   : > { %v5322_v7 = vsub.f32 %v5213_v25, %v1242_v61  ;;  %v5326_v37 = vsub.f32 %v5210_v13, %v1242_v61  ;;  %v1808_v25 = vmul.f32 1.442695, %v5318_v11 }
 0x4bd   : > { %2186 = vmatmul.mubr.f32.vlgmr.msra.gmra.mrb[16].mxu0 %v5235_v49  ;;  %v5267_v49 = vsub.f32 %v5157_v43, %v1120_v45  ;;  %v1251_v32 = vmul.f32 1.442695, %v5322_v7  ;;  %v1253_v29 = vmul.f32 1.442695, %v5326_v37 }
 0x4be   : > { %2191 = vmatprep.mubr.f32.mxu0 %v5253_v63  ;;  %v1125_v63 = vmul.f32 1.442695, %v5261_v6  ;;  %v1801_v4 = vpop.xlane.xlu1 %1800 }
 0x4bf   : > { %v1129_v43 = vmul.f32 1.442695, %v5267_v49  ;;  %v5339_v0 = vsub.f32 %v5218_v51, %v1801_v4  ;;  %v5343_v40 = vsub.f32 %v5221_v5, %v1801_v4 }
 0x4c0   : > { %3697 = vpow2.f32 %v1125_v63 }
 0x4c1   : > { %2192 = vmatmul.mubr.f32.gmra.mrb[18].mxu0 %v5251_v34  ;;  %v5270_v34 = vsub.f32 %v5154_v53, %v1120_v45  ;;  %3699 = vpow2.f32 %v1127_v62  ;;  %v1810_v45 = vmul.f32 1.442695, %v5339_v0  ;;  %v1812_v5 = vmul.f32 1.442695, %v5343_v40 }
 0x4c2   : > { %3701 = vpow2.f32 %v1129_v43 }
 0x4c3   : > { %v1131_v53 = vmul.f32 1.442695, %v5270_v34 }
 0x4c5   : > { %3703 = vpow2.f32 %v1131_v53 }
 0x4c6   : > { %3705 = vpow2.f32 %v1603_v8 }
 0x4c7   : > { %3707 = vpow2.f32 %v1605_v26 }
 0x4c8   : > { %3709 = vpow2.f32 %v1607_v50 }
 0x4c9   : > { %3711 = vpow2.f32 %v1609_v59 }
 0x4ca   : > { %3713 = vpow2.f32 %v1008_v38  ;;  %v3698_v14 = vpop.eup %3697 }
 0x4cb   : > { %3715 = vpow2.f32 %v1010_v16  ;;  %v3700_v57 = vpop.eup %3699 }
 0x4cc   : > { %3717 = vpow2.f32 %v1012_v36  ;;  %v3702_v27 = vpop.eup %3701  ;;  %v1133_v44 = vadd.f32 %v3700_v57, %v3698_v14 }
 0x4cd   : > { %3719 = vpow2.f32 %v1014_v41 }
 0x4ce   : > { %3721 = vpow2.f32 %v1247_v55 }
 0x4cf   : > { %v3704_v12 = vpop.eup %3703  ;;  %3723 = vpow2.f32 %v1249_v48 }
 0x4d0   : > { %v3706_v2 = vpop.eup %3705  ;;  %3725 = vpow2.f32 %v1806_v9  ;;  %v1136_v33 = vadd.f32 %v3704_v12, %v3702_v27 }
 0x4d1   : > { %v3708_v15 = vpop.eup %3707  ;;  %3727 = vpow2.f32 %v1808_v25 }
 0x4d2   : > { %v3710_v51 = vpop.eup %3709  ;;  %3729 = vpow2.f32 %v1251_v32  ;;  %v1611_v62 = vadd.f32 %v3708_v15, %v3706_v2 }
 0x4d3   : > { %v3712_v46 = vpop.eup %3711  ;;  %3731 = vpow2.f32 %v1253_v29 }
 0x4d4   : > { %v3714_v63 = vpop.eup %3713  ;;  %3733 = vpow2.f32 %v1810_v45  ;;  %v1614_v26 = vadd.f32 %v3712_v46, %v3710_v51 }
 0x4d5   : > { %v3716_v43 = vpop.eup %3715  ;;  %3735 = vpow2.f32 %v1812_v5 }
 0x4d6   : > { %v3718_v53 = vpop.eup %3717  ;;  %v1016_v54 = vadd.f32 %v3716_v43, %v3714_v63 }
 0x4d7   : > { %v3720_v8 = vpop.eup %3719 }
 0x4d8   : > { %v1019_v28 = vadd.f32 %v3720_v8, %v3718_v53 }
 0x590   : > { %v2187_v52 = vpop.f32.mrb[16].mxu0 }
 0x591   : > { %v5330_v10 = vsel %vm2203_vm0, %v2208_v23, %v2187_v52  ;;  %v5332_v31 = vpop.f32.mrb[17].mxu0 }
 0x592   : > { %v2219_v13 = vmax.f32 %v5330_v10, %v5332_v31 }
 0x594   : > { %2220 = vmax.xlane.f32.xlu0 %v2219_v13  ;;  %v2193_v24 = vpop.f32.mrb[18].mxu0 }
 0x595   : > { %v2195_v56 = vpop.f32.mrb[19].mxu0  ;;  %v2217_v42 = vsel %vm2203_vm0, %v5258_v3, %v2193_v24  ;;  %v3722_v3 = vpop.eup %3721 }
 0x596   : > { %v2222_v23 = vmax.f32 %v2217_v42, %v2195_v56  ;;  %v3724_v50 = vpop.eup %3723 }
 0x597   : > { %v3726_v59 = vpop.eup %3725  ;;  %v1255_v38 = vadd.f32 %v3724_v50, %v3722_v3 }
 0x598   : > { %1134 = vadd.xlane.f32.xlu0 %v1133_v44  ;;  %2223 = vmax.xlane.f32.xlu1 %v2222_v23  ;;  %v3728_v39 = vpop.eup %3727 }
 0x599   : > { %v3730_v61 = vpop.eup %3729  ;;  %v1814_v41 = vadd.f32 %v3728_v39, %v3726_v59 }
 0x59a   : > { %v3732_v16 = vpop.eup %3731 }
 0x59b   : > { %v3734_v36 = vpop.eup %3733  ;;  %v1258_v55 = vadd.f32 %v3732_v16, %v3730_v61 }
 0x59c   : > { %1612 = vadd.xlane.f32.xlu0 %v1611_v62  ;;  %1137 = vadd.xlane.f32.xlu1 %v1136_v33  ;;  %v3736_v48 = vpop.eup %3735 }
 0x59d   : > { %v1817_v4 = vadd.f32 %v3736_v48, %v3734_v36 }
 0x5a0   : > { %1017 = vadd.xlane.f32.xlu0 %v1016_v54  ;;  %1615 = vadd.xlane.f32.xlu1 %v1614_v26 }
 0x5a4   : > { %1256 = vadd.xlane.f32.xlu0 %v1255_v38  ;;  %1020 = vadd.xlane.f32.xlu1 %v1019_v28 }
 0x5a8   : > { %1815 = vadd.xlane.f32.xlu0 %v1814_v41  ;;  %1259 = vadd.xlane.f32.xlu1 %v1258_v55 }
 0x5ac   : > { %1818 = vadd.xlane.f32.xlu1 %v1817_v4 }
 0x621   : > { %v2221_v14 = vpop.xlane.xlu0 %2220 }
 0x622   : > { %v5350_v52 = vsub.f32 %v5330_v10, %v2221_v14  ;;  %v5353_v9 = vsub.f32 %v5332_v31, %v2221_v14 }
 0x624   : > { %v2229_v57 = vmul.f32 1.442695, %v5350_v52  ;;  %v2231_v25 = vmul.f32 1.442695, %v5353_v9 }
 0x625   : > { %v1135_v27 = vpop.xlane.xlu0 %1134  ;;  %v2224_v13 = vpop.xlane.xlu1 %2223 }
 0x626   : > { %3737 = vpow2.f32 %v2229_v57  ;;  %v5357_v32 = vsub.f32 %v2217_v42, %v2224_v13  ;;  %v5359_v12 = vsub.f32 %v2195_v56, %v2224_v13 }
 0x627   : > { %3739 = vpow2.f32 %v2231_v25 }
 0x628   : > { %3741 = vlog2.f32 %v1135_v27  ;;  %v2233_v29 = vmul.f32 1.442695, %v5357_v32  ;;  %v2235_v10 = vmul.f32 1.442695, %v5359_v12 }
 0x629   : > { %v1613_v2 = vpop.xlane.xlu0 %1612  ;;  %v1138_v31 = vpop.xlane.xlu1 %1137 }
 0x62a   : > { %3743 = vpow2.f32 %v2233_v29 }
 0x62b   : > { %3745 = vpow2.f32 %v2235_v10 }
 0x62c   : > { %3747 = vlog2.f32 %v1613_v2 }
 0x62d   : > { %3749 = vlog2.f32 %v1138_v31  ;;  %v1018_v24 = vpop.xlane.xlu0 %1017  ;;  %v1616_v44 = vpop.xlane.xlu1 %1615 }
 0x62e   : > { %3751 = vlog2.f32 %v1018_v24 }
 0x62f   : > { %3753 = vlog2.f32 %v1616_v44 }
 0x630   : > { %v3738_v15 = vpop.eup %3737 }
 0x631   : > { %v3740_v42 = vpop.eup %3739  ;;  %v1257_v56 = vpop.xlane.xlu0 %1256 }
 0x632   : > { %v1021_v51 = vpop.xlane.xlu1 %1020  ;;  %v3742_v23 = vpop.eup %3741  ;;  %3755 = vlog2.f32 %v1257_v56  ;;  %v2237_v45 = vadd.f32 %v3740_v42, %v3738_v15 }
 0x633   : > { %v1140_v46 = vmul.f32 0.6931472, %v3742_v23  ;;  %3757 = vlog2.f32 %v1021_v51 }
 0x634   : > { %v3744_v5 = vpop.eup %3743  ;;  %2238 = vadd.xlane.f32.xlu0 %v2237_v45 }
 0x635   : > { %v3746_v63 = vpop.eup %3745  ;;  %v1143_v62 = vsub.f32 %v5261_v6, %v1140_v46  ;;  %v1144_v33 = vsub.f32 %v5264_v17, %v1140_v46  ;;  %v1816_v43 = vpop.xlane.xlu0 %1815 }
 0x636   : > { %v1260_v53 = vpop.xlane.xlu1 %1259  ;;  %v3748_v8 = vpop.eup %3747  ;;  %3759 = vlog2.f32 %v1816_v43  ;;  %v2240_v3 = vadd.f32 %v3746_v63, %v3744_v5 }
 0x637   : > { %v3750_v54 = vpop.eup %3749  ;;  %1147 = vst [vmem:[%s5366_s14] sm:$0xff] %v1143_v62  ;;  %1148 = vst [vmem:[%s5366_s14 + $0x8] sm:$0xff] %v1144_v33  ;;  %v1618_v26 = vmul.f32 0.6931472, %v3748_v8  ;;  %3761 = vlog2.f32 %v1260_v53 }
 0x638   : > { %v3752_v50 = vpop.eup %3751  ;;  %v1142_v59 = vmul.f32 0.6931472, %v3750_v54  ;;  %2241 = vadd.xlane.f32.xlu1 %v2240_v3 }
 0x639   : > { %v3754_v6 = vpop.eup %3753  ;;  %v1621_v17 = vsub.f32 %v5274_v60, %v1618_v26  ;;  %v1622_v39 = vsub.f32 %v5278_v1, %v1618_v26  ;;  %v1023_v61 = vmul.f32 0.6931472, %v3752_v50 }
 0x63a   : > { %v1819_v38 = vpop.xlane.xlu1 %1818  ;;  %v1145_v28 = vsub.f32 %v5267_v49, %v1142_v59  ;;  %v1146_v16 = vsub.f32 %v5270_v34, %v1142_v59  ;;  %v1620_v36 = vmul.f32 0.6931472, %v3754_v6 }
 0x63b   : > { %3763 = vlog2.f32 %v1819_v38  ;;  %1625 = vst [vmem:[%s5375_s29] sm:$0xff] %v1621_v17  ;;  %1626 = vst [vmem:[%s5375_s29 + $0x8] sm:$0xff] %v1622_v39  ;;  %v1026_v60 = vsub.f32 %v5290_v20, %v1023_v61  ;;  %v1027_v1 = vsub.f32 %v5294_v18, %v1023_v61 }
 0x63c   : > { %v3756_v41 = vpop.eup %3755  ;;  %1149 = vst [vmem:[%s5366_s14 + $0x10] sm:$0xff] %v1145_v28  ;;  %1150 = vst [vmem:[%s5366_s14 + $0x18] sm:$0xff] %v1146_v16  ;;  %v1623_v49 = vsub.f32 %v5281_v21, %v1620_v36  ;;  %v1624_v34 = vsub.f32 %v5285_v35, %v1620_v36  ;;  %s4185_s14 = smov [#allocation15]  }
 0x63d   : > { %v3758_v55 = vpop.eup %3757  ;;  %1030 = vst [vmem:[%s5386_s21] sm:$0xff] %v1026_v60  ;;  %1031 = vst [vmem:[%s5386_s21 + $0x8] sm:$0xff] %v1027_v1  ;;  %v1262_v20 = vmul.f32 0.6931472, %v3756_v41 }
 0x63e   : > { %1627 = vst [vmem:[%s5375_s29 + $0x10] sm:$0xff] %v1623_v49  ;;  %1628 = vst [vmem:[%s5375_s29 + $0x18] sm:$0xff] %v1624_v34  ;;  %v1025_v18 = vmul.f32 0.6931472, %v3758_v55  ;;  %s3933_s29 = sshll.u32 %s4185_s14, 4  ;;  %s3934_s29 = int_to_ptr.vmem [resolvable:$false] %s3933_s29 }
 0x63f   : > { %v1265_v48 = vsub.f32 %v5306_v30, %v1262_v20  ;;  %v1266_v21 = vsub.f32 %v5310_v47, %v1262_v20  ;;  %p3936_p4 = scmp.lt.s32.totalorder %s5418_s3, %s3934_s29 }
 0x640   : > { %v3760_v4 = vpop.eup %3759  ;;  %v1028_v35 = vsub.f32 %v5298_v22, %v1025_v18  ;;  %v1029_v14 = vsub.f32 %v5302_v58, %v1025_v18 }
 0x641   : > { %v3762_v57 = vpop.eup %3761  ;;  %1269 = vst [vmem:[%s5397_s16] sm:$0xff] %v1265_v48  ;;  %1270 = vst [vmem:[%s5397_s16 + $0x8] sm:$0xff] %v1266_v21  ;;  %v1821_v25 = vmul.f32 0.6931472, %v3760_v4 }
 0x642   : > { %1032 = vst [vmem:[%s5386_s21 + $0x10] sm:$0xff] %v1028_v35  ;;  %1033 = vst [vmem:[%s5386_s21 + $0x18] sm:$0xff] %v1029_v14  ;;  %v1264_v30 = vmul.f32 0.6931472, %v3762_v57  ;;  %s3935_s21 = scalar_lea.vmem %s3934_s29, 1024 }
 0x643   : > { %v1824_v47 = vsub.f32 %v5314_v19, %v1821_v25  ;;  %v1825_v22 = vsub.f32 %v5318_v11, %v1821_v25  ;;  %p3937_p2 = scmp.lt.s32.totalorder %s3935_s21, %s3929_s18 }
 0x644   : > { %v1267_v27 = vsub.f32 %v5322_v7, %v1264_v30  ;;  %v1268_v13 = vsub.f32 %v5326_v37, %v1264_v30 }
 0x645   : > { %v3764_v58 = vpop.eup %3763  ;;  %1828 = vst [vmem:[%s643_s27] sm:$0xff] %v1824_v47  ;;  %1829 = vst [vmem:[%s643_s27 + $0x8] sm:$0xff] %v1825_v22  ;;  %p3938_p5 = por %p3937_p2, %p3936_p4 }
 0x646   : > { %v1823_v29 = vmul.f32 0.6931472, %v3764_v58  ;;  %1271 = vst [vmem:[%s5397_s16 + $0x10] sm:$0xff] %v1267_v27  ;;  %1272 = vst [vmem:[%s5397_s16 + $0x18] sm:$0xff] %v1268_v13 }
 0x647   : > { %p3939_p11 = pnand %p3938_p5, %p3932_p1 }
 0x648   : > { %v1826_v10 = vsub.f32 %v5339_v0, %v1823_v29  ;;  %v1827_v19 = vsub.f32 %v5343_v40, %v1823_v29 }
 0x64a   : > { %1830 = vst [vmem:[%s643_s27 + $0x10] sm:$0xff] %v1826_v10  ;;  %1831 = vst [vmem:[%s643_s27 + $0x18] sm:$0xff] %v1827_v19 }
 0x64b   : > { %3942 = shalt.err (!%p3939_p11)
}
 0x64c   : > { %s3943_s25 = scalar_lea.hbm %s5433_s9, 512  ;;  %s3947_s12 = scalar_lea.hbm %s5659_s8, 1536 }
 0x64d   : > { %p3944_p6 = scmp.ne.s32.totalorder %s5433_s9, %s3943_s25  ;;  %p3948_p13 = scmp.lt.u32.totalorder %s5433_s9, %s5659_s8 }
 0x64e   : > { %p3949_p0 = scmp.lt.u32.totalorder %s3947_s12, %s3943_s25  ;;  %p3951_p8 = scmp.lt.u32.totalorder %s3943_s25, %s5433_s9 }
 0x64f   : > { %p3945_p12 = pnand %p3944_p6, %p5828_p9 }
 0x650   : > { %p3950_p7 = por %p3949_p0, %p3948_p13 }
 0x651   : > { %p3946_p3 = pneg %p3945_p12 }
 0x652   : > { %p3952_p10 = por %p3951_p8, %p3950_p7 }
 0x654   : > { %p3953_p1 = pnand %p3952_p10, %p3946_p3 }
 0x656   : > { %3956 = shalt.err (!%p3953_p1)
}
 0x657   : > { %s4186_s18 = smov 256   ;;  %s4187_s29 = smov 16  }
 0x658   : > { %3586 = dma.vmem_to_hbm [thread:$0]  (%p5828_p9), %s5418_s3, 512, %s5433_s9, %s5733_s10, %s4186_s18, %s4186_s18, %s4187_s29  }
 0x659   : > { %s5829_s16 = sld [smem:[#allocation76_spill]]  ;;  %s2271_s12 = scalar_lea.sflag [#allocation19], %s4525_s13 }
 0x65a   : > { %s3957_s17 = scalar_lea.vmem %s5416_s19, 512  ;;  %s4188_s14 = smov [#allocation18]  }
 0x65b   : > { %p3958_p4 = scmp.ne.s32.totalorder %s5416_s19, %s3957_s17  ;;  %s3961_s0 = sshll.u32 %s4188_s14, 4  ;;  %s3962_s0 = int_to_ptr.vmem [resolvable:$false] %s3961_s0 }
 0x65c   : > { %s3963_s1 = scalar_lea.vmem %s3962_s0, 1024  ;;  %p3964_p11 = scmp.lt.s32.totalorder %s5416_s19, %s3962_s0 }
 0x65d   : > { %p3959_p2 = pnand %p3958_p4, %p5828_p9  ;;  %p3965_p6 = scmp.lt.s32.totalorder %s3963_s1, %s3957_s17 }
 0x65f   : > { %s5466_s27 = scalar_lea.hbm %s5829_s16, %s5427_s28  ;;  %p3960_p5 = pneg %p3959_p2 }
 0x660   : > { %p3966_p12 = por %p3965_p6, %p3964_p11 }
 0x662   : > { %p3967_p3 = pnand %p3966_p12, %p3960_p5 }
 0x664   : > { %3970 = shalt.err (!%p3967_p3)
}
 0x665   : > { %s3971_s3 = scalar_lea.hbm %s5466_s27, 512  ;;  %s3975_s25 = scalar_lea.hbm %s5829_s16, 1536 }
 0x666   : > { %p3972_p13 = scmp.ne.s32.totalorder %s5466_s27, %s3971_s3  ;;  %p3976_p8 = scmp.lt.u32.totalorder %s5466_s27, %s5829_s16 }
 0x667   : > { %p3977_p10 = scmp.lt.u32.totalorder %s3975_s25, %s3971_s3  ;;  %p3979_p4 = scmp.lt.u32.totalorder %s3971_s3, %s5466_s27 }
 0x668   : > { %p3973_p0 = pnand %p3972_p13, %p5828_p9 }
 0x669   : > { %p3978_p1 = por %p3977_p10, %p3976_p8 }
 0x66a   : > { %p3974_p7 = pneg %p3973_p0 }
 0x66b   : > { %p3980_p2 = por %p3979_p4, %p3978_p1 }
 0x66d   : > { %p3981_p5 = pnand %p3980_p2, %p3974_p7 }
 0x66f   : > { %3984 = shalt.err (!%p3981_p5)
}
 0x670   : > { %3588 = dma.vmem_to_hbm [thread:$0]  (%p5828_p9), %s5416_s19, 512, %s5466_s27, %s2271_s12, %s4186_s18, %s4186_s18, %s4187_s29  }
 0x671   : > { %s5830_s3 = sld [smem:[#allocation74_spill]]  ;;  %s5831_s14 = sld [smem:[#allocation75_spill]] }
 0x672   : > { %s2256_s10 = scalar_lea.sflag [#allocation4], %s4511_s20  ;;  %s3985_s2 = scalar_lea.vmem %s5420_s11, 512 }
 0x673   : > { %p3986_p11 = scmp.ne.s32.totalorder %s5420_s11, %s3985_s2  ;;  %s4189_s4 = smov [#allocation14]  }
 0x674   : > { %s3989_s5 = sshll.u32 %s4189_s4, 4  ;;  %s3990_s5 = int_to_ptr.vmem [resolvable:$false] %s3989_s5 }
 0x675   : > { %p3987_p6 = pnand %p3986_p11, %p5828_p9  ;;  %s3991_s19 = scalar_lea.vmem %s3990_s5, 1024 }
 0x676   : > { %p3992_p3 = scmp.lt.s32.totalorder %s5420_s11, %s3990_s5  ;;  %p3993_p13 = scmp.lt.s32.totalorder %s3991_s19, %s3985_s2 }
 0x677   : > { %s5499_s9 = scalar_lea.hbm %s5830_s3, %s5427_s28  ;;  %s5505_s0 = scalar_lea.hbm %s5831_s14, %s5427_s28 }
 0x678   : > { %p3988_p12 = pneg %p3987_p6  ;;  %p3994_p0 = por %p3993_p13, %p3992_p3 }
 0x67a   : > { %p3995_p7 = pnand %p3994_p0, %p3988_p12 }
 0x67c   : > { %3998 = shalt.err (!%p3995_p7)
}
 0x67d   : > { %s3999_s27 = scalar_lea.hbm %s5499_s9, 512  ;;  %s4003_s4 = scalar_lea.hbm %s5830_s3, 1536 }
 0x67e   : > { %p4000_p8 = scmp.ne.s32.totalorder %s5499_s9, %s3999_s27  ;;  %p4004_p4 = scmp.lt.u32.totalorder %s5499_s9, %s5830_s3 }
 0x67f   : > { %p4005_p2 = scmp.lt.u32.totalorder %s4003_s4, %s3999_s27  ;;  %p4007_p11 = scmp.lt.u32.totalorder %s3999_s27, %s5499_s9 }
 0x680   : > { %p4001_p10 = pnand %p4000_p8, %p5828_p9 }
 0x681   : > { %p4006_p5 = por %p4005_p2, %p4004_p4 }
 0x682   : > { %p4002_p1 = pneg %p4001_p10 }
 0x683   : > { %p4008_p6 = por %p4007_p11, %p4006_p5 }
 0x685   : > { %p4009_p12 = pnand %p4008_p6, %p4002_p1 }
 0x687   : > { %4012 = shalt.err (!%p4009_p12)
}
 0x688   : > { %3585 = dma.vmem_to_hbm [thread:$0]  (%p5828_p9), %s5420_s11, 512, %s5499_s9, %s2256_s10, %s4186_s18, %s4186_s18, %s4187_s29  }
 0x689   : > { %s4013_s2 = scalar_lea.vmem %s5424_s30, 512  ;;  %s4190_s25 = smov [#allocation17]  }
 0x68a   : > { %p4014_p3 = scmp.ne.s32.totalorder %s5424_s30, %s4013_s2  ;;  %s4017_s19 = sshll.u32 %s4190_s25, 4  ;;  %s4018_s19 = int_to_ptr.vmem [resolvable:$false] %s4017_s19 }
 0x68b   : > { %s4019_s27 = scalar_lea.vmem %s4018_s19, 1024  ;;  %p4020_p7 = scmp.lt.s32.totalorder %s5424_s30, %s4018_s19 }
 0x68c   : > { %p4015_p13 = pnand %p4014_p3, %p5828_p9  ;;  %p4021_p8 = scmp.lt.s32.totalorder %s4019_s27, %s4013_s2 }
 0x68e   : > { %p4016_p0 = pneg %p4015_p13  ;;  %p4022_p10 = por %p4021_p8, %p4020_p7 }
 0x690   : > { %p4023_p1 = pnand %p4022_p10, %p4016_p0 }
 0x692   : > { %4026 = shalt.err (!%p4023_p1)
}
 0x693   : > { %s4027_s11 = scalar_lea.hbm %s5505_s0, 512  ;;  %s4031_s1 = scalar_lea.hbm %s5831_s14, 1536 }
 0x694   : > { %p4028_p4 = scmp.ne.s32.totalorder %s5505_s0, %s4027_s11  ;;  %p4032_p11 = scmp.lt.u32.totalorder %s5505_s0, %s5831_s14 }
 0x695   : > { %p4033_p6 = scmp.lt.u32.totalorder %s4031_s1, %s4027_s11  ;;  %p4035_p3 = scmp.lt.u32.totalorder %s4027_s11, %s5505_s0 }
 0x696   : > { %p4029_p2 = pnand %p4028_p4, %p5828_p9 }
 0x697   : > { %p4034_p12 = por %p4033_p6, %p4032_p11 }
 0x698   : > { %p4030_p5 = pneg %p4029_p2 }
 0x699   : > { %p4036_p13 = por %p4035_p3, %p4034_p12 }
 0x69b   : > { %p4037_p0 = pnand %p4036_p13, %p4030_p5 }
 0x69d   : > { %4040 = shalt.err (!%p4037_p0)
}
 0x69e   : > { %s5832_s21 = scalar_lea.sflag [#allocation16], %s4525_s13  ;;  %s5833_s25 = sld [smem:[#allocation77_spill]] }
 0x69f   : > { %3587 = dma.vmem_to_hbm [thread:$0]  (%p5828_p9), %s5424_s30, 512, %s5505_s0, %s5832_s21, %s4186_s18, %s4186_s18, %s4187_s29  }
 0x6a0   : > { %s4041_s27 = scalar_lea.vmem %s5422_s7, 512  ;;  %s4191_s11 = smov [#allocation20]  }
 0x6a1   : > { %p4042_p7 = scmp.ne.s32.totalorder %s5422_s7, %s4041_s27  ;;  %s4045_s10 = sshll.u32 %s4191_s11, 4  ;;  %s4046_s10 = int_to_ptr.vmem [resolvable:$false] %s4045_s10 }
 0x6a2   : > { %s4047_s9 = scalar_lea.vmem %s4046_s10, 1024  ;;  %p4048_p1 = scmp.lt.s32.totalorder %s5422_s7, %s4046_s10 }
 0x6a3   : > { %p4043_p8 = pnand %p4042_p7, %p5828_p9  ;;  %p4049_p4 = scmp.lt.s32.totalorder %s4047_s9, %s4041_s27 }
 0x6a4   : > { %s5564_s19 = scalar_lea.hbm %s5833_s25, %s5427_s28 }
 0x6a5   : > { %p4044_p10 = pneg %p4043_p8  ;;  %p4050_p2 = por %p4049_p4, %p4048_p1 }
 0x6a7   : > { %p4051_p5 = pnand %p4050_p2, %p4044_p10 }
 0x6a9   : > { %4054 = shalt.err (!%p4051_p5)
}
 0x6aa   : > { %s4055_s30 = scalar_lea.hbm %s5564_s19, 512  ;;  %s4059_s17 = scalar_lea.hbm %s5833_s25, 1536 }
 0x6ab   : > { %p4056_p11 = scmp.ne.s32.totalorder %s5564_s19, %s4055_s30  ;;  %p4060_p3 = scmp.lt.u32.totalorder %s5564_s19, %s5833_s25 }
 0x6ac   : > { %p4061_p13 = scmp.lt.u32.totalorder %s4059_s17, %s4055_s30  ;;  %p4063_p7 = scmp.lt.u32.totalorder %s4055_s30, %s5564_s19 }
 0x6ad   : > { %p4057_p6 = pnand %p4056_p11, %p5828_p9 }
 0x6ae   : > { %p4062_p0 = por %p4061_p13, %p4060_p3 }
 0x6af   : > { %p4058_p12 = pneg %p4057_p6 }
 0x6b0   : > { %p4064_p8 = por %p4063_p7, %p4062_p0 }
 0x6b2   : > { %p4065_p10 = pnand %p4064_p8, %p4058_p12 }
 0x6b4   : > { %4068 = shalt.err (!%p4065_p10)
}
 0x6b5   : > { %3589 = dma.vmem_to_hbm [thread:$0]  (%p5828_p9), %s5422_s7, 512, %s5564_s19, %s2271_s12, %s4186_s18, %s4186_s18, %s4187_s29  }
 0x6b6   : > { %s664_s5 = scalar_lea.vmem [#allocation21], %s4514_s26  ;;  %s5834_s7 = sld [smem:[#allocation78_spill]] }
 0x6b7   : > { %s2380_s2 = sshll.u32 %s664_s5, 4  ;;  %s2281_s19 = scalar_lea.sflag [#allocation22], %s4511_s20  ;;  %s5595_s2 = int_to_ptr.vmem [resolvable:$true] %s2380_s2 }
 0x6b8   : > { %s4069_s27 = scalar_lea.vmem %s5595_s2, 512  ;;  %s4192_s11 = smov [#allocation21]  }
 0x6b9   : > { %p4070_p1 = scmp.ne.s32.totalorder %s5595_s2, %s4069_s27  ;;  %s4073_s10 = sshll.u32 %s4192_s11, 4  ;;  %s4074_s10 = int_to_ptr.vmem [resolvable:$false] %s4073_s10 }
 0x6ba   : > { %s4075_s9 = scalar_lea.vmem %s4074_s10, 1024  ;;  %p4076_p5 = scmp.lt.s32.totalorder %s5595_s2, %s4074_s10 }
 0x6bb   : > { %p4071_p4 = pnand %p4070_p1, %p5828_p9  ;;  %p4077_p11 = scmp.lt.s32.totalorder %s4075_s9, %s4069_s27 }
 0x6bc   : > { %s5603_s12 = scalar_lea.hbm %s5834_s7, %s5427_s28 }
 0x6bd   : > { %p4072_p2 = pneg %p4071_p4  ;;  %p4078_p6 = por %p4077_p11, %p4076_p5 }
 0x6bf   : > { %p4079_p12 = pnand %p4078_p6, %p4072_p2 }
 0x6c1   : > { %v2239_v11 = vpop.xlane.xlu0 %2238 }
 0x6c2   : > { %3765 = vlog2.f32 %v2239_v11 }
 0x6c5   : > { %v2242_v7 = vpop.xlane.xlu1 %2241 }
 0x6c6   : > { %3767 = vlog2.f32 %v2242_v7 }
 0x6cc   : > { %v3766_v37 = vpop.eup %3765 }
 0x6cd   : > { %v2244_v0 = vmul.f32 0.6931472, %v3766_v37 }
 0x6cf   : > { %v2247_v40 = vsub.f32 %v5350_v52, %v2244_v0  ;;  %v2248_v2 = vsub.f32 %v5353_v9, %v2244_v0 }
 0x6d0   : > { %v3768_v31 = vpop.eup %3767 }
 0x6d1   : > { %2251 = vst [vmem:[%s664_s5] sm:$0xff] %v2247_v40  ;;  %2252 = vst [vmem:[%s664_s5 + $0x8] sm:$0xff] %v2248_v2  ;;  %v2246_v24 = vmul.f32 0.6931472, %v3768_v31 }
 0x6d3   : > { %v2249_v44 = vsub.f32 %v5357_v32, %v2246_v24  ;;  %v2250_v15 = vsub.f32 %v5359_v12, %v2246_v24 }
 0x6d5   : > { %2253 = vst [vmem:[%s664_s5 + $0x10] sm:$0xff] %v2249_v44  ;;  %2254 = vst [vmem:[%s664_s5 + $0x18] sm:$0xff] %v2250_v15 }
 0x6d6   : > { %4082 = shalt.err (!%p4079_p12)
}
 0x6d7   : > { %s4083_s28 = scalar_lea.hbm %s5603_s12, 512  ;;  %s4087_s1 = scalar_lea.hbm %s5834_s7, 1536 }
 0x6d8   : > { %p4084_p3 = scmp.ne.s32.totalorder %s5603_s12, %s4083_s28  ;;  %p4088_p7 = scmp.lt.u32.totalorder %s5603_s12, %s5834_s7 }
 0x6d9   : > { %p4089_p8 = scmp.lt.u32.totalorder %s4087_s1, %s4083_s28  ;;  %p4091_p1 = scmp.lt.u32.totalorder %s4083_s28, %s5603_s12 }
 0x6da   : > { %p4085_p13 = pnand %p4084_p3, %p5828_p9 }
 0x6db   : > { %p4090_p10 = por %p4089_p8, %p4088_p7 }
 0x6dc   : > { %p4086_p0 = pneg %p4085_p13 }
 0x6dd   : > { %p4092_p4 = por %p4091_p1, %p4090_p10 }
 0x6df   : > { %p4093_p2 = pnand %p4092_p4, %p4086_p0 }
 0x6e1   : > { %4096 = shalt.err (!%p4093_p2)
}
 0x6e2   : > { %3590 = dma.vmem_to_hbm [thread:$0]  (%p5828_p9), %s5595_s2, 512, %s5603_s12, %s2281_s19, %s4186_s18, %s4186_s18, %s4187_s29  }
 0x6e3 PF: > { %s5835_s21 = sld [smem:[#allocation37_spill]]  ;;  %s5836_s5 = sld [smem:[#allocation40_spill]] }
 0x6e4   : > { %p3637_p5 = scmp.ge.s32.totalorder %s4159_s24, 2 }
 0x6e9   : > { %s2395_s26 = sand.u32 1, %s5835_s21   ;;  %p5837_p11 = scmp.ne.s32.totalorder %s5836_s5, 0 }
 0x6ea   : > { %s2396_s13 = scalar_lea.sflag [#allocation4], %s2395_s26 }
 0x6eb   : > { %p3611_p6 = pnand %p3637_p5, %p5837_p11 }
 0x6ed   : > { %4130 = dma.done.wait (!%p3611_p6), %s2396_s13, 512  }
 0x6ee   : > { %4132 = vsyncadd (!%p3611_p6), %s2396_s13, 4294966784  ;;  %s5838_s15 = sadd.s32 4294967294, %s4159_s24  }
 0x6ef   : > { %s2404_s27 = sand.u32 1, %s5838_s15  }
 0x6f0   : > { %s2405_s11 = scalar_lea.sflag [#allocation16], %s2404_s27 }
 0x6f1   : > { %4134 = dma.done.wait (!%p3611_p6), %s2405_s11, 1024  }
 0x6f2   : > { %4136 = vsyncadd (!%p3611_p6), %s2405_s11, 4294966272  ;;  %s2423_s20 = scalar_lea.sflag [#allocation19], %s2404_s27 }
 0x6f3   : > { %4138 = dma.done.wait (!%p3611_p6), %s2423_s20, 1024  }
 0x6f4   : > { %4140 = vsyncadd (!%p3611_p6), %s2423_s20, 4294966272  ;;  %s2441_s18 = scalar_lea.sflag [#allocation22], %s2395_s26 }
 0x6f5   : > { %4142 = dma.done.wait (!%p3611_p6), %s2441_s18, 512  }
 0x6f6   : > { %4144 = vsyncadd (!%p3611_p6), %s2441_s18, 4294966784  ;;  %s5839_s24 = sld [smem:[#allocation38_spill]]  ;;  %s5840_s29 = sld [smem:[#allocation39_spill]] }
 0x6f7   : > { %s5841_s21 = smov %s4151_s22  ;;  %s5842_s22 = smov %s4155_s23 }
 0x6fc   : > { %p40_p9 = scmp.ge.s32.totalorder %s5839_s24, 5   ;;  %s5843_s23 = smov %s5840_s29 }
 0x6fe   :  { %42 = sbr.rel (!%p40_p9) target bundleno = 27 (0x1b), region = 226 }
 0x705   :  { %2446 = vsyncpa [#allocation3], 1 }
 0x706   :  { %2448 = vsyncpa [#allocation3 + $0x1], 1 }
 0x707   :  { %2449 = vsyncpa [#allocation6], 1 }
 0x708   :  { %2451 = vsyncpa [#allocation6 + $0x1], 1 }
 0x709   :  { %2452 = vsyncpa [#allocation9], 1 }
 0x70a   :  { %2453 = vsyncpa [#allocation12], 1 }
 0x70b   :  { %2454 = vsyncpa [#allocation4], 1 }
 0x70c   :  { %2456 = vsyncpa [#allocation4 + $0x1], 1 }
 0x70d   :  { %2457 = vsyncpa [#allocation16], 1 }
 0x70e   :  { %2459 = vsyncpa [#allocation16 + $0x1], 1 }
 0x70f   :  { %2460 = vsyncpa [#allocation19], 1 }
 0x710   :  { %2462 = vsyncpa [#allocation19 + $0x1], 1 }
 0x711   :  { %2463 = vsyncpa [#allocation22], 1 }
 0x712   :  { %2465 = vsyncpa [#allocation22 + $0x1], 1 }

</bundles_post_ra>
